<compile_context>
chip_gen: v7x
topology: tpu7x:2x2x1
jax: 0.10.0
libtpu: 0.0.40
codegen_flags: <defaults>
</compile_context>

<pallas_src>
from functools import partial

import jax
import jax.numpy as jnp
from jax import lax
from jax.experimental import pallas as pl
from jax.experimental.pallas import tpu as pltpu


# --------------------------------------------------------------------------- #
# Fully fused kernel: maxpool -> conv1 -> BN1 -> ReLU -> conv2 -> BN2 -> ReLU  #
# --------------------------------------------------------------------------- #
def _down_fused_kernel(x_ref, w1_ref, b1_ref, g1_ref, be1_ref,
                       w2_ref, b2_ref, g2_ref, be2_ref,
                       out_ref, pad1_ref, pad2_ref, *, eps):
    N, H, W, Cin = x_ref.shape
    Hp, Wp = H // 2, W // 2
    M = N * Hp * Wp
    Cmid = w1_ref.shape[-1]
    Cout = w2_ref.shape[-1]
    inv_m = 1.0 / M

    # ---- 2x2 max pool, written directly into conv1's zero-halo scratch -----
    pad1_ref[...] = jnp.zeros_like(pad1_ref)          # zeroed exactly once
    for n in range(N):                                # static unroll, N small
        xn = x_ref[n].reshape(Hp, 2, Wp, 2, Cin)
        pooled = jnp.max(jnp.max(xn, axis=3), axis=1)          # (Hp, Wp, Cin)
        pad1_ref[n:n + 1, 1:Hp + 1, 1:Wp + 1, :] = pooled[None]

    # ---- conv1: 9 accumulating MXU dots (no im2col concat, no 9x buffer) ---
    acc1 = None
    for k in range(9):
        dy, dx = divmod(k, 3)
        tap = pad1_ref[:, dy:dy + Hp, dx:dx + Wp, :].reshape(M, Cin)
        d = jnp.dot(tap, w1_ref[k], preferred_element_type=jnp.float32)
        acc1 = d if acc1 is None else acc1 + d
    acc1 = acc1 + b1_ref[...]                                   # (M, Cmid)

    # ---- BN1 (batch stats over whole batch, two-pass) + ReLU ---------------
    mean1 = jnp.sum(acc1, axis=0, keepdims=True) * inv_m        # (1, Cmid)
    cen1 = acc1 - mean1
    var1 = jnp.sum(cen1 * cen1, axis=0, keepdims=True) * inv_m
    a1 = jnp.maximum(cen1 * (g1_ref[...] * lax.rsqrt(var1 + eps))
                     + be1_ref[...], 0.0)                       # (M, Cmid)

    # ---- conv2 over BN1+ReLU activation (never leaves VMEM) ----------------
    pad2_ref[...] = jnp.zeros_like(pad2_ref)
    pad2_ref[:, 1:Hp + 1, 1:Wp + 1, :] = a1.reshape(N, Hp, Wp, Cmid)

    acc2 = None
    for k in range(9):
        dy, dx = divmod(k, 3)
        tap = pad2_ref[:, dy:dy + Hp, dx:dx + Wp, :].reshape(M, Cmid)
        d = jnp.dot(tap, w2_ref[k], preferred_element_type=jnp.float32)
        acc2 = d if acc2 is None else acc2 + d
    acc2 = acc2 + b2_ref[...]                                   # (M, Cout)

    # ---- BN2 + ReLU + single output store -----------------------------------
    mean2 = jnp.sum(acc2, axis=0, keepdims=True) * inv_m
    cen2 = acc2 - mean2
    var2 = jnp.sum(cen2 * cen2, axis=0, keepdims=True) * inv_m
    y = jnp.maximum(cen2 * (g2_ref[...] * lax.rsqrt(var2 + eps))
                    + be2_ref[...], 0.0)
    out_ref[...] = y.reshape(N, Hp * Wp, Cout).astype(out_ref.dtype)


# --------------------------------------------------------------------------- #
# Wrapper                                                                      #
# --------------------------------------------------------------------------- #
def down_forward(x_nchw, params, eps=1e-5):
    """params: [(w1_hwio, b1, gamma1, beta1), (w2_hwio, b2, gamma2, beta2)]."""
    (w1, b1, g1, be1), (w2, b2, g2, be2) = params
    N, Cin, H, W = x_nchw.shape
    assert H % 2 == 0 and W % 2 == 0, "MaxPool2d(2) requires even H and W"
    Cmid = w1.shape[-1]
    Cout = w2.shape[-1]
    Hp, Wp = H // 2, W // 2
    P = Hp * Wp

    x = jnp.transpose(x_nchw, (0, 2, 3, 1)).astype(jnp.float32)  # NCHW -> NHWC

    y = pl.pallas_call(
        partial(_down_fused_kernel, eps=eps),
        out_shape=jax.ShapeDtypeStruct((N, P, Cout), jnp.float32),
        grid=(1,),
        in_specs=[
            pl.BlockSpec((N, H, W, Cin), lambda i: (0, 0, 0, 0)),
            pl.BlockSpec((9, Cin, Cmid), lambda i: (0, 0, 0)),
            pl.BlockSpec((1, Cmid), lambda i: (0, 0)),
            pl.BlockSpec((1, Cmid), lambda i: (0, 0)),
            pl.BlockSpec((1, Cmid), lambda i: (0, 0)),
            pl.BlockSpec((9, Cmid, Cout), lambda i: (0, 0, 0)),
            pl.BlockSpec((1, Cout), lambda i: (0, 0)),
            pl.BlockSpec((1, Cout), lambda i: (0, 0)),
            pl.BlockSpec((1, Cout), lambda i: (0, 0)),
        ],
        out_specs=pl.BlockSpec((N, P, Cout), lambda i: (0, 0, 0)),
        scratch_shapes=[
            pltpu.VMEM((N, Hp + 2, Wp + 2, Cin), jnp.float32),
            pltpu.VMEM((N, Hp + 2, Wp + 2, Cmid), jnp.float32),
        ],
        compiler_params=pltpu.CompilerParams(
            dimension_semantics=("arbitrary",)),
    )(x,
      w1.reshape(9, Cin, Cmid).astype(jnp.float32),
      b1.reshape(1, Cmid).astype(jnp.float32),
      g1.reshape(1, Cmid).astype(jnp.float32),
      be1.reshape(1, Cmid).astype(jnp.float32),
      w2.reshape(9, Cmid, Cout).astype(jnp.float32),
      b2.reshape(1, Cout).astype(jnp.float32),
      g2.reshape(1, Cout).astype(jnp.float32),
      be2.reshape(1, Cout).astype(jnp.float32))

    out = y.reshape(N, Hp, Wp, Cout)
    return jnp.transpose(out, (0, 3, 1, 2))          # NHWC -> NCHW


# --------------------------------------------------------------- JAX reference
def _ref_forward(x, params, eps=1e-5):
    N, C, H, W = x.shape
    y = x.reshape(N, C, H // 2, 2, W // 2, 2).max(axis=(3, 5))
    for (w, b, gamma, beta) in params:
        w_oihw = jnp.transpose(w, (3, 2, 0, 1))
        y = lax.conv_general_dilated(y, w_oihw, (1, 1), 'SAME',
                                     dimension_numbers=('NCHW', 'OIHW', 'NCHW'))
        y = y + b[None, :, None, None]
        mean = y.mean(axis=(0, 2, 3), keepdims=True)
        var = ((y - mean) ** 2).mean(axis=(0, 2, 3), keepdims=True)
        y = (y - mean) * lax.rsqrt(var + eps) * gamma[None, :, None, None] \
            + beta[None, :, None, None]
        y = jnp.maximum(y, 0.0)
    return y


if __name__ == "__main__":
    key = jax.random.PRNGKey(0)
    N, in_ch, out_ch, H, W = 2, 4, 8, 16, 16
    ks = jax.random.split(key, 9)

    x = jax.random.normal(ks[0], (N, in_ch, H, W), jnp.float32)

    # deterministic synthetic parameters (conv weights stored HWIO)
    w1 = 0.2 * jax.random.normal(ks[1], (3, 3, in_ch, out_ch), jnp.float32)
    b1 = 0.1 * jax.random.normal(ks[2], (out_ch,), jnp.float32)
    g1 = 1.0 + 0.1 * jax.random.normal(ks[3], (out_ch,), jnp.float32)
    be1 = 0.1 * jax.random.normal(ks[4], (out_ch,), jnp.float32)
    w2 = 0.2 * jax.random.normal(ks[5], (3, 3, out_ch, out_ch), jnp.float32)
    b2 = 0.1 * jax.random.normal(ks[6], (out_ch,), jnp.float32)
    g2 = 1.0 + 0.1 * jax.random.normal(ks[7], (out_ch,), jnp.float32)
    be2 = 0.1 * jax.random.normal(ks[8], (out_ch,), jnp.float32)

    params = [(w1, b1, g1, be1), (w2, b2, g2, be2)]

    out = down_forward(x, params)
    out = jax.block_until_ready(out)
    assert out.shape == (N, out_ch, H // 2, W // 2), out.shape

    ref = _ref_forward(x, params)
    assert jnp.allclose(out, ref, atol=2e-3, rtol=2e-3), \
        float(jnp.max(jnp.abs(out - ref)))

    print("KERNEL_OK")
</pallas_src>

<mosaic_0001>
module attributes {stable_mosaic.version = 11 : i64} {
  func.func @_down_fused_kernel(%arg0: i32, %arg1: memref<2x16x16x4xf32, #tpu.memory_space<vmem>>, %arg2: memref<9x4x8xf32, #tpu.memory_space<vmem>>, %arg3: memref<1x8xf32, #tpu.memory_space<vmem>>, %arg4: memref<1x8xf32, #tpu.memory_space<vmem>>, %arg5: memref<1x8xf32, #tpu.memory_space<vmem>>, %arg6: memref<9x8x8xf32, #tpu.memory_space<vmem>>, %arg7: memref<1x8xf32, #tpu.memory_space<vmem>>, %arg8: memref<1x8xf32, #tpu.memory_space<vmem>>, %arg9: memref<1x8xf32, #tpu.memory_space<vmem>>, %arg10: memref<2x64x8xf32, #tpu.memory_space<vmem>>, %arg11: memref<2x10x10x4xf32, #tpu.memory_space<vmem>>, %arg12: memref<2x10x10x8xf32, #tpu.memory_space<vmem>>) attributes {dimension_semantics = [#tpu.dimension_semantics<arbitrary>], iteration_bounds = array<i64: 1>, scalar_prefetch = 0 : i64, scratch_operands = 2 : i64, tpu.core_type = #tpu.core_type<tc>, window_params = [{pipeline_mode = #tpu.pipeline_mode<synchronous>, transform_indices = @transform_0, window_bounds = array<i64: 2, 16, 16, 4>}, {pipeline_mode = #tpu.pipeline_mode<synchronous>, transform_indices = @transform_1, window_bounds = array<i64: 9, 4, 8>}, {pipeline_mode = #tpu.pipeline_mode<synchronous>, transform_indices = @transform_2, window_bounds = array<i64: 1, 8>}, {pipeline_mode = #tpu.pipeline_mode<synchronous>, transform_indices = @transform_3, window_bounds = array<i64: 1, 8>}, {pipeline_mode = #tpu.pipeline_mode<synchronous>, transform_indices = @transform_4, window_bounds = array<i64: 1, 8>}, {pipeline_mode = #tpu.pipeline_mode<synchronous>, transform_indices = @transform_5, window_bounds = array<i64: 9, 8, 8>}, {pipeline_mode = #tpu.pipeline_mode<synchronous>, transform_indices = @transform_6, window_bounds = array<i64: 1, 8>}, {pipeline_mode = #tpu.pipeline_mode<synchronous>, transform_indices = @transform_7, window_bounds = array<i64: 1, 8>}, {pipeline_mode = #tpu.pipeline_mode<synchronous>, transform_indices = @transform_8, window_bounds = array<i64: 1, 8>}, {pipeline_mode = #tpu.pipeline_mode<synchronous>, transform_indices = @transform_9, window_bounds = array<i64: 2, 64, 8>}]} {
    %cst = arith.constant 0.000000e+00 : f32
    %0 = vector.broadcast %cst : f32 to vector<2x10x10x4xf32>
    %c0 = arith.constant 0 : index
    %c0_0 = arith.constant 0 : index
    %c0_1 = arith.constant 0 : index
    %c0_2 = arith.constant 0 : index
    %1 = vector.load %arg11[%c0, %c0_0, %c0_1, %c0_2] : memref<2x10x10x4xf32, #tpu.memory_space<vmem>>, vector<2x10x10x4xf32>
    tpu.vector_store %arg11[%c0, %c0_0, %c0_1, %c0_2], %0 {strides = array<i32>} : memref<2x10x10x4xf32, #tpu.memory_space<vmem>>, vector<2x10x10x4xf32>,
    %c0_3 = arith.constant 0 : index
    %c0_4 = arith.constant 0 : index
    %c0_5 = arith.constant 0 : index
    %c0_6 = arith.constant 0 : index
    %2 = vector.load %arg1[%c0_3, %c0_4, %c0_5, %c0_6] : memref<2x16x16x4xf32, #tpu.memory_space<vmem>>, vector<1x16x16x4xf32>
    %3 = vector.shape_cast %2 : vector<1x16x16x4xf32> to vector<16x16x4xf32>
    %4 = vector.shape_cast %3 : vector<16x16x4xf32> to vector<8x2x8x2x4xf32>
    %cst_7 = arith.constant dense<0xFF800000> : vector<8x2x8x4xf32>
    %5 = vector.multi_reduction <maximumf>, %4, %cst_7 [3] : vector<8x2x8x2x4xf32> to vector<8x2x8x4xf32>
    %cst_8 = arith.constant dense<0xFF800000> : vector<8x8x4xf32>
    %6 = vector.multi_reduction <maximumf>, %5, %cst_8 [1] : vector<8x2x8x4xf32> to vector<8x8x4xf32>
    %7 = vector.shape_cast %6 : vector<8x8x4xf32> to vector<1x8x8x4xf32>
    %c0_9 = arith.constant 0 : index
    %c1 = arith.constant 1 : index
    %c1_10 = arith.constant 1 : index
    %c0_11 = arith.constant 0 : index
    %8 = vector.load %arg11[%c0_9, %c1, %c1_10, %c0_11] : memref<2x10x10x4xf32, #tpu.memory_space<vmem>>, vector<1x8x8x4xf32>
    tpu.vector_store %arg11[%c0_9, %c1, %c1_10, %c0_11], %7 {strides = array<i32>} : memref<2x10x10x4xf32, #tpu.memory_space<vmem>>, vector<1x8x8x4xf32>,
    %c1_12 = arith.constant 1 : index
    %c0_13 = arith.constant 0 : index
    %c0_14 = arith.constant 0 : index
    %c0_15 = arith.constant 0 : index
    %9 = vector.load %arg1[%c1_12, %c0_13, %c0_14, %c0_15] : memref<2x16x16x4xf32, #tpu.memory_space<vmem>>, vector<1x16x16x4xf32>
    %10 = vector.shape_cast %9 : vector<1x16x16x4xf32> to vector<16x16x4xf32>
    %11 = vector.shape_cast %10 : vector<16x16x4xf32> to vector<8x2x8x2x4xf32>
    %cst_16 = arith.constant dense<0xFF800000> : vector<8x2x8x4xf32>
    %12 = vector.multi_reduction <maximumf>, %11, %cst_16 [3] : vector<8x2x8x2x4xf32> to vector<8x2x8x4xf32>
    %cst_17 = arith.constant dense<0xFF800000> : vector<8x8x4xf32>
    %13 = vector.multi_reduction <maximumf>, %12, %cst_17 [1] : vector<8x2x8x4xf32> to vector<8x8x4xf32>
    %14 = vector.shape_cast %13 : vector<8x8x4xf32> to vector<1x8x8x4xf32>
    %c1_18 = arith.constant 1 : index
    %c1_19 = arith.constant 1 : index
    %c1_20 = arith.constant 1 : index
    %c0_21 = arith.constant 0 : index
    %15 = vector.load %arg11[%c1_18, %c1_19, %c1_20, %c0_21] : memref<2x10x10x4xf32, #tpu.memory_space<vmem>>, vector<1x8x8x4xf32>
    tpu.vector_store %arg11[%c1_18, %c1_19, %c1_20, %c0_21], %14 {strides = array<i32>} : memref<2x10x10x4xf32, #tpu.memory_space<vmem>>, vector<1x8x8x4xf32>,
    %c0_22 = arith.constant 0 : index
    %c0_23 = arith.constant 0 : index
    %c0_24 = arith.constant 0 : index
    %c0_25 = arith.constant 0 : index
    %16 = vector.load %arg11[%c0_22, %c0_23, %c0_24, %c0_25] : memref<2x10x10x4xf32, #tpu.memory_space<vmem>>, vector<2x8x8x4xf32>
    %17 = vector.shape_cast %16 : vector<2x8x8x4xf32> to vector<128x4xf32>
    %c0_26 = arith.constant 0 : index
    %c0_27 = arith.constant 0 : index
    %c0_28 = arith.constant 0 : index
    %18 = vector.load %arg2[%c0_26, %c0_27, %c0_28] : memref<9x4x8xf32, #tpu.memory_space<vmem>>, vector<1x4x8xf32>
    %19 = vector.shape_cast %18 : vector<1x4x8xf32> to vector<4x8xf32>
    %cst_29 = arith.constant dense<0.000000e+00> : vector<128x8xf32>
    %20 = tpu.matmul %17, %19, %cst_29 {dimension_numbers = #tpu.dot_dimension_numbers<[1], [0], [0], [1], [0, 0, 1, 1], [], []>} : vector<128x4xf32>, vector<4x8xf32>, vector<128x8xf32> -> vector<128x8xf32>
    %c0_30 = arith.constant 0 : index
    %c0_31 = arith.constant 0 : index
    %c1_32 = arith.constant 1 : index
    %c0_33 = arith.constant 0 : index
    %21 = vector.load %arg11[%c0_30, %c0_31, %c1_32, %c0_33] : memref<2x10x10x4xf32, #tpu.memory_space<vmem>>, vector<2x8x8x4xf32>
    %22 = vector.shape_cast %21 : vector<2x8x8x4xf32> to vector<128x4xf32>
    %c1_34 = arith.constant 1 : index
    %c0_35 = arith.constant 0 : index
    %c0_36 = arith.constant 0 : index
    %23 = vector.load %arg2[%c1_34, %c0_35, %c0_36] : memref<9x4x8xf32, #tpu.memory_space<vmem>>, vector<1x4x8xf32>
    %24 = vector.shape_cast %23 : vector<1x4x8xf32> to vector<4x8xf32>
    %cst_37 = arith.constant dense<0.000000e+00> : vector<128x8xf32>
    %25 = tpu.matmul %22, %24, %cst_37 {dimension_numbers = #tpu.dot_dimension_numbers<[1], [0], [0], [1], [0, 0, 1, 1], [], []>} : vector<128x4xf32>, vector<4x8xf32>, vector<128x8xf32> -> vector<128x8xf32>
    %26 = arith.addf %20, %25 : vector<128x8xf32>
    %c0_38 = arith.constant 0 : index
    %c0_39 = arith.constant 0 : index
    %c2 = arith.constant 2 : index
    %c0_40 = arith.constant 0 : index
    %27 = vector.load %arg11[%c0_38, %c0_39, %c2, %c0_40] : memref<2x10x10x4xf32, #tpu.memory_space<vmem>>, vector<2x8x8x4xf32>
    %28 = vector.shape_cast %27 : vector<2x8x8x4xf32> to vector<128x4xf32>
    %c2_41 = arith.constant 2 : index
    %c0_42 = arith.constant 0 : index
    %c0_43 = arith.constant 0 : index
    %29 = vector.load %arg2[%c2_41, %c0_42, %c0_43] : memref<9x4x8xf32, #tpu.memory_space<vmem>>, vector<1x4x8xf32>
    %30 = vector.shape_cast %29 : vector<1x4x8xf32> to vector<4x8xf32>
    %cst_44 = arith.constant dense<0.000000e+00> : vector<128x8xf32>
    %31 = tpu.matmul %28, %30, %cst_44 {dimension_numbers = #tpu.dot_dimension_numbers<[1], [0], [0], [1], [0, 0, 1, 1], [], []>} : vector<128x4xf32>, vector<4x8xf32>, vector<128x8xf32> -> vector<128x8xf32>
    %32 = arith.addf %26, %31 : vector<128x8xf32>
    %c0_45 = arith.constant 0 : index
    %c1_46 = arith.constant 1 : index
    %c0_47 = arith.constant 0 : index
    %c0_48 = arith.constant 0 : index
    %33 = vector.load %arg11[%c0_45, %c1_46, %c0_47, %c0_48] : memref<2x10x10x4xf32, #tpu.memory_space<vmem>>, vector<2x8x8x4xf32>
    %34 = vector.shape_cast %33 : vector<2x8x8x4xf32> to vector<128x4xf32>
    %c3 = arith.constant 3 : index
    %c0_49 = arith.constant 0 : index
    %c0_50 = arith.constant 0 : index
    %35 = vector.load %arg2[%c3, %c0_49, %c0_50] : memref<9x4x8xf32, #tpu.memory_space<vmem>>, vector<1x4x8xf32>
    %36 = vector.shape_cast %35 : vector<1x4x8xf32> to vector<4x8xf32>
    %cst_51 = arith.constant dense<0.000000e+00> : vector<128x8xf32>
    %37 = tpu.matmul %34, %36, %cst_51 {dimension_numbers = #tpu.dot_dimension_numbers<[1], [0], [0], [1], [0, 0, 1, 1], [], []>} : vector<128x4xf32>, vector<4x8xf32>, vector<128x8xf32> -> vector<128x8xf32>
    %38 = arith.addf %32, %37 : vector<128x8xf32>
    %c0_52 = arith.constant 0 : index
    %c1_53 = arith.constant 1 : index
    %c1_54 = arith.constant 1 : index
    %c0_55 = arith.constant 0 : index
    %39 = vector.load %arg11[%c0_52, %c1_53, %c1_54, %c0_55] : memref<2x10x10x4xf32, #tpu.memory_space<vmem>>, vector<2x8x8x4xf32>
    %40 = vector.shape_cast %39 : vector<2x8x8x4xf32> to vector<128x4xf32>
    %c4 = arith.constant 4 : index
    %c0_56 = arith.constant 0 : index
    %c0_57 = arith.constant 0 : index
    %41 = vector.load %arg2[%c4, %c0_56, %c0_57] : memref<9x4x8xf32, #tpu.memory_space<vmem>>, vector<1x4x8xf32>
    %42 = vector.shape_cast %41 : vector<1x4x8xf32> to vector<4x8xf32>
    %cst_58 = arith.constant dense<0.000000e+00> : vector<128x8xf32>
    %43 = tpu.matmul %40, %42, %cst_58 {dimension_numbers = #tpu.dot_dimension_numbers<[1], [0], [0], [1], [0, 0, 1, 1], [], []>} : vector<128x4xf32>, vector<4x8xf32>, vector<128x8xf32> -> vector<128x8xf32>
    %44 = arith.addf %38, %43 : vector<128x8xf32>
    %c0_59 = arith.constant 0 : index
    %c1_60 = arith.constant 1 : index
    %c2_61 = arith.constant 2 : index
    %c0_62 = arith.constant 0 : index
    %45 = vector.load %arg11[%c0_59, %c1_60, %c2_61, %c0_62] : memref<2x10x10x4xf32, #tpu.memory_space<vmem>>, vector<2x8x8x4xf32>
    %46 = vector.shape_cast %45 : vector<2x8x8x4xf32> to vector<128x4xf32>
    %c5 = arith.constant 5 : index
    %c0_63 = arith.constant 0 : index
    %c0_64 = arith.constant 0 : index
    %47 = vector.load %arg2[%c5, %c0_63, %c0_64] : memref<9x4x8xf32, #tpu.memory_space<vmem>>, vector<1x4x8xf32>
    %48 = vector.shape_cast %47 : vector<1x4x8xf32> to vector<4x8xf32>
    %cst_65 = arith.constant dense<0.000000e+00> : vector<128x8xf32>
    %49 = tpu.matmul %46, %48, %cst_65 {dimension_numbers = #tpu.dot_dimension_numbers<[1], [0], [0], [1], [0, 0, 1, 1], [], []>} : vector<128x4xf32>, vector<4x8xf32>, vector<128x8xf32> -> vector<128x8xf32>
    %50 = arith.addf %44, %49 : vector<128x8xf32>
    %c0_66 = arith.constant 0 : index
    %c2_67 = arith.constant 2 : index
    %c0_68 = arith.constant 0 : index
    %c0_69 = arith.constant 0 : index
    %51 = vector.load %arg11[%c0_66, %c2_67, %c0_68, %c0_69] : memref<2x10x10x4xf32, #tpu.memory_space<vmem>>, vector<2x8x8x4xf32>
    %52 = vector.shape_cast %51 : vector<2x8x8x4xf32> to vector<128x4xf32>
    %c6 = arith.constant 6 : index
    %c0_70 = arith.constant 0 : index
    %c0_71 = arith.constant 0 : index
    %53 = vector.load %arg2[%c6, %c0_70, %c0_71] : memref<9x4x8xf32, #tpu.memory_space<vmem>>, vector<1x4x8xf32>
    %54 = vector.shape_cast %53 : vector<1x4x8xf32> to vector<4x8xf32>
    %cst_72 = arith.constant dense<0.000000e+00> : vector<128x8xf32>
    %55 = tpu.matmul %52, %54, %cst_72 {dimension_numbers = #tpu.dot_dimension_numbers<[1], [0], [0], [1], [0, 0, 1, 1], [], []>} : vector<128x4xf32>, vector<4x8xf32>, vector<128x8xf32> -> vector<128x8xf32>
    %56 = arith.addf %50, %55 : vector<128x8xf32>
    %c0_73 = arith.constant 0 : index
    %c2_74 = arith.constant 2 : index
    %c1_75 = arith.constant 1 : index
    %c0_76 = arith.constant 0 : index
    %57 = vector.load %arg11[%c0_73, %c2_74, %c1_75, %c0_76] : memref<2x10x10x4xf32, #tpu.memory_space<vmem>>, vector<2x8x8x4xf32>
    %58 = vector.shape_cast %57 : vector<2x8x8x4xf32> to vector<128x4xf32>
    %c7 = arith.constant 7 : index
    %c0_77 = arith.constant 0 : index
    %c0_78 = arith.constant 0 : index
    %59 = vector.load %arg2[%c7, %c0_77, %c0_78] : memref<9x4x8xf32, #tpu.memory_space<vmem>>, vector<1x4x8xf32>
    %60 = vector.shape_cast %59 : vector<1x4x8xf32> to vector<4x8xf32>
    %cst_79 = arith.constant dense<0.000000e+00> : vector<128x8xf32>
    %61 = tpu.matmul %58, %60, %cst_79 {dimension_numbers = #tpu.dot_dimension_numbers<[1], [0], [0], [1], [0, 0, 1, 1], [], []>} : vector<128x4xf32>, vector<4x8xf32>, vector<128x8xf32> -> vector<128x8xf32>
    %62 = arith.addf %56, %61 : vector<128x8xf32>
    %c0_80 = arith.constant 0 : index
    %c2_81 = arith.constant 2 : index
    %c2_82 = arith.constant 2 : index
    %c0_83 = arith.constant 0 : index
    %63 = vector.load %arg11[%c0_80, %c2_81, %c2_82, %c0_83] : memref<2x10x10x4xf32, #tpu.memory_space<vmem>>, vector<2x8x8x4xf32>
    %64 = vector.shape_cast %63 : vector<2x8x8x4xf32> to vector<128x4xf32>
    %c8 = arith.constant 8 : index
    %c0_84 = arith.constant 0 : index
    %c0_85 = arith.constant 0 : index
    %65 = vector.load %arg2[%c8, %c0_84, %c0_85] : memref<9x4x8xf32, #tpu.memory_space<vmem>>, vector<1x4x8xf32>
    %66 = vector.shape_cast %65 : vector<1x4x8xf32> to vector<4x8xf32>
    %cst_86 = arith.constant dense<0.000000e+00> : vector<128x8xf32>
    %67 = tpu.matmul %64, %66, %cst_86 {dimension_numbers = #tpu.dot_dimension_numbers<[1], [0], [0], [1], [0, 0, 1, 1], [], []>} : vector<128x4xf32>, vector<4x8xf32>, vector<128x8xf32> -> vector<128x8xf32>
    %68 = arith.addf %62, %67 : vector<128x8xf32>
    %c0_87 = arith.constant 0 : index
    %c0_88 = arith.constant 0 : index
    %69 = vector.load %arg3[%c0_87, %c0_88] : memref<1x8xf32, #tpu.memory_space<vmem>>, vector<1x8xf32>
    %70 = vector.broadcast %69 : vector<1x8xf32> to vector<128x8xf32>
    %71 = arith.addf %68, %70 : vector<128x8xf32>
    %cst_89 = arith.constant dense<0.000000e+00> : vector<8xf32>
    %72 = vector.multi_reduction <add>, %71, %cst_89 [0] : vector<128x8xf32> to vector<8xf32>
    %73 = vector.shape_cast %72 : vector<8xf32> to vector<1x8xf32>
    %cst_90 = arith.constant 7.812500e-03 : f32
    %74 = vector.broadcast %cst_90 : f32 to vector<1x8xf32>
    %75 = arith.mulf %73, %74 : vector<1x8xf32>
    %76 = vector.broadcast %75 : vector<1x8xf32> to vector<128x8xf32>
    %77 = arith.subf %71, %76 : vector<128x8xf32>
    %78 = arith.mulf %77, %77 : vector<128x8xf32>
    %cst_91 = arith.constant dense<0.000000e+00> : vector<8xf32>
    %79 = vector.multi_reduction <add>, %78, %cst_91 [0] : vector<128x8xf32> to vector<8xf32>
    %80 = vector.shape_cast %79 : vector<8xf32> to vector<1x8xf32>
    %cst_92 = arith.constant 7.812500e-03 : f32
    %81 = vector.broadcast %cst_92 : f32 to vector<1x8xf32>
    %82 = arith.mulf %80, %81 : vector<1x8xf32>
    %c0_93 = arith.constant 0 : index
    %c0_94 = arith.constant 0 : index
    %83 = vector.load %arg4[%c0_93, %c0_94] : memref<1x8xf32, #tpu.memory_space<vmem>>, vector<1x8xf32>
    %cst_95 = arith.constant 9.99999974E-6 : f32
    %84 = vector.broadcast %cst_95 : f32 to vector<1x8xf32>
    %85 = arith.addf %82, %84 : vector<1x8xf32>
    %86 = math.rsqrt %85 : vector<1x8xf32>
    %87 = arith.mulf %83, %86 : vector<1x8xf32>
    %88 = vector.broadcast %87 : vector<1x8xf32> to vector<128x8xf32>
    %89 = arith.mulf %77, %88 : vector<128x8xf32>
    %c0_96 = arith.constant 0 : index
    %c0_97 = arith.constant 0 : index
    %90 = vector.load %arg5[%c0_96, %c0_97] : memref<1x8xf32, #tpu.memory_space<vmem>>, vector<1x8xf32>
    %91 = vector.broadcast %90 : vector<1x8xf32> to vector<128x8xf32>
    %92 = arith.addf %89, %91 : vector<128x8xf32>
    %cst_98 = arith.constant 0.000000e+00 : f32
    %93 = vector.broadcast %cst_98 : f32 to vector<128x8xf32>
    %94 = arith.maximumf %92, %93 : vector<128x8xf32>
    %cst_99 = arith.constant 0.000000e+00 : f32
    %95 = vector.broadcast %cst_99 : f32 to vector<2x10x10x8xf32>
    %c0_100 = arith.constant 0 : index
    %c0_101 = arith.constant 0 : index
    %c0_102 = arith.constant 0 : index
    %c0_103 = arith.constant 0 : index
    %96 = vector.load %arg12[%c0_100, %c0_101, %c0_102, %c0_103] : memref<2x10x10x8xf32, #tpu.memory_space<vmem>>, vector<2x10x10x8xf32>
    tpu.vector_store %arg12[%c0_100, %c0_101, %c0_102, %c0_103], %95 {strides = array<i32>} : memref<2x10x10x8xf32, #tpu.memory_space<vmem>>, vector<2x10x10x8xf32>,
    %97 = vector.shape_cast %94 : vector<128x8xf32> to vector<2x8x8x8xf32>
    %c0_104 = arith.constant 0 : index
    %c1_105 = arith.constant 1 : index
    %c1_106 = arith.constant 1 : index
    %c0_107 = arith.constant 0 : index
    %98 = vector.load %arg12[%c0_104, %c1_105, %c1_106, %c0_107] : memref<2x10x10x8xf32, #tpu.memory_space<vmem>>, vector<2x8x8x8xf32>
    tpu.vector_store %arg12[%c0_104, %c1_105, %c1_106, %c0_107], %97 {strides = array<i32>} : memref<2x10x10x8xf32, #tpu.memory_space<vmem>>, vector<2x8x8x8xf32>,
    %c0_108 = arith.constant 0 : index
    %c0_109 = arith.constant 0 : index
    %c0_110 = arith.constant 0 : index
    %c0_111 = arith.constant 0 : index
    %99 = vector.load %arg12[%c0_108, %c0_109, %c0_110, %c0_111] : memref<2x10x10x8xf32, #tpu.memory_space<vmem>>, vector<2x8x8x8xf32>
    %100 = vector.shape_cast %99 : vector<2x8x8x8xf32> to vector<128x8xf32>
    %c0_112 = arith.constant 0 : index
    %c0_113 = arith.constant 0 : index
    %c0_114 = arith.constant 0 : index
    %101 = vector.load %arg6[%c0_112, %c0_113, %c0_114] : memref<9x8x8xf32, #tpu.memory_space<vmem>>, vector<1x8x8xf32>
    %102 = vector.shape_cast %101 : vector<1x8x8xf32> to vector<8x8xf32>
    %cst_115 = arith.constant dense<0.000000e+00> : vector<128x8xf32>
    %103 = tpu.matmul %100, %102, %cst_115 {dimension_numbers = #tpu.dot_dimension_numbers<[1], [0], [0], [1], [0, 0, 1, 1], [], []>} : vector<128x8xf32>, vector<8x8xf32>, vector<128x8xf32> -> vector<128x8xf32>
    %c0_116 = arith.constant 0 : index
    %c0_117 = arith.constant 0 : index
    %c1_118 = arith.constant 1 : index
    %c0_119 = arith.constant 0 : index
    %104 = vector.load %arg12[%c0_116, %c0_117, %c1_118, %c0_119] : memref<2x10x10x8xf32, #tpu.memory_space<vmem>>, vector<2x8x8x8xf32>
    %105 = vector.shape_cast %104 : vector<2x8x8x8xf32> to vector<128x8xf32>
    %c1_120 = arith.constant 1 : index
    %c0_121 = arith.constant 0 : index
    %c0_122 = arith.constant 0 : index
    %106 = vector.load %arg6[%c1_120, %c0_121, %c0_122] : memref<9x8x8xf32, #tpu.memory_space<vmem>>, vector<1x8x8xf32>
    %107 = vector.shape_cast %106 : vector<1x8x8xf32> to vector<8x8xf32>
    %cst_123 = arith.constant dense<0.000000e+00> : vector<128x8xf32>
    %108 = tpu.matmul %105, %107, %cst_123 {dimension_numbers = #tpu.dot_dimension_numbers<[1], [0], [0], [1], [0, 0, 1, 1], [], []>} : vector<128x8xf32>, vector<8x8xf32>, vector<128x8xf32> -> vector<128x8xf32>
    %109 = arith.addf %103, %108 : vector<128x8xf32>
    %c0_124 = arith.constant 0 : index
    %c0_125 = arith.constant 0 : index
    %c2_126 = arith.constant 2 : index
    %c0_127 = arith.constant 0 : index
    %110 = vector.load %arg12[%c0_124, %c0_125, %c2_126, %c0_127] : memref<2x10x10x8xf32, #tpu.memory_space<vmem>>, vector<2x8x8x8xf32>
    %111 = vector.shape_cast %110 : vector<2x8x8x8xf32> to vector<128x8xf32>
    %c2_128 = arith.constant 2 : index
    %c0_129 = arith.constant 0 : index
    %c0_130 = arith.constant 0 : index
    %112 = vector.load %arg6[%c2_128, %c0_129, %c0_130] : memref<9x8x8xf32, #tpu.memory_space<vmem>>, vector<1x8x8xf32>
    %113 = vector.shape_cast %112 : vector<1x8x8xf32> to vector<8x8xf32>
    %cst_131 = arith.constant dense<0.000000e+00> : vector<128x8xf32>
    %114 = tpu.matmul %111, %113, %cst_131 {dimension_numbers = #tpu.dot_dimension_numbers<[1], [0], [0], [1], [0, 0, 1, 1], [], []>} : vector<128x8xf32>, vector<8x8xf32>, vector<128x8xf32> -> vector<128x8xf32>
    %115 = arith.addf %109, %114 : vector<128x8xf32>
    %c0_132 = arith.constant 0 : index
    %c1_133 = arith.constant 1 : index
    %c0_134 = arith.constant 0 : index
    %c0_135 = arith.constant 0 : index
    %116 = vector.load %arg12[%c0_132, %c1_133, %c0_134, %c0_135] : memref<2x10x10x8xf32, #tpu.memory_space<vmem>>, vector<2x8x8x8xf32>
    %117 = vector.shape_cast %116 : vector<2x8x8x8xf32> to vector<128x8xf32>
    %c3_136 = arith.constant 3 : index
    %c0_137 = arith.constant 0 : index
    %c0_138 = arith.constant 0 : index
    %118 = vector.load %arg6[%c3_136, %c0_137, %c0_138] : memref<9x8x8xf32, #tpu.memory_space<vmem>>, vector<1x8x8xf32>
    %119 = vector.shape_cast %118 : vector<1x8x8xf32> to vector<8x8xf32>
    %cst_139 = arith.constant dense<0.000000e+00> : vector<128x8xf32>
    %120 = tpu.matmul %117, %119, %cst_139 {dimension_numbers = #tpu.dot_dimension_numbers<[1], [0], [0], [1], [0, 0, 1, 1], [], []>} : vector<128x8xf32>, vector<8x8xf32>, vector<128x8xf32> -> vector<128x8xf32>
    %121 = arith.addf %115, %120 : vector<128x8xf32>
    %c0_140 = arith.constant 0 : index
    %c1_141 = arith.constant 1 : index
    %c1_142 = arith.constant 1 : index
    %c0_143 = arith.constant 0 : index
    %122 = vector.load %arg12[%c0_140, %c1_141, %c1_142, %c0_143] : memref<2x10x10x8xf32, #tpu.memory_space<vmem>>, vector<2x8x8x8xf32>
    %123 = vector.shape_cast %122 : vector<2x8x8x8xf32> to vector<128x8xf32>
    %c4_144 = arith.constant 4 : index
    %c0_145 = arith.constant 0 : index
    %c0_146 = arith.constant 0 : index
    %124 = vector.load %arg6[%c4_144, %c0_145, %c0_146] : memref<9x8x8xf32, #tpu.memory_space<vmem>>, vector<1x8x8xf32>
    %125 = vector.shape_cast %124 : vector<1x8x8xf32> to vector<8x8xf32>
    %cst_147 = arith.constant dense<0.000000e+00> : vector<128x8xf32>
    %126 = tpu.matmul %123, %125, %cst_147 {dimension_numbers = #tpu.dot_dimension_numbers<[1], [0], [0], [1], [0, 0, 1, 1], [], []>} : vector<128x8xf32>, vector<8x8xf32>, vector<128x8xf32> -> vector<128x8xf32>
    %127 = arith.addf %121, %126 : vector<128x8xf32>
    %c0_148 = arith.constant 0 : index
    %c1_149 = arith.constant 1 : index
    %c2_150 = arith.constant 2 : index
    %c0_151 = arith.constant 0 : index
    %128 = vector.load %arg12[%c0_148, %c1_149, %c2_150, %c0_151] : memref<2x10x10x8xf32, #tpu.memory_space<vmem>>, vector<2x8x8x8xf32>
    %129 = vector.shape_cast %128 : vector<2x8x8x8xf32> to vector<128x8xf32>
    %c5_152 = arith.constant 5 : index
    %c0_153 = arith.constant 0 : index
    %c0_154 = arith.constant 0 : index
    %130 = vector.load %arg6[%c5_152, %c0_153, %c0_154] : memref<9x8x8xf32, #tpu.memory_space<vmem>>, vector<1x8x8xf32>
    %131 = vector.shape_cast %130 : vector<1x8x8xf32> to vector<8x8xf32>
    %cst_155 = arith.constant dense<0.000000e+00> : vector<128x8xf32>
    %132 = tpu.matmul %129, %131, %cst_155 {dimension_numbers = #tpu.dot_dimension_numbers<[1], [0], [0], [1], [0, 0, 1, 1], [], []>} : vector<128x8xf32>, vector<8x8xf32>, vector<128x8xf32> -> vector<128x8xf32>
    %133 = arith.addf %127, %132 : vector<128x8xf32>
    %c0_156 = arith.constant 0 : index
    %c2_157 = arith.constant 2 : index
    %c0_158 = arith.constant 0 : index
    %c0_159 = arith.constant 0 : index
    %134 = vector.load %arg12[%c0_156, %c2_157, %c0_158, %c0_159] : memref<2x10x10x8xf32, #tpu.memory_space<vmem>>, vector<2x8x8x8xf32>
    %135 = vector.shape_cast %134 : vector<2x8x8x8xf32> to vector<128x8xf32>
    %c6_160 = arith.constant 6 : index
    %c0_161 = arith.constant 0 : index
    %c0_162 = arith.constant 0 : index
    %136 = vector.load %arg6[%c6_160, %c0_161, %c0_162] : memref<9x8x8xf32, #tpu.memory_space<vmem>>, vector<1x8x8xf32>
    %137 = vector.shape_cast %136 : vector<1x8x8xf32> to vector<8x8xf32>
    %cst_163 = arith.constant dense<0.000000e+00> : vector<128x8xf32>
    %138 = tpu.matmul %135, %137, %cst_163 {dimension_numbers = #tpu.dot_dimension_numbers<[1], [0], [0], [1], [0, 0, 1, 1], [], []>} : vector<128x8xf32>, vector<8x8xf32>, vector<128x8xf32> -> vector<128x8xf32>
    %139 = arith.addf %133, %138 : vector<128x8xf32>
    %c0_164 = arith.constant 0 : index
    %c2_165 = arith.constant 2 : index
    %c1_166 = arith.constant 1 : index
    %c0_167 = arith.constant 0 : index
    %140 = vector.load %arg12[%c0_164, %c2_165, %c1_166, %c0_167] : memref<2x10x10x8xf32, #tpu.memory_space<vmem>>, vector<2x8x8x8xf32>
    %141 = vector.shape_cast %140 : vector<2x8x8x8xf32> to vector<128x8xf32>
    %c7_168 = arith.constant 7 : index
    %c0_169 = arith.constant 0 : index
    %c0_170 = arith.constant 0 : index
    %142 = vector.load %arg6[%c7_168, %c0_169, %c0_170] : memref<9x8x8xf32, #tpu.memory_space<vmem>>, vector<1x8x8xf32>
    %143 = vector.shape_cast %142 : vector<1x8x8xf32> to vector<8x8xf32>
    %cst_171 = arith.constant dense<0.000000e+00> : vector<128x8xf32>
    %144 = tpu.matmul %141, %143, %cst_171 {dimension_numbers = #tpu.dot_dimension_numbers<[1], [0], [0], [1], [0, 0, 1, 1], [], []>} : vector<128x8xf32>, vector<8x8xf32>, vector<128x8xf32> -> vector<128x8xf32>
    %145 = arith.addf %139, %144 : vector<128x8xf32>
    %c0_172 = arith.constant 0 : index
    %c2_173 = arith.constant 2 : index
    %c2_174 = arith.constant 2 : index
    %c0_175 = arith.constant 0 : index
    %146 = vector.load %arg12[%c0_172, %c2_173, %c2_174, %c0_175] : memref<2x10x10x8xf32, #tpu.memory_space<vmem>>, vector<2x8x8x8xf32>
    %147 = vector.shape_cast %146 : vector<2x8x8x8xf32> to vector<128x8xf32>
    %c8_176 = arith.constant 8 : index
    %c0_177 = arith.constant 0 : index
    %c0_178 = arith.constant 0 : index
    %148 = vector.load %arg6[%c8_176, %c0_177, %c0_178] : memref<9x8x8xf32, #tpu.memory_space<vmem>>, vector<1x8x8xf32>
    %149 = vector.shape_cast %148 : vector<1x8x8xf32> to vector<8x8xf32>
    %cst_179 = arith.constant dense<0.000000e+00> : vector<128x8xf32>
    %150 = tpu.matmul %147, %149, %cst_179 {dimension_numbers = #tpu.dot_dimension_numbers<[1], [0], [0], [1], [0, 0, 1, 1], [], []>} : vector<128x8xf32>, vector<8x8xf32>, vector<128x8xf32> -> vector<128x8xf32>
    %151 = arith.addf %145, %150 : vector<128x8xf32>
    %c0_180 = arith.constant 0 : index
    %c0_181 = arith.constant 0 : index
    %152 = vector.load %arg7[%c0_180, %c0_181] : memref<1x8xf32, #tpu.memory_space<vmem>>, vector<1x8xf32>
    %153 = vector.broadcast %152 : vector<1x8xf32> to vector<128x8xf32>
    %154 = arith.addf %151, %153 : vector<128x8xf32>
    %cst_182 = arith.constant dense<0.000000e+00> : vector<8xf32>
    %155 = vector.multi_reduction <add>, %154, %cst_182 [0] : vector<128x8xf32> to vector<8xf32>
    %156 = vector.shape_cast %155 : vector<8xf32> to vector<1x8xf32>
    %cst_183 = arith.constant 7.812500e-03 : f32
    %157 = vector.broadcast %cst_183 : f32 to vector<1x8xf32>
    %158 = arith.mulf %156, %157 : vector<1x8xf32>
    %159 = vector.broadcast %158 : vector<1x8xf32> to vector<128x8xf32>
    %160 = arith.subf %154, %159 : vector<128x8xf32>
    %161 = arith.mulf %160, %160 : vector<128x8xf32>
    %cst_184 = arith.constant dense<0.000000e+00> : vector<8xf32>
    %162 = vector.multi_reduction <add>, %161, %cst_184 [0] : vector<128x8xf32> to vector<8xf32>
    %163 = vector.shape_cast %162 : vector<8xf32> to vector<1x8xf32>
    %cst_185 = arith.constant 7.812500e-03 : f32
    %164 = vector.broadcast %cst_185 : f32 to vector<1x8xf32>
    %165 = arith.mulf %163, %164 : vector<1x8xf32>
    %c0_186 = arith.constant 0 : index
    %c0_187 = arith.constant 0 : index
    %166 = vector.load %arg8[%c0_186, %c0_187] : memref<1x8xf32, #tpu.memory_space<vmem>>, vector<1x8xf32>
    %cst_188 = arith.constant 9.99999974E-6 : f32
    %167 = vector.broadcast %cst_188 : f32 to vector<1x8xf32>
    %168 = arith.addf %165, %167 : vector<1x8xf32>
    %169 = math.rsqrt %168 : vector<1x8xf32>
    %170 = arith.mulf %166, %169 : vector<1x8xf32>
    %171 = vector.broadcast %170 : vector<1x8xf32> to vector<128x8xf32>
    %172 = arith.mulf %160, %171 : vector<128x8xf32>
    %c0_189 = arith.constant 0 : index
    %c0_190 = arith.constant 0 : index
    %173 = vector.load %arg9[%c0_189, %c0_190] : memref<1x8xf32, #tpu.memory_space<vmem>>, vector<1x8xf32>
    %174 = vector.broadcast %173 : vector<1x8xf32> to vector<128x8xf32>
    %175 = arith.addf %172, %174 : vector<128x8xf32>
    %cst_191 = arith.constant 0.000000e+00 : f32
    %176 = vector.broadcast %cst_191 : f32 to vector<128x8xf32>
    %177 = arith.maximumf %175, %176 : vector<128x8xf32>
    %178 = vector.shape_cast %177 : vector<128x8xf32> to vector<2x64x8xf32>
    %c0_192 = arith.constant 0 : index
    %c0_193 = arith.constant 0 : index
    %c0_194 = arith.constant 0 : index
    %179 = vector.load %arg10[%c0_192, %c0_193, %c0_194] : memref<2x64x8xf32, #tpu.memory_space<vmem>>, vector<2x64x8xf32>
    tpu.vector_store %arg10[%c0_192, %c0_193, %c0_194], %178 {strides = array<i32>} : memref<2x64x8xf32, #tpu.memory_space<vmem>>, vector<2x64x8xf32>,
    return
  }
  func.func @transform_0(%arg0: i32) -> (i32, i32, i32, i32) {
    %c0_i32 = arith.constant 0 : i32
    %c0_i32_0 = arith.constant 0 : i32
    %c0_i32_1 = arith.constant 0 : i32
    %c0_i32_2 = arith.constant 0 : i32
    %c0_i32_3 = arith.constant 0 : i32
    return %c0_i32, %c0_i32_0, %c0_i32_1, %c0_i32_2 : i32, i32, i32, i32
  }
  func.func @transform_1(%arg0: i32) -> (i32, i32, i32) {
    %c0_i32 = arith.constant 0 : i32
    %c0_i32_0 = arith.constant 0 : i32
    %c0_i32_1 = arith.constant 0 : i32
    %c0_i32_2 = arith.constant 0 : i32
    return %c0_i32, %c0_i32_0, %c0_i32_1 : i32, i32, i32
  }
  func.func @transform_2(%arg0: i32) -> (i32, i32) {
    %c0_i32 = arith.constant 0 : i32
    %c0_i32_0 = arith.constant 0 : i32
    %c0_i32_1 = arith.constant 0 : i32
    return %c0_i32, %c0_i32_0 : i32, i32
  }
  func.func @transform_3(%arg0: i32) -> (i32, i32) {
    %c0_i32 = arith.constant 0 : i32
    %c0_i32_0 = arith.constant 0 : i32
    %c0_i32_1 = arith.constant 0 : i32
    return %c0_i32, %c0_i32_0 : i32, i32
  }
  func.func @transform_4(%arg0: i32) -> (i32, i32) {
    %c0_i32 = arith.constant 0 : i32
    %c0_i32_0 = arith.constant 0 : i32
    %c0_i32_1 = arith.constant 0 : i32
    return %c0_i32, %c0_i32_0 : i32, i32
  }
  func.func @transform_5(%arg0: i32) -> (i32, i32, i32) {
    %c0_i32 = arith.constant 0 : i32
    %c0_i32_0 = arith.constant 0 : i32
    %c0_i32_1 = arith.constant 0 : i32
    %c0_i32_2 = arith.constant 0 : i32
    return %c0_i32, %c0_i32_0, %c0_i32_1 : i32, i32, i32
  }
  func.func @transform_6(%arg0: i32) -> (i32, i32) {
    %c0_i32 = arith.constant 0 : i32
    %c0_i32_0 = arith.constant 0 : i32
    %c0_i32_1 = arith.constant 0 : i32
    return %c0_i32, %c0_i32_0 : i32, i32
  }
  func.func @transform_7(%arg0: i32) -> (i32, i32) {
    %c0_i32 = arith.constant 0 : i32
    %c0_i32_0 = arith.constant 0 : i32
    %c0_i32_1 = arith.constant 0 : i32
    return %c0_i32, %c0_i32_0 : i32, i32
  }
  func.func @transform_8(%arg0: i32) -> (i32, i32) {
    %c0_i32 = arith.constant 0 : i32
    %c0_i32_0 = arith.constant 0 : i32
    %c0_i32_1 = arith.constant 0 : i32
    return %c0_i32, %c0_i32_0 : i32, i32
  }
  func.func @transform_9(%arg0: i32) -> (i32, i32, i32) {
    %c0_i32 = arith.constant 0 : i32
    %c0_i32_0 = arith.constant 0 : i32
    %c0_i32_1 = arith.constant 0 : i32
    %c0_i32_2 = arith.constant 0 : i32
    return %c0_i32, %c0_i32_0, %c0_i32_1 : i32, i32, i32
  }
}

</mosaic_0001>

<bundles_post_ra>
// kernel: tpu_custom_call.1
= control target key start
LH: loop header
LB: loop body
LE: loop exit
PB: predicated region body
PF: predicated region fallthrough
CT: control target
= control target key end

     0   :  { %vm4087_vm0 = vcmask 1043456   ;;  %vm32_vm1 = vcmask 31744   ;;  %vm34_vm2 = vcmask 25600   ;;  %v13282_v1 = vmov 0.0   ;;  %s13272_s1 = inlined_call_operand.vmem [shape: f32[9,4,8], index: 1, kind: input, shape index: {}]   ;;  %s13273_s0 = inlined_call_operand.vmem [shape: f32[2,16,16,4], index: 0, kind: input, shape index: {}]   ;;  %s13274_s2 = inlined_call_operand.vmem [shape: f32[1,8], index: 2, kind: input, shape index: {}]   ;;  %s13275_s5 = inlined_call_operand.vmem [shape: f32[9,8,8], index: 5, kind: input, shape index: {}]   ;;  %s13276_s3 = inlined_call_operand.vmem [shape: f32[1,8], index: 3, kind: input, shape index: {}]   ;;  %s13277_s4 = inlined_call_operand.vmem [shape: f32[1,8], index: 4, kind: input, shape index: {}]   ;;  %s13278_s6 = inlined_call_operand.vmem [shape: f32[1,8], index: 6, kind: input, shape index: {}]   ;;  %s13279_s7 = inlined_call_operand.vmem [shape: f32[1,8], index: 7, kind: input, shape index: {}]   ;;  %s13280_s8 = inlined_call_operand.vmem [shape: f32[1,8], index: 8, kind: input, shape index: {}]   ;;  %s13281_s9 = inlined_call_operand.vmem [shape: f32[2,64,8], index: 9, kind: output, shape index: {}]  }
   0x1   :  { %v8557_v0 = vld [vmem:[%s13272_s1 + $0x4] sm:$0xf]  ;;  %33 = vst.msk [vmem:[#allocation2] sm:$0xff] %vm32_vm1, %v13282_v1  ;;  %36 = vst.msk [vmem:[#allocation2 + $0x10] sm:$0xff] %vm32_vm1, %v13282_v1  ;;  %v10115_v2 = vld [vmem:[%s13272_s1] sm:$0xf]  ;;  %v142_v4 = vlaneseq }
   0x2   :  { %35 = vst.msk [vmem:[#allocation2 + $0x8] sm:$0x3] %vm34_vm2, %v13282_v1  ;;  %37 = vst.msk [vmem:[#allocation2 + $0x18] sm:$0x3] %vm34_vm2, %v13282_v1  ;;  %v74_v3 = vld [vmem:[%s13273_s0] sm:$0xff]  ;;  %9180 = vmatprep.subr.msk.mxu0 %vm4087_vm0, %v8557_v0  ;;  %v75_v5 = vld [vmem:[%s13273_s0 + $0x8] sm:$0xff] }
   0x3   :  { %38 = vst.msk [vmem:[#allocation2 + $0x20] sm:$0xff] %vm32_vm1, %v13282_v1  ;;  %40 = vst.msk [vmem:[#allocation2 + $0x30] sm:$0xff] %vm32_vm1, %v13282_v1  ;;  %v76_v6 = vld [vmem:[%s13273_s0 + $0x10] sm:$0xff]  ;;  %v77_v7 = vld [vmem:[%s13273_s0 + $0x18] sm:$0xff]  ;;  %9181 = vmatpush3.msk.msra.mxu0 %vm4087_vm0, %v8557_v0  ;;  %v9978_v8 = vmov 1983009808   ;;  %v138_v14 = vcombine.high %v74_v3, %v74_v3  ;;  %v155_v15 = vcombine.high %v75_v5, %v75_v5 }
   0x4   :  { %39 = vst.msk [vmem:[#allocation2 + $0x28] sm:$0x3] %vm34_vm2, %v13282_v1  ;;  %41 = vst.msk [vmem:[#allocation2 + $0x38] sm:$0x3] %vm34_vm2, %v13282_v1  ;;  %v140_v9 = vunpack.c.l.s4 %v9978_v8  ;;  %v10131_v10 = vshrl.u32 %v142_v4, 7  ;;  %v10136_v11 = vld [vmem:[%s13273_s0 + $0x20] sm:$0xff]  ;;  %9206 = vmatprep.subr.msk.mxu0 %vm4087_vm0, %v10115_v2  ;;  %v172_v20 = vcombine.high %v76_v6, %v76_v6  ;;  %v189_v21 = vcombine.high %v77_v7, %v77_v7 }
   0x5   :  { %42 = vst.msk [vmem:[#allocation2 + $0x40] sm:$0xff] %vm32_vm1, %v13282_v1  ;;  %44 = vst.msk [vmem:[#allocation2 + $0x50] sm:$0xff] %vm32_vm1, %v13282_v1  ;;  %v10141_v12 = vld [vmem:[%s13273_s0 + $0x28] sm:$0xff]  ;;  %v10146_v13 = vld [vmem:[%s13273_s0 + $0x30] sm:$0xff]  ;;  %v206_v22 = vcombine.high %v10136_v11, %v10136_v11  ;;  %vm1962_vm3 = vcmask 1041409   ;;  %vm1964_vm4 = vcmask 1042434  }
   0x6   :  { %43 = vst.msk [vmem:[#allocation2 + $0x48] sm:$0x3] %vm34_vm2, %v13282_v1  ;;  %45 = vst.msk [vmem:[#allocation2 + $0x58] sm:$0x3] %vm34_vm2, %v13282_v1  ;;  %v10153_v16 = vld [vmem:[%s13273_s0 + $0x38] sm:$0xff]  ;;  %v10158_v17 = vld [vmem:[%s13273_s0 + $0x40] sm:$0xff]  ;;  %v141_v19 = vunpack.c.0.s8 %v140_v9  ;;  %v223_v26 = vcombine.high %v10141_v12, %v10141_v12  ;;  %v240_v27 = vcombine.high %v10146_v13, %v10146_v13 }
   0x7   :  { %46 = vst.msk [vmem:[#allocation2 + $0x60] sm:$0xff] %vm32_vm1, %v13282_v1  ;;  %48 = vst.msk [vmem:[#allocation2 + $0x70] sm:$0xff] %vm32_vm1, %v13282_v1  ;;  %v10163_v18 = vld [vmem:[%s13273_s0 + $0x48] sm:$0xff]  ;;  %v10170_v23 = vld [vmem:[%s13273_s0 + $0x50] sm:$0xff]  ;;  %v257_v28 = vcombine.high %v10153_v16, %v10153_v16  ;;  %v274_v29 = vcombine.high %v10158_v17, %v10158_v17  ;;  %vm1966_vm5 = vcmask 1043459   ;;  %vm1968_vm6 = vcmask 1044484  }
   0x8   :  { %47 = vst.msk [vmem:[#allocation2 + $0x68] sm:$0x3] %vm34_vm2, %v13282_v1  ;;  %49 = vst.msk [vmem:[#allocation2 + $0x78] sm:$0x3] %vm34_vm2, %v13282_v1  ;;  %v10175_v24 = vld [vmem:[%s13273_s0 + $0x58] sm:$0xff]  ;;  %v10180_v25 = vld [vmem:[%s13273_s0 + $0x60] sm:$0xff]  ;;  %v10206_v33 = vsub.s32 %v141_v19, %v10131_v10 }
   0x9   :  { %50 = vst.msk [vmem:[#allocation2 + $0x80] sm:$0xff] %vm32_vm1, %v13282_v1  ;;  %52 = vst.msk [vmem:[#allocation2 + $0x90] sm:$0xff] %vm32_vm1, %v13282_v1  ;;  %v10193_v30 = vld [vmem:[%s13273_s0 + $0x68] sm:$0xff]  ;;  %v10198_v31 = vld [vmem:[%s13273_s0 + $0x70] sm:$0xff]  ;;  %vm1970_vm7 = vcmask 1045509   ;;  %vm1972_vm8 = vcmask 1046534  }
   0xa   :  { %51 = vst.msk [vmem:[#allocation2 + $0x88] sm:$0x3] %vm34_vm2, %v13282_v1  ;;  %53 = vst.msk [vmem:[#allocation2 + $0x98] sm:$0x3] %vm34_vm2, %v13282_v1  ;;  %v10203_v32 = vld [vmem:[%s13273_s0 + $0x78] sm:$0xff]  ;;  %v4021_v37 = vld [vmem:[#allocation2 + $0x1] sm:$0xff]  ;;  %v145_v42 = vrot.slane %v74_v3, %v10206_v33  ;;  %v152_v43 = vrot.slane %v138_v14, %v10206_v33  ;;  %v162_v44 = vrot.slane %v75_v5, %v10206_v33 }
   0xb   :  { %54 = vst.msk [vmem:[#allocation2 + $0xa0] sm:$0xff] %vm32_vm1, %v13282_v1  ;;  %56 = vst.msk [vmem:[#allocation2 + $0xb0] sm:$0xff] %vm32_vm1, %v13282_v1  ;;  %9182 = vmatprep.mubr.msk.f32.mxu0 %vm32_vm1, %v4021_v37  ;;  %v169_v45 = vrot.slane %v155_v15, %v10206_v33  ;;  %v10228_v46 = vrot.slane %v76_v6, %v10206_v33  ;;  %v10231_v47 = vrot.slane %v172_v20, %v10206_v33  ;;  %vm1974_vm9 = vcmask 1047559  }
   0xc   :  { %55 = vst.msk [vmem:[#allocation2 + $0xa8] sm:$0x3] %vm34_vm2, %v13282_v1  ;;  %57 = vst.msk [vmem:[#allocation2 + $0xb8] sm:$0x3] %vm34_vm2, %v13282_v1  ;;  %v10234_v48 = vrot.slane %v77_v7, %v10206_v33  ;;  %v10237_v49 = vrot.slane %v189_v21, %v10206_v33  ;;  %v153_v50 = vcombine.high %v145_v42, %v145_v42  ;;  %v810_v58 = vsel %vm34_vm2, %v145_v42, -inf }
   0xd   :  { %58 = vst.msk [vmem:[#allocation2 + $0xc0] sm:$0xff] %vm32_vm1, %v13282_v1  ;;  %60 = vst.msk [vmem:[#allocation2 + $0xd0] sm:$0xff] %vm32_vm1, %v13282_v1  ;;  %v154_v51 = vcombine.high %v152_v43, %v152_v43  ;;  %v170_v52 = vcombine.high %v162_v44, %v162_v44  ;;  %v171_v53 = vcombine.high %v169_v45, %v169_v45  ;;  %v824_v60 = vsel %vm34_vm2, %v152_v43, -inf }
   0xe   :  { %59 = vst.msk [vmem:[#allocation2 + $0xc8] sm:$0x3] %vm34_vm2, %v13282_v1  ;;  %61 = vst.msk [vmem:[#allocation2 + $0xd8] sm:$0x3] %vm34_vm2, %v13282_v1  ;;  %v187_v54 = vcombine.high %v10228_v46, %v10228_v46  ;;  %v188_v55 = vcombine.high %v10231_v47, %v10231_v47  ;;  %v204_v56 = vcombine.high %v10234_v48, %v10234_v48  ;;  %v817_v59 = vsel %vm34_vm2, %v153_v50, -inf }
   0xf   :  { %62 = vst.msk [vmem:[#allocation2 + $0xe0] sm:$0xff] %vm32_vm1, %v13282_v1  ;;  %64 = vst.msk [vmem:[#allocation2 + $0xf0] sm:$0xff] %vm32_vm1, %v13282_v1  ;;  %v205_v57 = vcombine.high %v10237_v49, %v10237_v49  ;;  %v831_v61 = vsel %vm34_vm2, %v154_v51, -inf  ;;  %v811_v62 = vrot.slane %v810_v58, 4  ;;  %v818_v63 = vrot.slane %v817_v59, 4 }
  0x10   :  { %63 = vst.msk [vmem:[#allocation2 + $0xe8] sm:$0x3] %vm34_vm2, %v13282_v1  ;;  %65 = vst.msk [vmem:[#allocation2 + $0xf8] sm:$0x3] %vm34_vm2, %v13282_v1  ;;  %v825_v0 = vrot.slane %v824_v60, 4  ;;  %v832_v3 = vrot.slane %v831_v61, 4 }
  0x11   :  { %66 = vst.msk [vmem:[#allocation2 + $0x100] sm:$0xff] %vm32_vm1, %v13282_v1  ;;  %68 = vst.msk [vmem:[#allocation2 + $0x110] sm:$0xff] %vm32_vm1, %v13282_v1  ;;  %v838_v4 = vsel %vm34_vm2, %v162_v44, -inf  ;;  %v845_v5 = vsel %vm34_vm2, %v170_v52, -inf  ;;  %v852_v6 = vsel %vm34_vm2, %v169_v45, -inf  ;;  %v859_v7 = vsel %vm34_vm2, %v171_v53, -inf }
  0x12   :  { %67 = vst.msk [vmem:[#allocation2 + $0x108] sm:$0x3] %vm34_vm2, %v13282_v1  ;;  %69 = vst.msk [vmem:[#allocation2 + $0x118] sm:$0x3] %vm34_vm2, %v13282_v1  ;;  %v812_v8 = vmax.f32 %v810_v58, %v811_v62  ;;  %v819_v9 = vmax.f32 %v817_v59, %v818_v63  ;;  %v826_v14 = vmax.f32 %v824_v60, %v825_v0  ;;  %v839_v19 = vrot.slane %v838_v4, 4 }
  0x13   :  { %70 = vst.msk [vmem:[#allocation2 + $0x120] sm:$0xff] %vm32_vm1, %v13282_v1  ;;  %72 = vst.msk [vmem:[#allocation2 + $0x130] sm:$0xff] %vm32_vm1, %v13282_v1  ;;  %v833_v15 = vmax.f32 %v831_v61, %v832_v3  ;;  %v846_v20 = vrot.slane %v845_v5, 4  ;;  %v853_v21 = vrot.slane %v852_v6, 4  ;;  %v860_v37 = vrot.slane %v859_v7, 4 }
  0x14   :  { %71 = vst.msk [vmem:[#allocation2 + $0x128] sm:$0x3] %vm34_vm2, %v13282_v1  ;;  %73 = vst.msk [vmem:[#allocation2 + $0x138] sm:$0x3] %vm34_vm2, %v13282_v1  ;;  %v813_v42 = vrot.slane %v812_v8, 2  ;;  %v820_v43 = vrot.slane %v819_v9, 2  ;;  %v840_v1 = vmax.f32 %v838_v4, %v839_v19 }
  0x15   :  { %v827_v50 = vrot.slane %v826_v14, 2  ;;  %v834_v51 = vrot.slane %v833_v15, 2  ;;  %v847_v44 = vmax.f32 %v845_v5, %v846_v20  ;;  %v854_v41 = vmax.f32 %v852_v6, %v853_v21 }
  0x16   :  { %v861_v52 = vmax.f32 %v859_v7, %v860_v37  ;;  %v814_v40 = vmax.f32 %v812_v8, %v813_v42  ;;  %v821_v45 = vmax.f32 %v819_v9, %v820_v43  ;;  %v841_v58 = vrot.slane %v840_v1, 2 }
  0x17   :  { %v828_v39 = vmax.f32 %v826_v14, %v827_v50  ;;  %v835_v53 = vmax.f32 %v833_v15, %v834_v51  ;;  %v848_v59 = vrot.slane %v847_v44, 2  ;;  %v855_v60 = vrot.slane %v854_v41, 2 }
  0x18   :  { %v862_v61 = vrot.slane %v861_v52, 2  ;;  %v815_v62 = vrot.slane %v814_v40, 1  ;;  %v822_v63 = vrot.slane %v821_v45, 1  ;;  %v842_v38 = vmax.f32 %v840_v1, %v841_v58 }
  0x19   :  { %v829_v0 = vrot.slane %v828_v39, 1  ;;  %v836_v3 = vrot.slane %v835_v53, 1  ;;  %v849_v36 = vmax.f32 %v847_v44, %v848_v59  ;;  %v856_v35 = vmax.f32 %v854_v41, %v855_v60 }
  0x1a   :  { %v863_v34 = vmax.f32 %v861_v52, %v862_v61  ;;  %v10255_v4 = vmax.f32 %v814_v40, %v815_v62  ;;  %v10257_v5 = vmax.f32 %v821_v45, %v822_v63  ;;  %v843_v8 = vrot.slane %v842_v38, 1 }
  0x1b   :  { %v10259_v6 = vmax.f32 %v828_v39, %v829_v0  ;;  %v10261_v7 = vmax.f32 %v835_v53, %v836_v3  ;;  %v850_v9 = vrot.slane %v849_v36, 1  ;;  %v857_v14 = vrot.slane %v856_v35, 1 }
  0x1c   :  { %v864_v15 = vrot.slane %v863_v34, 1  ;;  %v866_v19 = vsel %vm34_vm2, %v10228_v46, -inf  ;;  %v873_v1 = vsel %vm34_vm2, %v187_v54, -inf  ;;  %v880_v41 = vsel %vm34_vm2, %v10231_v47, -inf }
  0x1d   :  { %v887_v40 = vsel %vm34_vm2, %v188_v55, -inf  ;;  %v10269_v20 = vmax.f32 %v842_v38, %v843_v8  ;;  %v10271_v39 = vmax.f32 %v849_v36, %v850_v9  ;;  %v10273_v21 = vmax.f32 %v856_v35, %v857_v14 }
  0x1e   :  { %v10275_v37 = vmax.f32 %v863_v34, %v864_v15  ;;  %v867_v42 = vrot.slane %v866_v19, 4  ;;  %v874_v43 = vrot.slane %v873_v1, 4  ;;  %v881_v50 = vrot.slane %v880_v41, 4 }
  0x1f   :  { %v888_v51 = vrot.slane %v887_v40, 4  ;;  %v894_v46 = vsel %vm34_vm2, %v10234_v48, -inf  ;;  %v901_v47 = vsel %vm34_vm2, %v204_v56, -inf  ;;  %v908_v36 = vsel %vm34_vm2, %v10237_v49, -inf }
  0x20   :  { %v915_v34 = vsel %vm34_vm2, %v205_v57, -inf  ;;  %v868_v35 = vmax.f32 %v866_v19, %v867_v42  ;;  %v875_v38 = vmax.f32 %v873_v1, %v874_v43  ;;  %v882_v54 = vmax.f32 %v880_v41, %v881_v50 }
  0x21   :  { %v889_v55 = vmax.f32 %v887_v40, %v888_v51  ;;  %v895_v44 = vrot.slane %v894_v46, 4  ;;  %v902_v52 = vrot.slane %v901_v47, 4  ;;  %v909_v45 = vrot.slane %v908_v36, 4 }
  0x22   :  { %v916_v53 = vrot.slane %v915_v34, 4  ;;  %v869_v58 = vrot.slane %v868_v35, 2  ;;  %v876_v48 = vrot.slane %v875_v38, 2  ;;  %v883_v59 = vrot.slane %v882_v54, 2 }
  0x23   :  { %v890_v56 = vrot.slane %v889_v55, 2  ;;  %v896_v60 = vmax.f32 %v894_v46, %v895_v44  ;;  %v903_v61 = vmax.f32 %v901_v47, %v902_v52  ;;  %v910_v62 = vmax.f32 %v908_v36, %v909_v45 }
  0x24   :  { %v917_v63 = vmax.f32 %v915_v34, %v916_v53  ;;  %v870_v0 = vmax.f32 %v868_v35, %v869_v58  ;;  %v877_v49 = vmax.f32 %v875_v38, %v876_v48  ;;  %v884_v3 = vmax.f32 %v882_v54, %v883_v59 }
  0x25   :  { %v891_v57 = vmax.f32 %v889_v55, %v890_v56  ;;  %v897_v8 = vrot.slane %v896_v60, 2  ;;  %v904_v9 = vrot.slane %v903_v61, 2  ;;  %v911_v14 = vrot.slane %v910_v62, 2 }
  0x26   :  { %v918_v15 = vrot.slane %v917_v63, 2  ;;  %v871_v19 = vrot.slane %v870_v0, 1  ;;  %v878_v1 = vrot.slane %v877_v49, 1  ;;  %v885_v41 = vrot.slane %v884_v3, 1 }
  0x27   :  { %v892_v40 = vrot.slane %v891_v57, 1  ;;  %v898_v42 = vmax.f32 %v896_v60, %v897_v8  ;;  %v905_v43 = vmax.f32 %v903_v61, %v904_v9  ;;  %v912_v50 = vmax.f32 %v910_v62, %v911_v14 }
  0x28   :  { %v919_v51 = vmax.f32 %v917_v63, %v918_v15  ;;  %v872_v46 = vmax.f32 %v870_v0, %v871_v19  ;;  %v879_v47 = vmax.f32 %v877_v49, %v878_v1  ;;  %v886_v36 = vmax.f32 %v884_v3, %v885_v41 }
  0x29   :  { %v893_v34 = vmax.f32 %v891_v57, %v892_v40  ;;  %v899_v35 = vrot.slane %v898_v42, 1  ;;  %v906_v38 = vrot.slane %v905_v43, 1  ;;  %v913_v54 = vrot.slane %v912_v50, 1 }
  0x2a   :  { %v920_v55 = vrot.slane %v919_v51, 1  ;;  %v1706_v44 = vsel %vm32_vm1, %v10255_v4, -inf  ;;  %v1707_v52 = vsel %vm32_vm1, %v872_v46, -inf  ;;  %v1709_v45 = vsel %vm32_vm1, %v10257_v5, -inf }
  0x2b   :  { %v1710_v53 = vsel %vm32_vm1, %v879_v47, -inf  ;;  %v900_v58 = vmax.f32 %v898_v42, %v899_v35  ;;  %v907_v48 = vmax.f32 %v905_v43, %v906_v38  ;;  %v914_v59 = vmax.f32 %v912_v50, %v913_v54 }
  0x2c   :  { %v921_v56 = vmax.f32 %v919_v51, %v920_v55  ;;  %v1708_v60 = vmax.f32 %v1706_v44, %v1707_v52  ;;  %v1711_v61 = vmax.f32 %v1709_v45, %v1710_v53  ;;  %v1712_v62 = vsel %vm32_vm1, %v10259_v6, -inf }
  0x2d   :  { %v1713_v4 = vsel %vm32_vm1, %v886_v36, -inf  ;;  %v1715_v0 = vsel %vm32_vm1, %v10261_v7, -inf  ;;  %v1716_v5 = vsel %vm32_vm1, %v893_v34, -inf  ;;  %v1718_v49 = vsel %vm32_vm1, %v10269_v20, -inf }
  0x2e   :  { %v1714_v63 = vmax.f32 %v1712_v62, %v1713_v4  ;;  %v1717_v3 = vmax.f32 %v1715_v0, %v1716_v5  ;;  %v1719_v57 = vsel %vm32_vm1, %v900_v58, -inf  ;;  %v1721_v8 = vsel %vm32_vm1, %v10271_v39, -inf }
  0x2f   :  { %v1722_v9 = vsel %vm32_vm1, %v907_v48, -inf  ;;  %v1720_v6 = vmax.f32 %v1718_v49, %v1719_v57  ;;  %v1724_v15 = vsel %vm32_vm1, %v10273_v21, -inf  ;;  %v1725_v7 = vsel %vm32_vm1, %v914_v59, -inf }
  0x30   :  { %v1723_v14 = vmax.f32 %v1721_v8, %v1722_v9  ;;  %v1726_v19 = vmax.f32 %v1724_v15, %v1725_v7  ;;  %v1727_v1 = vsel %vm32_vm1, %v10275_v37, -inf  ;;  %v1728_v20 = vsel %vm32_vm1, %v921_v56, -inf }
  0x31   :  { %v1963_v41 = vsel %vm1962_vm3, %v1711_v61, %v1708_v60  ;;  %v1729_v40 = vmax.f32 %v1727_v1, %v1728_v20  ;;  %v213_v42 = vrot.slane %v10136_v11, %v10206_v33  ;;  %v220_v21 = vrot.slane %v206_v22, %v10206_v33 }
  0x32   :  { %v1965_v39 = vsel %vm1964_vm4, %v1714_v63, %v1963_v41  ;;  %v230_v37 = vrot.slane %v10141_v12, %v10206_v33  ;;  %v237_v50 = vrot.slane %v223_v26, %v10206_v33  ;;  %v10330_v51 = vrot.slane %v10146_v13, %v10206_v33 }
  0x33   :  { %v1967_v43 = vsel %vm1966_vm5, %v1717_v3, %v1965_v39  ;;  %v221_v47 = vcombine.high %v213_v42, %v213_v42  ;;  %v222_v36 = vcombine.high %v220_v21, %v220_v21  ;;  %v10337_v11 = vrot.slane %v240_v27, %v10206_v33 }
  0x34   :  { %v1969_v46 = vsel %vm1968_vm6, %v1720_v6, %v1967_v43  ;;  %v238_v34 = vcombine.high %v230_v37, %v230_v37  ;;  %v239_v35 = vcombine.high %v237_v50, %v237_v50  ;;  %v255_v12 = vcombine.high %v10330_v51, %v10330_v51 }
  0x35   :  { %v1971_v22 = vsel %vm1970_vm7, %v1723_v14, %v1969_v46  ;;  %v256_v38 = vcombine.high %v10337_v11, %v10337_v11  ;;  %v10347_v54 = vrot.slane %v10153_v16, %v10206_v33  ;;  %v10353_v13 = vrot.slane %v257_v28, %v10206_v33 }
  0x36   :  { %v1973_v26 = vsel %vm1972_vm8, %v1726_v19, %v1971_v22  ;;  %v922_v55 = vsel %vm34_vm2, %v213_v42, -inf  ;;  %v929_v44 = vsel %vm34_vm2, %v221_v47, -inf  ;;  %v936_v52 = vsel %vm34_vm2, %v220_v21, -inf }
  0x37   :  { %v1975_v27 = vsel %vm1974_vm9, %v1729_v40, %v1973_v26  ;;  %v272_v45 = vcombine.high %v10347_v54, %v10347_v54  ;;  %v273_v53 = vcombine.high %v10353_v13, %v10353_v13  ;;  %v923_v58 = vrot.slane %v922_v55, 4 }
  0x38   :  { %2034 = vst.msk [vmem:[#allocation2 + $0x11] sm:$0xff] %vm32_vm1, %v1975_v27  ;;  %v930_v16 = vrot.slane %v929_v44, 4  ;;  %v937_v28 = vrot.slane %v936_v52, 4  ;;  %v943_v48 = vsel %vm34_vm2, %v222_v36, -inf  ;;  %v950_v59 = vsel %vm34_vm2, %v230_v37, -inf }
  0x39   :  { %v957_v56 = vsel %vm34_vm2, %v238_v34, -inf  ;;  %v924_v60 = vmax.f32 %v922_v55, %v923_v58  ;;  %v944_v62 = vrot.slane %v943_v48, 4  ;;  %v951_v4 = vrot.slane %v950_v59, 4 }
  0x3a   :  { %v931_v61 = vmax.f32 %v929_v44, %v930_v16  ;;  %v938_v63 = vmax.f32 %v936_v52, %v937_v28  ;;  %v958_v0 = vrot.slane %v957_v56, 4  ;;  %v964_v5 = vsel %vm34_vm2, %v237_v50, -inf }
  0x3b   :  { %v971_v49 = vsel %vm34_vm2, %v239_v35, -inf  ;;  %v925_v3 = vrot.slane %v924_v60, 2  ;;  %v945_v8 = vmax.f32 %v943_v48, %v944_v62  ;;  %v952_v9 = vmax.f32 %v950_v59, %v951_v4 }
  0x3c   :  { %v932_v57 = vrot.slane %v931_v61, 2  ;;  %v939_v6 = vrot.slane %v938_v63, 2  ;;  %v959_v14 = vmax.f32 %v957_v56, %v958_v0  ;;  %v965_v15 = vrot.slane %v964_v5, 4 }
  0x3d   :  { %v972_v7 = vrot.slane %v971_v49, 4  ;;  %v926_v19 = vmax.f32 %v924_v60, %v925_v3  ;;  %v946_v20 = vrot.slane %v945_v8, 2  ;;  %v953_v41 = vrot.slane %v952_v9, 2 }
  0x3e   :  { %v933_v1 = vmax.f32 %v931_v61, %v932_v57  ;;  %v940_v39 = vmax.f32 %v938_v63, %v939_v6  ;;  %v960_v42 = vrot.slane %v959_v14, 2  ;;  %v966_v21 = vmax.f32 %v964_v5, %v965_v15 }
  0x3f   :  { %v4022_v40 = vld [vmem:[#allocation2 + $0x11] sm:$0xff]  ;;  %v973_v43 = vmax.f32 %v971_v49, %v972_v7  ;;  %v927_v37 = vrot.slane %v926_v19, 1  ;;  %v947_v46 = vmax.f32 %v945_v8, %v946_v20  ;;  %v954_v47 = vmax.f32 %v952_v9, %v953_v41 }
  0x40   :  { %9183 = vmatmul.mubr.msk.f32.vlgmr.msra.gmra.mrb[0].mxu0 %vm32_vm1, %v4022_v40  ;;  %v934_v50 = vrot.slane %v933_v1, 1  ;;  %v941_v36 = vrot.slane %v940_v39, 1  ;;  %v961_v22 = vmax.f32 %v959_v14, %v960_v42  ;;  %v967_v34 = vrot.slane %v966_v21, 2 }
  0x41   :  { %9207 = vmatpush3.msk.msra.mxu0 %vm4087_vm0, %v10115_v2  ;;  %v974_v35 = vrot.slane %v973_v43, 2  ;;  %v10372_v26 = vmax.f32 %v926_v19, %v927_v37  ;;  %v948_v55 = vrot.slane %v947_v46, 1  ;;  %v955_v44 = vrot.slane %v954_v47, 1 }
  0x42   :  { %v10374_v27 = vmax.f32 %v933_v1, %v934_v50  ;;  %v10376_v52 = vmax.f32 %v940_v39, %v941_v36  ;;  %v962_v58 = vrot.slane %v961_v22, 1  ;;  %v968_v16 = vmax.f32 %v966_v21, %v967_v34 }
  0x43   :  { %v975_v28 = vmax.f32 %v973_v43, %v974_v35  ;;  %v10378_v48 = vmax.f32 %v947_v46, %v948_v55  ;;  %v10380_v59 = vmax.f32 %v954_v47, %v955_v44  ;;  %v978_v2 = vsel %vm34_vm2, %v10330_v51, -inf }
  0x44   :  { %v985_v56 = vsel %vm34_vm2, %v255_v12, -inf  ;;  %v10388_v60 = vmax.f32 %v961_v22, %v962_v58  ;;  %v969_v61 = vrot.slane %v968_v16, 1  ;;  %v979_v4 = vrot.slane %v978_v2, 4 }
  0x45   :  { %v976_v62 = vrot.slane %v975_v28, 1  ;;  %v986_v63 = vrot.slane %v985_v56, 4  ;;  %v992_v0 = vsel %vm34_vm2, %v10337_v11, -inf  ;;  %v999_v5 = vsel %vm34_vm2, %v256_v38, -inf }
  0x46   :  { %v1006_v49 = vsel %vm34_vm2, %v10347_v54, -inf  ;;  %v10398_v51 = vmax.f32 %v968_v16, %v969_v61  ;;  %v980_v3 = vmax.f32 %v978_v2, %v979_v4  ;;  %v993_v57 = vrot.slane %v992_v0, 4 }
  0x47   :  { %v10400_v12 = vmax.f32 %v975_v28, %v976_v62  ;;  %v987_v8 = vmax.f32 %v985_v56, %v986_v63  ;;  %v1000_v9 = vrot.slane %v999_v5, 4  ;;  %v1007_v6 = vrot.slane %v1006_v49, 4 }
  0x48   :  { %v1013_v14 = vsel %vm34_vm2, %v272_v45, -inf  ;;  %v981_v11 = vrot.slane %v980_v3, 2  ;;  %v994_v15 = vmax.f32 %v992_v0, %v993_v57  ;;  %v1020_v7 = vsel %vm34_vm2, %v10353_v13, -inf }
  0x49   :  { %v1014_v38 = vrot.slane %v1013_v14, 4  ;;  %v988_v19 = vrot.slane %v987_v8, 2  ;;  %v1001_v1 = vmax.f32 %v999_v5, %v1000_v9  ;;  %v1008_v20 = vmax.f32 %v1006_v49, %v1007_v6 }
  0x4a   :  { %v1021_v41 = vrot.slane %v1020_v7, 4  ;;  %v982_v40 = vmax.f32 %v980_v3, %v981_v11  ;;  %v995_v39 = vrot.slane %v994_v15, 2  ;;  %v1027_v54 = vsel %vm34_vm2, %v273_v53, -inf }
  0x4b   :  { %v1015_v42 = vmax.f32 %v1013_v14, %v1014_v38  ;;  %v989_v21 = vmax.f32 %v987_v8, %v988_v19  ;;  %v1002_v45 = vrot.slane %v1001_v1, 2  ;;  %v1009_v43 = vrot.slane %v1008_v20, 2 }
  0x4c   :  { %v1022_v37 = vmax.f32 %v1020_v7, %v1021_v41  ;;  %v983_v50 = vrot.slane %v982_v40, 1  ;;  %v996_v46 = vmax.f32 %v994_v15, %v995_v39  ;;  %v1028_v36 = vrot.slane %v1027_v54, 4 }
  0x4d   :  { %v1016_v47 = vrot.slane %v1015_v42, 2  ;;  %v990_v22 = vrot.slane %v989_v21, 1  ;;  %v1003_v34 = vmax.f32 %v1001_v1, %v1002_v45  ;;  %v1010_v35 = vmax.f32 %v1008_v20, %v1009_v43 }
  0x4e   :  { %v1023_v55 = vrot.slane %v1022_v37, 2  ;;  %v984_v44 = vmax.f32 %v982_v40, %v983_v50  ;;  %v997_v58 = vrot.slane %v996_v46, 1  ;;  %v1029_v28 = vmax.f32 %v1027_v54, %v1028_v36 }
  0x4f   :  { %v1017_v16 = vmax.f32 %v1015_v42, %v1016_v47  ;;  %v991_v2 = vmax.f32 %v989_v21, %v990_v22  ;;  %v1004_v13 = vrot.slane %v1003_v34, 1  ;;  %v1011_v56 = vrot.slane %v1010_v35, 1 }
  0x50   :  { %v1024_v53 = vmax.f32 %v1022_v37, %v1023_v55  ;;  %v998_v61 = vmax.f32 %v996_v46, %v997_v58  ;;  %v1030_v4 = vrot.slane %v1029_v28, 2  ;;  %v1730_v63 = vsel %vm32_vm1, %v10372_v26, -inf }
  0x51   :  { %v1018_v62 = vrot.slane %v1017_v16, 1  ;;  %v1005_v0 = vmax.f32 %v1003_v34, %v1004_v13  ;;  %v1012_v5 = vmax.f32 %v1010_v35, %v1011_v56  ;;  %v1731_v3 = vsel %vm32_vm1, %v984_v44, -inf }
  0x52   :  { %v1025_v49 = vrot.slane %v1024_v53, 1  ;;  %v1031_v8 = vmax.f32 %v1029_v28, %v1030_v4  ;;  %v1732_v9 = vmax.f32 %v1730_v63, %v1731_v3  ;;  %v1733_v6 = vsel %vm32_vm1, %v10374_v27, -inf }
  0x53   :  { %v1019_v57 = vmax.f32 %v1017_v16, %v1018_v62  ;;  %v1734_v11 = vsel %vm32_vm1, %v991_v2, -inf  ;;  %v1736_v15 = vsel %vm32_vm1, %v10376_v52, -inf  ;;  %v1737_v38 = vsel %vm32_vm1, %v998_v61, -inf }
  0x54   :  { %v1026_v14 = vmax.f32 %v1024_v53, %v1025_v49  ;;  %v1032_v26 = vrot.slane %v1031_v8, 1  ;;  %v1735_v7 = vmax.f32 %v1733_v6, %v1734_v11  ;;  %v1738_v19 = vmax.f32 %v1736_v15, %v1737_v38 }
  0x55   :  { %v1739_v1 = vsel %vm32_vm1, %v10378_v48, -inf  ;;  %v1740_v20 = vsel %vm32_vm1, %v1005_v0, -inf  ;;  %v1742_v41 = vsel %vm32_vm1, %v10380_v59, -inf  ;;  %v1743_v27 = vsel %vm32_vm1, %v1012_v5, -inf }
  0x56   :  { %v1745_v40 = vsel %vm32_vm1, %v10388_v60, -inf  ;;  %v1033_v39 = vmax.f32 %v1031_v8, %v1032_v26  ;;  %v1741_v52 = vmax.f32 %v1739_v1, %v1740_v20  ;;  %v1744_v42 = vmax.f32 %v1742_v41, %v1743_v27 }
  0x57   :  { %v1746_v54 = vsel %vm32_vm1, %v1019_v57, -inf  ;;  %v1748_v45 = vsel %vm32_vm1, %v10398_v51, -inf  ;;  %v1749_v48 = vsel %vm32_vm1, %v1026_v14, -inf  ;;  %v1751_v43 = vsel %vm32_vm1, %v10400_v12, -inf }
  0x58   :  { %v1747_v21 = vmax.f32 %v1745_v40, %v1746_v54  ;;  %v1750_v59 = vmax.f32 %v1748_v45, %v1749_v48  ;;  %v1752_v37 = vsel %vm32_vm1, %v1033_v39, -inf  ;;  %v1976_v50 = vsel %vm1962_vm3, %v1735_v7, %v1732_v9 }
  0x59   :  { %v281_v60 = vrot.slane %v10158_v17, %v10206_v33  ;;  %v1753_v46 = vmax.f32 %v1751_v43, %v1752_v37  ;;  %v1977_v47 = vsel %vm1964_vm4, %v1738_v19, %v1976_v50  ;;  %v288_v51 = vrot.slane %v274_v29, %v10206_v33 }
  0x5a   :  { %v298_v36 = vrot.slane %v10163_v18, %v10206_v33  ;;  %v1978_v12 = vsel %vm1966_vm5, %v1741_v52, %v1977_v47  ;;  %v13284_v34 = vcombine.high %v10163_v18, %v10163_v18  ;;  %v10453_v55 = vrot.slane %v10170_v23, %v10206_v33 }
  0x5b   :  { %v289_v22 = vcombine.high %v281_v60, %v281_v60  ;;  %v1979_v44 = vsel %vm1968_vm6, %v1744_v42, %v1978_v12  ;;  %v290_v58 = vcombine.high %v288_v51, %v288_v51  ;;  %v13285_v29 = vcombine.high %v10170_v23, %v10170_v23 }
  0x5c   :  { %v305_v35 = vrot.slane %v13284_v34, %v10206_v33  ;;  %v306_v17 = vcombine.high %v298_v36, %v298_v36  ;;  %v1980_v28 = vsel %vm1970_vm7, %v1747_v21, %v1979_v44  ;;  %v323_v18 = vcombine.high %v10453_v55, %v10453_v55 }
  0x5d   :  { %v10460_v16 = vrot.slane %v13285_v29, %v10206_v33  ;;  %v10467_v13 = vrot.slane %v10175_v24, %v10206_v33  ;;  %v1981_v56 = vsel %vm1972_vm8, %v1750_v59, %v1980_v28  ;;  %v13286_v23 = vcombine.high %v10175_v24, %v10175_v24 }
  0x5e   :  { %v307_v2 = vcombine.high %v305_v35, %v305_v35  ;;  %v1034_v62 = vsel %vm34_vm2, %v281_v60, -inf  ;;  %v1982_v4 = vsel %vm1974_vm9, %v1753_v46, %v1981_v56  ;;  %v1041_v5 = vsel %vm34_vm2, %v289_v22, -inf }
  0x5f   :  { %v324_v53 = vcombine.high %v10460_v16, %v10460_v16  ;;  %v10476_v61 = vrot.slane %v13286_v23, %v10206_v33  ;;  %v340_v63 = vcombine.high %v10467_v13, %v10467_v13  ;;  %v1035_v0 = vrot.slane %v1034_v62, 4  ;;  %2035 = vst.msk [vmem:[#allocation2 + $0x21] sm:$0xff] %vm32_vm1, %v1982_v4 }
  0x60   :  { %v1042_v3 = vrot.slane %v1041_v5, 4  ;;  %v1048_v24 = vsel %vm34_vm2, %v288_v51, -inf  ;;  %v1055_v57 = vsel %vm34_vm2, %v290_v58, -inf  ;;  %v1062_v14 = vsel %vm34_vm2, %v298_v36, -inf }
  0x61   :  { %v341_v49 = vcombine.high %v10476_v61, %v10476_v61  ;;  %v1036_v8 = vmax.f32 %v1034_v62, %v1035_v0  ;;  %v1049_v9 = vrot.slane %v1048_v24, 4  ;;  %v1056_v6 = vrot.slane %v1055_v57, 4 }
  0x62   :  { %v1043_v11 = vmax.f32 %v1041_v5, %v1042_v3  ;;  %v1063_v15 = vrot.slane %v1062_v14, 4  ;;  %v1069_v38 = vsel %vm34_vm2, %v306_v17, -inf  ;;  %v1076_v26 = vsel %vm34_vm2, %v305_v35, -inf }
  0x63   :  { %v1037_v7 = vrot.slane %v1036_v8, 2  ;;  %v1050_v19 = vmax.f32 %v1048_v24, %v1049_v9  ;;  %v1057_v1 = vmax.f32 %v1055_v57, %v1056_v6  ;;  %v1070_v20 = vrot.slane %v1069_v38, 4 }
  0x64   :  { %v1044_v41 = vrot.slane %v1043_v11, 2  ;;  %v1064_v27 = vmax.f32 %v1062_v14, %v1063_v15  ;;  %v1077_v40 = vrot.slane %v1076_v26, 4  ;;  %v1083_v39 = vsel %vm34_vm2, %v307_v2, -inf }
  0x65   :  { %v1038_v52 = vmax.f32 %v1036_v8, %v1037_v7  ;;  %v1051_v42 = vrot.slane %v1050_v19, 2  ;;  %v1058_v54 = vrot.slane %v1057_v1, 2  ;;  %v1071_v21 = vmax.f32 %v1069_v38, %v1070_v20 }
  0x66   :  { %v1045_v45 = vmax.f32 %v1043_v11, %v1044_v41  ;;  %v1065_v48 = vrot.slane %v1064_v27, 2  ;;  %v1078_v43 = vmax.f32 %v1076_v26, %v1077_v40  ;;  %v1084_v59 = vrot.slane %v1083_v39, 4  ;;  %v4023_v37 = vld [vmem:[#allocation2 + $0x21] sm:$0xff] }
  0x67   :  { %v1039_v50 = vrot.slane %v1038_v52, 1  ;;  %v1052_v60 = vmax.f32 %v1050_v19, %v1051_v42  ;;  %v1059_v46 = vmax.f32 %v1057_v1, %v1058_v54  ;;  %v1072_v47 = vrot.slane %v1071_v21, 2  ;;  %9185 = vmatprep.mubr.msk.f32.mxu0 %vm32_vm1, %v4023_v37 }
  0x68   :  { %v1046_v51 = vrot.slane %v1045_v45, 1  ;;  %v1066_v36 = vmax.f32 %v1064_v27, %v1065_v48  ;;  %v1079_v12 = vrot.slane %v1078_v43, 2  ;;  %v1085_v22 = vmax.f32 %v1083_v39, %v1084_v59 }
  0x69   :  { %v10493_v34 = vmax.f32 %v1038_v52, %v1039_v50  ;;  %v1053_v35 = vrot.slane %v1052_v60, 1  ;;  %v1060_v44 = vrot.slane %v1059_v46, 1  ;;  %v1073_v58 = vmax.f32 %v1071_v21, %v1072_v47 }
  0x6a   :  { %v10495_v17 = vmax.f32 %v1045_v45, %v1046_v51  ;;  %v1067_v29 = vrot.slane %v1066_v36, 1  ;;  %v1080_v28 = vmax.f32 %v1078_v43, %v1079_v12  ;;  %v1086_v2 = vrot.slane %v1085_v22, 2 }
  0x6b   :  { %v10497_v56 = vmax.f32 %v1052_v60, %v1053_v35  ;;  %v10499_v23 = vmax.f32 %v1059_v46, %v1060_v44  ;;  %v1074_v62 = vrot.slane %v1073_v58, 1  ;;  %v1090_v4 = vsel %vm34_vm2, %v10453_v55, -inf }
  0x6c   :  { %v10503_v0 = vmax.f32 %v1066_v36, %v1067_v29  ;;  %v1081_v5 = vrot.slane %v1080_v28, 1  ;;  %v1087_v3 = vmax.f32 %v1085_v22, %v1086_v2  ;;  %v1091_v24 = vrot.slane %v1090_v4, 4 }
  0x6d   :  { %v10505_v57 = vmax.f32 %v1073_v58, %v1074_v62  ;;  %v1097_v8 = vsel %vm34_vm2, %v323_v18, -inf  ;;  %v1104_v9 = vsel %vm34_vm2, %v10460_v16, -inf  ;;  %v1111_v6 = vsel %vm34_vm2, %v324_v53, -inf }
  0x6e   :  { %v10517_v14 = vmax.f32 %v1080_v28, %v1081_v5  ;;  %v1088_v11 = vrot.slane %v1087_v3, 1  ;;  %v1092_v15 = vmax.f32 %v1090_v4, %v1091_v24  ;;  %v1098_v38 = vrot.slane %v1097_v8, 4 }
  0x6f   :  { %v1105_v26 = vrot.slane %v1104_v9, 4  ;;  %v1112_v7 = vrot.slane %v1111_v6, 4  ;;  %v1118_v55 = vsel %vm34_vm2, %v10467_v13, -inf  ;;  %v1125_v18 = vsel %vm34_vm2, %v340_v63, -inf }
  0x70   :  { %v10525_v19 = vmax.f32 %v1087_v3, %v1088_v11  ;;  %v1093_v16 = vrot.slane %v1092_v15, 2  ;;  %v1099_v1 = vmax.f32 %v1097_v8, %v1098_v38  ;;  %v1119_v53 = vrot.slane %v1118_v55, 4 }
  0x71   :  { %v1106_v20 = vmax.f32 %v1104_v9, %v1105_v26  ;;  %v1113_v41 = vmax.f32 %v1111_v6, %v1112_v7  ;;  %v1126_v27 = vrot.slane %v1125_v18, 4  ;;  %v1132_v40 = vsel %vm34_vm2, %v10476_v61, -inf }
  0x72   :  { %v1094_v39 = vmax.f32 %v1092_v15, %v1093_v16  ;;  %v1100_v52 = vrot.slane %v1099_v1, 2  ;;  %v1120_v42 = vmax.f32 %v1118_v55, %v1119_v53  ;;  %v1133_v54 = vrot.slane %v1132_v40, 4 }
  0x73   :  { %v1107_v21 = vrot.slane %v1106_v20, 2  ;;  %v1114_v45 = vrot.slane %v1113_v41, 2  ;;  %v1127_v13 = vmax.f32 %v1125_v18, %v1126_v27  ;;  %v1139_v63 = vsel %vm34_vm2, %v341_v49, -inf }
  0x74   :  { %v1095_v48 = vrot.slane %v1094_v39, 1  ;;  %v1101_v43 = vmax.f32 %v1099_v1, %v1100_v52  ;;  %v1121_v59 = vrot.slane %v1120_v42, 2  ;;  %v1134_v37 = vmax.f32 %v1132_v40, %v1133_v54 }
  0x75   :  { %v1108_v50 = vmax.f32 %v1106_v20, %v1107_v21  ;;  %v1115_v60 = vmax.f32 %v1113_v41, %v1114_v45  ;;  %v1128_v46 = vrot.slane %v1127_v13, 2  ;;  %v1140_v47 = vrot.slane %v1139_v63, 4 }
  0x76   :  { %v1096_v51 = vmax.f32 %v1094_v39, %v1095_v48  ;;  %v1102_v36 = vrot.slane %v1101_v43, 1  ;;  %v1122_v12 = vmax.f32 %v1120_v42, %v1121_v59  ;;  %v1135_v22 = vrot.slane %v1134_v37, 2 }
  0x77   :  { %v1109_v35 = vrot.slane %v1108_v50, 1  ;;  %v1116_v44 = vrot.slane %v1115_v60, 1  ;;  %v1129_v58 = vmax.f32 %v1127_v13, %v1128_v46  ;;  %v1141_v29 = vmax.f32 %v1139_v63, %v1140_v47 }
  0x78   :  { %v1103_v28 = vmax.f32 %v1101_v43, %v1102_v36  ;;  %v1123_v61 = vrot.slane %v1122_v12, 1  ;;  %v1136_v2 = vmax.f32 %v1134_v37, %v1135_v22  ;;  %v1754_v49 = vsel %vm32_vm1, %v10493_v34, -inf }
  0x79   :  { %v1110_v62 = vmax.f32 %v1108_v50, %v1109_v35  ;;  %v1117_v4 = vmax.f32 %v1115_v60, %v1116_v44  ;;  %v1130_v5 = vrot.slane %v1129_v58, 1  ;;  %v1142_v3 = vrot.slane %v1141_v29, 2 }
  0x7a   :  { %v1124_v24 = vmax.f32 %v1122_v12, %v1123_v61  ;;  %v1137_v8 = vrot.slane %v1136_v2, 1  ;;  %v1755_v9 = vsel %vm32_vm1, %v1096_v51, -inf  ;;  %v1757_v6 = vsel %vm32_vm1, %v10495_v17, -inf }
  0x7b   :  { %v1131_v11 = vmax.f32 %v1129_v58, %v1130_v5  ;;  %v1143_v15 = vmax.f32 %v1141_v29, %v1142_v3  ;;  %v1756_v38 = vmax.f32 %v1754_v49, %v1755_v9  ;;  %v1758_v26 = vsel %vm32_vm1, %v1103_v28, -inf  ;;  %v10590_v58 = vld.sshfl [vmem:[%s13273_s0 + $0x78] sm:$0xff pattern:$0x76325410] }
  0x7c   :  { %v1138_v7 = vmax.f32 %v1136_v2, %v1137_v8  ;;  %v1759_v55 = vmax.f32 %v1757_v6, %v1758_v26  ;;  %v1760_v34 = vsel %vm32_vm1, %v10497_v56, -inf  ;;  %v1761_v18 = vsel %vm32_vm1, %v1110_v62, -inf }
  0x7d   :  { %v1144_v16 = vrot.slane %v1143_v15, 1  ;;  %v1762_v1 = vmax.f32 %v1760_v34, %v1761_v18  ;;  %v1763_v53 = vsel %vm32_vm1, %v10499_v23, -inf  ;;  %v1764_v20 = vsel %vm32_vm1, %v1117_v4, -inf }
  0x7e   :  { %v1765_v17 = vmax.f32 %v1763_v53, %v1764_v20  ;;  %v1766_v41 = vsel %vm32_vm1, %v10503_v0, -inf  ;;  %v1767_v27 = vsel %vm32_vm1, %v1124_v24, -inf  ;;  %v1769_v40 = vsel %vm32_vm1, %v10505_v57, -inf }
  0x7f   :  { %v1145_v39 = vmax.f32 %v1143_v15, %v1144_v16  ;;  %v1768_v56 = vmax.f32 %v1766_v41, %v1767_v27  ;;  %v1770_v52 = vsel %vm32_vm1, %v1131_v11, -inf  ;;  %v1772_v42 = vsel %vm32_vm1, %v10517_v14, -inf }
  0x80   :  { %v1771_v54 = vmax.f32 %v1769_v40, %v1770_v52  ;;  %v1773_v23 = vsel %vm32_vm1, %v1138_v7, -inf  ;;  %v1775_v21 = vsel %vm32_vm1, %v10525_v19, -inf  ;;  %v1983_v0 = vsel %vm1962_vm3, %v1759_v55, %v1756_v38 }
  0x81   :  { %v1774_v45 = vmax.f32 %v1772_v42, %v1773_v23  ;;  %v1776_v13 = vsel %vm32_vm1, %v1145_v39, -inf  ;;  %v1984_v57 = vsel %vm1964_vm4, %v1762_v1, %v1983_v0  ;;  %v349_v63 = vrot.slane %v10180_v25, %v10206_v33 }
  0x82   :  { %v1777_v48 = vmax.f32 %v1775_v21, %v1776_v13  ;;  %v1985_v43 = vsel %vm1966_vm5, %v1765_v17, %v1984_v57  ;;  %v13287_v14 = vcombine.high %v10180_v25, %v10180_v25  ;;  %v366_v19 = vrot.slane %v10193_v30, %v10206_v33 }
  0x83   :  { %v1986_v37 = vsel %vm1968_vm6, %v1768_v56, %v1985_v43  ;;  %v357_v50 = vcombine.high %v349_v63, %v349_v63  ;;  %v13288_v60 = vcombine.high %v10193_v30, %v10193_v30  ;;  %v10575_v47 = vrot.slane %v10198_v31, %v10206_v33 }
  0x84   :  { %v356_v59 = vrot.slane %v13287_v14, %v10206_v33  ;;  %v1987_v51 = vsel %vm1970_vm7, %v1771_v54, %v1986_v37  ;;  %v374_v25 = vcombine.high %v366_v19, %v366_v19  ;;  %v13289_v12 = vcombine.high %v10198_v31, %v10198_v31 }
  0x85   :  { %v373_v46 = vrot.slane %v13288_v60, %v10206_v33  ;;  %v1988_v35 = vsel %vm1972_vm8, %v1774_v45, %v1987_v51  ;;  %v391_v30 = vcombine.high %v10575_v47, %v10575_v47  ;;  %v13290_v31 = vcombine.high %v10203_v32, %v10203_v32 }
  0x86   :  { %v358_v36 = vcombine.high %v356_v59, %v356_v59  ;;  %v10582_v22 = vrot.slane %v13289_v12, %v10206_v33  ;;  %v1989_v29 = vsel %vm1974_vm9, %v1777_v48, %v1988_v35  ;;  %v1146_v2 = vsel %vm34_vm2, %v349_v63, -inf }
  0x87   :  { %v375_v44 = vcombine.high %v373_v46, %v373_v46  ;;  %v10599_v61 = vrot.slane %v13290_v31, %v10206_v33  ;;  %2036 = vst.msk [vmem:[#allocation2 + $0x31] sm:$0xff] %vm32_vm1, %v1989_v29  ;;  %v408_v49 = vcombine.high %v10590_v58, %v10590_v58  ;;  %v1147_v62 = vrot.slane %v1146_v2, 4 }
  0x88   :  { %v392_v28 = vcombine.high %v10582_v22, %v10582_v22  ;;  %v1153_v4 = vsel %vm34_vm2, %v357_v50, -inf  ;;  %v1160_v5 = vsel %vm34_vm2, %v356_v59, -inf  ;;  %v1167_v32 = vsel %vm34_vm2, %v358_v36, -inf }
  0x89   :  { %v409_v3 = vcombine.high %v10599_v61, %v10599_v61  ;;  %v1154_v24 = vrot.slane %v1153_v4, 4  ;;  %v1161_v8 = vrot.slane %v1160_v5, 4  ;;  %v1148_v9 = vmax.f32 %v1146_v2, %v1147_v62 }
  0x8a   :  { %v1168_v6 = vrot.slane %v1167_v32, 4  ;;  %v1174_v11 = vsel %vm34_vm2, %v366_v19, -inf  ;;  %v1181_v15 = vsel %vm34_vm2, %v374_v25, -inf  ;;  %v1188_v16 = vsel %vm34_vm2, %v373_v46, -inf }
  0x8b   :  { %v1155_v38 = vmax.f32 %v1153_v4, %v1154_v24  ;;  %v1162_v26 = vmax.f32 %v1160_v5, %v1161_v8  ;;  %v1175_v7 = vrot.slane %v1174_v11, 4  ;;  %v1182_v55 = vrot.slane %v1181_v15, 4 }
  0x8c   :  { %v1149_v34 = vrot.slane %v1148_v9, 2  ;;  %v1169_v18 = vmax.f32 %v1167_v32, %v1168_v6  ;;  %v1195_v1 = vsel %vm34_vm2, %v375_v44, -inf  ;;  %v1189_v39 = vrot.slane %v1188_v16, 4 }
  0x8d   :  { %v1156_v53 = vrot.slane %v1155_v38, 2  ;;  %v1163_v20 = vrot.slane %v1162_v26, 2  ;;  %v1176_v17 = vmax.f32 %v1174_v11, %v1175_v7  ;;  %v1183_v41 = vmax.f32 %v1181_v15, %v1182_v55 }
  0x8e   :  { %v1150_v27 = vmax.f32 %v1148_v9, %v1149_v34  ;;  %v1170_v40 = vrot.slane %v1169_v18, 2  ;;  %v1196_v56 = vrot.slane %v1195_v1, 4  ;;  %v4024_v52 = vld [vmem:[#allocation2 + $0x31] sm:$0xff]  ;;  %v1190_v13 = vmax.f32 %v1188_v16, %v1189_v39 }
  0x8f   :  { %v1157_v42 = vmax.f32 %v1155_v38, %v1156_v53  ;;  %v1164_v54 = vmax.f32 %v1162_v26, %v1163_v20  ;;  %v1177_v23 = vrot.slane %v1176_v17, 2  ;;  %v1184_v21 = vrot.slane %v1183_v41, 2  ;;  %9186 = vmatmul.mubr.msk.f32.gmra.mrb[2].mxu0 %vm32_vm1, %v4024_v52 }
  0x90   :  { %v1151_v0 = vrot.slane %v1150_v27, 1  ;;  %v1171_v45 = vmax.f32 %v1169_v18, %v1170_v40  ;;  %v1197_v57 = vmax.f32 %v1195_v1, %v1196_v56  ;;  %v1191_v37 = vrot.slane %v1190_v13, 2 }
  0x91   :  { %v1158_v63 = vrot.slane %v1157_v42, 1  ;;  %v1165_v48 = vrot.slane %v1164_v54, 1  ;;  %v1178_v43 = vmax.f32 %v1176_v17, %v1177_v23  ;;  %v1185_v14 = vmax.f32 %v1183_v41, %v1184_v21 }
  0x92   :  { %v10615_v59 = vmax.f32 %v1150_v27, %v1151_v0  ;;  %v1172_v19 = vrot.slane %v1171_v45, 1  ;;  %v1198_v50 = vrot.slane %v1197_v57, 2  ;;  %v1192_v12 = vmax.f32 %v1190_v13, %v1191_v37 }
  0x93   :  { %v10617_v60 = vmax.f32 %v1157_v42, %v1158_v63  ;;  %v10619_v46 = vmax.f32 %v1164_v54, %v1165_v48  ;;  %v1179_v51 = vrot.slane %v1178_v43, 1  ;;  %v1186_v36 = vrot.slane %v1185_v14, 1 }
  0x94   :  { %v10621_v25 = vmax.f32 %v1171_v45, %v1172_v19  ;;  %v1199_v35 = vmax.f32 %v1197_v57, %v1198_v50  ;;  %v1202_v44 = vsel %vm34_vm2, %v10575_v47, -inf  ;;  %v1209_v62 = vsel %vm34_vm2, %v391_v30, -inf }
  0x95   :  { %v10625_v29 = vmax.f32 %v1178_v43, %v1179_v51  ;;  %v10627_v31 = vmax.f32 %v1185_v14, %v1186_v36  ;;  %v1203_v2 = vrot.slane %v1202_v44, 4  ;;  %v1193_v4 = vrot.slane %v1192_v12, 1 }
  0x96   :  { %v1200_v5 = vrot.slane %v1199_v35, 1  ;;  %v1210_v24 = vrot.slane %v1209_v62, 4  ;;  %v1216_v8 = vsel %vm34_vm2, %v10582_v22, -inf  ;;  %v1223_v6 = vsel %vm34_vm2, %v392_v28, -inf }
  0x97   :  { %v1204_v32 = vmax.f32 %v1202_v44, %v1203_v2  ;;  %v1217_v9 = vrot.slane %v1216_v8, 4  ;;  %v1230_v11 = vsel %vm34_vm2, %v10590_v58, -inf  ;;  %v10641_v15 = vmax.f32 %v1192_v12, %v1193_v4 }
  0x98   :  { %v10643_v47 = vmax.f32 %v1199_v35, %v1200_v5  ;;  %v1211_v30 = vmax.f32 %v1209_v62, %v1210_v24  ;;  %v1224_v38 = vrot.slane %v1223_v6, 4  ;;  %v1231_v55 = vrot.slane %v1230_v11, 4 }
  0x99   :  { %v1205_v26 = vrot.slane %v1204_v32, 2  ;;  %v1218_v7 = vmax.f32 %v1216_v8, %v1217_v9  ;;  %v1237_v34 = vsel %vm34_vm2, %v408_v49, -inf  ;;  %v1244_v16 = vsel %vm34_vm2, %v10599_v61, -inf }
  0x9a   :  { %v1212_v22 = vrot.slane %v1211_v30, 2  ;;  %v1225_v18 = vmax.f32 %v1223_v6, %v1224_v38  ;;  %v1238_v28 = vrot.slane %v1237_v34, 4  ;;  %v1232_v20 = vmax.f32 %v1230_v11, %v1231_v55 }
  0x9b   :  { %v1206_v1 = vmax.f32 %v1204_v32, %v1205_v26  ;;  %v1219_v53 = vrot.slane %v1218_v7, 2  ;;  %v1245_v17 = vrot.slane %v1244_v16, 4  ;;  %v1251_v58 = vsel %vm34_vm2, %v409_v3, -inf  ;;  %v90_v26 = vld [vmem:[%s13273_s0 + $0x80] sm:$0xff] }
  0x9c   :  { %v1213_v41 = vmax.f32 %v1211_v30, %v1212_v22  ;;  %v1226_v27 = vrot.slane %v1225_v18, 2  ;;  %v1239_v40 = vmax.f32 %v1237_v34, %v1238_v28  ;;  %v1233_v56 = vrot.slane %v1232_v20, 2 }
  0x9d   :  { %v1207_v39 = vrot.slane %v1206_v1, 1  ;;  %v1220_v49 = vmax.f32 %v1218_v7, %v1219_v53  ;;  %v1246_v52 = vmax.f32 %v1244_v16, %v1245_v17  ;;  %v1252_v21 = vrot.slane %v1251_v58, 4 }
  0x9e   :  { %v1214_v42 = vrot.slane %v1213_v41, 1  ;;  %v1227_v54 = vmax.f32 %v1225_v18, %v1226_v27  ;;  %v1240_v23 = vrot.slane %v1239_v40, 2  ;;  %v1234_v13 = vmax.f32 %v1232_v20, %v1233_v56 }
  0x9f   :  { %v1208_v0 = vmax.f32 %v1206_v1, %v1207_v39  ;;  %v1221_v45 = vrot.slane %v1220_v49, 1  ;;  %v1247_v57 = vrot.slane %v1246_v52, 2  ;;  %v1253_v14 = vmax.f32 %v1251_v58, %v1252_v21 }
  0xa0   :  { %v1215_v63 = vmax.f32 %v1213_v41, %v1214_v42  ;;  %v1228_v48 = vrot.slane %v1227_v54, 1  ;;  %v1241_v43 = vmax.f32 %v1239_v40, %v1240_v23  ;;  %v1235_v61 = vrot.slane %v1234_v13, 1 }
  0xa1   :  { %v1222_v19 = vmax.f32 %v1220_v49, %v1221_v45  ;;  %v1248_v37 = vmax.f32 %v1246_v52, %v1247_v57  ;;  %v1778_v3 = vsel %vm32_vm1, %v10615_v59, -inf  ;;  %v1254_v36 = vrot.slane %v1253_v14, 2 }
  0xa2   :  { %v1229_v50 = vmax.f32 %v1227_v54, %v1228_v48  ;;  %v1242_v51 = vrot.slane %v1241_v43, 1  ;;  %v1779_v12 = vsel %vm32_vm1, %v1208_v0, -inf  ;;  %v1236_v35 = vmax.f32 %v1234_v13, %v1235_v61 }
  0xa3   :  { %v1249_v44 = vrot.slane %v1248_v37, 1  ;;  %v1780_v2 = vmax.f32 %v1778_v3, %v1779_v12  ;;  %v1781_v62 = vsel %vm32_vm1, %v10617_v60, -inf  ;;  %v1255_v5 = vmax.f32 %v1253_v14, %v1254_v36 }
  0xa4   :  { %v1243_v4 = vmax.f32 %v1241_v43, %v1242_v51  ;;  %v1782_v24 = vsel %vm32_vm1, %v1215_v63, -inf  ;;  %v1784_v8 = vsel %vm32_vm1, %v10619_v46, -inf  ;;  %v1785_v9 = vsel %vm32_vm1, %v1222_v19, -inf }
  0xa5   :  { %v1250_v32 = vmax.f32 %v1248_v37, %v1249_v44  ;;  %v1783_v59 = vmax.f32 %v1781_v62, %v1782_v24  ;;  %v1787_v6 = vsel %vm32_vm1, %v10621_v25, -inf  ;;  %v1256_v11 = vrot.slane %v1255_v5, 1 }
  0xa6   :  { %v1786_v30 = vmax.f32 %v1784_v8, %v1785_v9  ;;  %v1788_v38 = vsel %vm32_vm1, %v1229_v50, -inf  ;;  %v1790_v60 = vsel %vm32_vm1, %v10625_v29, -inf  ;;  %v1791_v46 = vsel %vm32_vm1, %v1236_v35, -inf  ;;  %v91_v29 = vld [vmem:[%s13273_s0 + $0x88] sm:$0xff] }
  0xa7   :  { %v1789_v7 = vmax.f32 %v1787_v6, %v1788_v38  ;;  %v1793_v55 = vsel %vm32_vm1, %v10627_v31, -inf  ;;  %v1794_v34 = vsel %vm32_vm1, %v1243_v4, -inf  ;;  %v1257_v25 = vmax.f32 %v1255_v5, %v1256_v11  ;;  %v92_v31 = vld [vmem:[%s13273_s0 + $0x90] sm:$0xff] }
  0xa8   :  { %v1792_v22 = vmax.f32 %v1790_v60, %v1791_v46  ;;  %v1795_v18 = vmax.f32 %v1793_v55, %v1794_v34  ;;  %v1796_v28 = vsel %vm32_vm1, %v10641_v15, -inf  ;;  %v1797_v16 = vsel %vm32_vm1, %v1250_v32, -inf }
  0xa9   :  { %v1799_v1 = vsel %vm32_vm1, %v10643_v47, -inf  ;;  %v1990_v53 = vsel %vm1962_vm3, %v1783_v59, %v1780_v2  ;;  %v410_v20 = vcombine.high %v90_v26, %v90_v26  ;;  %v1798_v17 = vmax.f32 %v1796_v28, %v1797_v16  ;;  %v93_v47 = vld [vmem:[%s13273_s0 + $0x98] sm:$0xff] }
  0xaa   :  { %v1800_v41 = vsel %vm32_vm1, %v1257_v25, -inf  ;;  %v1991_v15 = vsel %vm1964_vm4, %v1786_v30, %v1990_v53  ;;  %v417_v27 = vrot.slane %v90_v26, %v10206_v33  ;;  %v427_v49 = vcombine.high %v91_v29, %v91_v29 }
  0xab   :  { %v1801_v40 = vmax.f32 %v1799_v1, %v1800_v41  ;;  %v1992_v58 = vsel %vm1966_vm5, %v1789_v7, %v1991_v15  ;;  %v424_v39 = vrot.slane %v410_v20, %v10206_v33  ;;  %v434_v42 = vrot.slane %v91_v29, %v10206_v33 }
  0xac   :  { %v1993_v56 = vsel %vm1968_vm6, %v1792_v22, %v1992_v58  ;;  %v425_v52 = vcombine.high %v417_v27, %v417_v27  ;;  %v444_v54 = vcombine.high %v92_v31, %v92_v31  ;;  %v441_v0 = vrot.slane %v427_v49, %v10206_v33 }
  0xad   :  { %v1994_v23 = vsel %vm1970_vm7, %v1795_v18, %v1993_v56  ;;  %v426_v21 = vcombine.high %v424_v39, %v424_v39  ;;  %v10701_v45 = vrot.slane %v92_v31, %v10206_v33  ;;  %v442_v57 = vcombine.high %v434_v42, %v434_v42 }
  0xae   :  { %v1995_v13 = vsel %vm1972_vm8, %v1798_v17, %v1994_v23  ;;  %v10705_v63 = vrot.slane %v444_v54, %v10206_v33  ;;  %v461_v48 = vcombine.high %v93_v47, %v93_v47  ;;  %v443_v14 = vcombine.high %v441_v0, %v441_v0 }
  0xaf   :  { %v1996_v43 = vsel %vm1974_vm9, %v1801_v40, %v1995_v13  ;;  %v459_v19 = vcombine.high %v10701_v45, %v10701_v45  ;;  %v10711_v61 = vrot.slane %v93_v47, %v10206_v33  ;;  %v1258_v50 = vsel %vm34_vm2, %v417_v27, -inf }
  0xb0   :  { %2037 = vst.msk [vmem:[#allocation2 + $0x41] sm:$0xff] %vm32_vm1, %v1996_v43  ;;  %v460_v37 = vcombine.high %v10705_v63, %v10705_v63  ;;  %v10717_v3 = vrot.slane %v461_v48, %v10206_v33  ;;  %v1265_v51 = vsel %vm34_vm2, %v425_v52, -inf  ;;  %v1259_v12 = vrot.slane %v1258_v50, 4 }
  0xb1   :  { %v476_v36 = vcombine.high %v10711_v61, %v10711_v61  ;;  %v1266_v35 = vrot.slane %v1265_v51, 4  ;;  %v1272_v44 = vsel %vm34_vm2, %v424_v39, -inf  ;;  %v1279_v4 = vsel %vm34_vm2, %v426_v21, -inf }
  0xb2   :  { %v477_v2 = vcombine.high %v10717_v3, %v10717_v3  ;;  %v1273_v62 = vrot.slane %v1272_v44, 4  ;;  %v1286_v5 = vsel %vm34_vm2, %v434_v42, -inf  ;;  %v1260_v24 = vmax.f32 %v1258_v50, %v1259_v12 }
  0xb3   :  { %v1267_v8 = vmax.f32 %v1265_v51, %v1266_v35  ;;  %v1280_v32 = vrot.slane %v1279_v4, 4  ;;  %v1287_v59 = vrot.slane %v1286_v5, 4  ;;  %v1293_v6 = vsel %vm34_vm2, %v442_v57, -inf }
  0xb4   :  { %v1274_v9 = vmax.f32 %v1272_v44, %v1273_v62  ;;  %v1300_v11 = vsel %vm34_vm2, %v441_v0, -inf  ;;  %v1307_v30 = vsel %vm34_vm2, %v443_v14, -inf  ;;  %v1261_v38 = vrot.slane %v1260_v24, 2 }
  0xb5   :  { %v1268_v60 = vrot.slane %v1267_v8, 2  ;;  %v1281_v26 = vmax.f32 %v1279_v4, %v1280_v32  ;;  %v1288_v7 = vmax.f32 %v1286_v5, %v1287_v59  ;;  %v1294_v55 = vrot.slane %v1293_v6, 4 }
  0xb6   :  { %v1275_v46 = vrot.slane %v1274_v9, 2  ;;  %v1301_v34 = vrot.slane %v1300_v11, 4  ;;  %v1308_v25 = vrot.slane %v1307_v30, 4  ;;  %v1262_v18 = vmax.f32 %v1260_v24, %v1261_v38 }
  0xb7   :  { %v4025_v22 = vld [vmem:[#allocation2 + $0x41] sm:$0xff]  ;;  %v1269_v28 = vmax.f32 %v1267_v8, %v1268_v60  ;;  %v1282_v29 = vrot.slane %v1281_v26, 2  ;;  %v1289_v16 = vrot.slane %v1288_v7, 2  ;;  %v1295_v53 = vmax.f32 %v1293_v6, %v1294_v55 }
  0xb8   :  { %9188 = vmatprep.mubr.msk.f32.mxu0 %vm32_vm1, %v4025_v22  ;;  %v1276_v1 = vmax.f32 %v1274_v9, %v1275_v46  ;;  %v1302_v31 = vmax.f32 %v1300_v11, %v1301_v34  ;;  %v1309_v20 = vmax.f32 %v1307_v30, %v1308_v25  ;;  %v1263_v17 = vrot.slane %v1262_v18, 1 }
  0xb9   :  { %v1270_v41 = vrot.slane %v1269_v28, 1  ;;  %v1283_v15 = vmax.f32 %v1281_v26, %v1282_v29  ;;  %v1290_v27 = vmax.f32 %v1288_v7, %v1289_v16  ;;  %v1296_v58 = vrot.slane %v1295_v53, 2 }
  0xba   :  { %v1277_v40 = vrot.slane %v1276_v1, 1  ;;  %v1303_v47 = vrot.slane %v1302_v31, 2  ;;  %v1310_v39 = vrot.slane %v1309_v20, 2  ;;  %v10732_v49 = vmax.f32 %v1262_v18, %v1263_v17 }
  0xbb   :  { %v10734_v56 = vmax.f32 %v1269_v28, %v1270_v41  ;;  %v1284_v52 = vrot.slane %v1283_v15, 1  ;;  %v1291_v42 = vrot.slane %v1290_v27, 1  ;;  %v1297_v23 = vmax.f32 %v1295_v53, %v1296_v58 }
  0xbc   :  { %v10736_v54 = vmax.f32 %v1276_v1, %v1277_v40  ;;  %v1304_v21 = vmax.f32 %v1302_v31, %v1303_v47  ;;  %v1311_v0 = vmax.f32 %v1309_v20, %v1310_v39  ;;  %v1314_v48 = vsel %vm34_vm2, %v10701_v45, -inf }
  0xbd   :  { %v10738_v13 = vmax.f32 %v1283_v15, %v1284_v52  ;;  %v10740_v57 = vmax.f32 %v1290_v27, %v1291_v42  ;;  %v1321_v43 = vsel %vm34_vm2, %v459_v19, -inf  ;;  %v1298_v14 = vrot.slane %v1297_v23, 1 }
  0xbe   :  { %v1305_v50 = vrot.slane %v1304_v21, 1  ;;  %v1312_v51 = vrot.slane %v1311_v0, 1  ;;  %v1315_v12 = vrot.slane %v1314_v48, 4  ;;  %v1322_v35 = vrot.slane %v1321_v43, 4 }
  0xbf   :  { %v1328_v44 = vsel %vm34_vm2, %v10705_v63, -inf  ;;  %v1335_v62 = vsel %vm34_vm2, %v460_v37, -inf  ;;  %v1342_v4 = vsel %vm34_vm2, %v10711_v61, -inf  ;;  %v10753_v5 = vmax.f32 %v1297_v23, %v1298_v14 }
  0xc0   :  { %v10755_v45 = vmax.f32 %v1304_v21, %v1305_v50  ;;  %v10757_v19 = vmax.f32 %v1311_v0, %v1312_v51  ;;  %v1316_v24 = vmax.f32 %v1314_v48, %v1315_v12  ;;  %v1323_v8 = vmax.f32 %v1321_v43, %v1322_v35 }
  0xc1   :  { %v1329_v32 = vrot.slane %v1328_v44, 4  ;;  %v1336_v59 = vrot.slane %v1335_v62, 4  ;;  %v1343_v9 = vrot.slane %v1342_v4, 4  ;;  %v1349_v63 = vsel %vm34_vm2, %v476_v36, -inf }
  0xc2   :  { %v1317_v6 = vrot.slane %v1316_v24, 2  ;;  %v1356_v37 = vsel %vm34_vm2, %v10717_v3, -inf  ;;  %v1363_v11 = vsel %vm34_vm2, %v477_v2, -inf  ;;  %v1324_v30 = vrot.slane %v1323_v8, 2 }
  0xc3   :  { %v1330_v38 = vmax.f32 %v1328_v44, %v1329_v32  ;;  %v1337_v60 = vmax.f32 %v1335_v62, %v1336_v59  ;;  %v1344_v26 = vmax.f32 %v1342_v4, %v1343_v9  ;;  %v1350_v46 = vrot.slane %v1349_v63, 4 }
  0xc4   :  { %v1318_v7 = vmax.f32 %v1316_v24, %v1317_v6  ;;  %v1357_v55 = vrot.slane %v1356_v37, 4  ;;  %v1364_v34 = vrot.slane %v1363_v11, 4  ;;  %v1325_v25 = vmax.f32 %v1323_v8, %v1324_v30 }
  0xc5   :  { %v1331_v61 = vrot.slane %v1330_v38, 2  ;;  %v1338_v22 = vrot.slane %v1337_v60, 2  ;;  %v1345_v36 = vrot.slane %v1344_v26, 2  ;;  %v1351_v28 = vmax.f32 %v1349_v63, %v1350_v46 }
  0xc6   :  { %v1319_v18 = vrot.slane %v1318_v7, 1  ;;  %v1358_v29 = vmax.f32 %v1356_v37, %v1357_v55  ;;  %v1365_v16 = vmax.f32 %v1363_v11, %v1364_v34  ;;  %v1326_v1 = vrot.slane %v1325_v25, 1  ;;  %v94_v11 = vld [vmem:[%s13273_s0 + $0xa0] sm:$0xff] }
  0xc7   :  { %v1332_v3 = vmax.f32 %v1330_v38, %v1331_v61  ;;  %v1339_v53 = vmax.f32 %v1337_v60, %v1338_v22  ;;  %v1346_v2 = vmax.f32 %v1344_v26, %v1345_v36  ;;  %v1352_v20 = vrot.slane %v1351_v28, 2  ;;  %v97_v36 = vld [vmem:[%s13273_s0 + $0xb8] sm:$0xff] }
  0xc8   :  { %v1320_v31 = vmax.f32 %v1318_v7, %v1319_v18  ;;  %v1359_v17 = vrot.slane %v1358_v29, 2  ;;  %v1366_v41 = vrot.slane %v1365_v16, 2  ;;  %v1327_v15 = vmax.f32 %v1325_v25, %v1326_v1 }
  0xc9   :  { %v1333_v27 = vrot.slane %v1332_v3, 1  ;;  %v1340_v40 = vrot.slane %v1339_v53, 1  ;;  %v1347_v58 = vrot.slane %v1346_v2, 1  ;;  %v1353_v47 = vmax.f32 %v1351_v28, %v1352_v20 }
  0xca   :  { %v1360_v39 = vmax.f32 %v1358_v29, %v1359_v17  ;;  %v1367_v52 = vmax.f32 %v1365_v16, %v1366_v41  ;;  %v1802_v42 = vsel %vm32_vm1, %v10732_v49, -inf  ;;  %v1803_v48 = vsel %vm32_vm1, %v1320_v31, -inf }
  0xcb   :  { %v1334_v23 = vmax.f32 %v1332_v3, %v1333_v27  ;;  %v1341_v21 = vmax.f32 %v1339_v53, %v1340_v40  ;;  %v1348_v0 = vmax.f32 %v1346_v2, %v1347_v58  ;;  %v1354_v43 = vrot.slane %v1353_v47, 1 }
  0xcc   :  { %v1361_v14 = vrot.slane %v1360_v39, 1  ;;  %v1368_v50 = vrot.slane %v1367_v52, 1  ;;  %v1804_v51 = vmax.f32 %v1802_v42, %v1803_v48  ;;  %v1805_v12 = vsel %vm32_vm1, %v10734_v56, -inf }
  0xcd   :  { %v1806_v35 = vsel %vm32_vm1, %v1327_v15, -inf  ;;  %v1808_v44 = vsel %vm32_vm1, %v10736_v54, -inf  ;;  %v1809_v62 = vsel %vm32_vm1, %v1334_v23, -inf  ;;  %v1355_v49 = vmax.f32 %v1353_v47, %v1354_v43 }
  0xce   :  { %v1362_v4 = vmax.f32 %v1360_v39, %v1361_v14  ;;  %v1369_v24 = vmax.f32 %v1367_v52, %v1368_v50  ;;  %v1807_v8 = vmax.f32 %v1805_v12, %v1806_v35  ;;  %v1810_v32 = vmax.f32 %v1808_v44, %v1809_v62 }
  0xcf   :  { %v1811_v59 = vsel %vm32_vm1, %v10738_v13, -inf  ;;  %v1812_v9 = vsel %vm32_vm1, %v1341_v21, -inf  ;;  %v1814_v56 = vsel %vm32_vm1, %v10740_v57, -inf  ;;  %v1815_v63 = vsel %vm32_vm1, %v1348_v0, -inf  ;;  %v95_v57 = vld [vmem:[%s13273_s0 + $0xa8] sm:$0xff] }
  0xd0   :  { %v1813_v6 = vmax.f32 %v1811_v59, %v1812_v9  ;;  %v1817_v54 = vsel %vm32_vm1, %v10753_v5, -inf  ;;  %v1818_v37 = vsel %vm32_vm1, %v1355_v49, -inf  ;;  %v1816_v30 = vmax.f32 %v1814_v56, %v1815_v63  ;;  %v96_v5 = vld [vmem:[%s13273_s0 + $0xb0] sm:$0xff] }
  0xd1   :  { %v1819_v38 = vmax.f32 %v1817_v54, %v1818_v37  ;;  %v1820_v13 = vsel %vm32_vm1, %v10755_v45, -inf  ;;  %v1821_v60 = vsel %vm32_vm1, %v1362_v4, -inf  ;;  %v1823_v7 = vsel %vm32_vm1, %v10757_v19, -inf }
  0xd2   :  { %v1822_v26 = vmax.f32 %v1820_v13, %v1821_v60  ;;  %v1824_v46 = vsel %vm32_vm1, %v1369_v24, -inf  ;;  %v1997_v55 = vsel %vm1962_vm3, %v1807_v8, %v1804_v51  ;;  %v478_v25 = vcombine.high %v94_v11, %v94_v11 }
  0xd3   :  { %v1825_v34 = vmax.f32 %v1823_v7, %v1824_v46  ;;  %v1998_v45 = vsel %vm1964_vm4, %v1810_v32, %v1997_v55  ;;  %v485_v61 = vrot.slane %v94_v11, %v10206_v33  ;;  %v495_v18 = vcombine.high %v95_v57, %v95_v57 }
  0xd4   :  { %v1999_v22 = vsel %vm1966_vm5, %v1813_v6, %v1998_v45  ;;  %v502_v28 = vrot.slane %v95_v57, %v10206_v33  ;;  %v512_v19 = vcombine.high %v96_v5, %v96_v5  ;;  %v492_v16 = vrot.slane %v478_v25, %v10206_v33 }
  0xd5   :  { %v2000_v29 = vsel %vm1968_vm6, %v1816_v30, %v1999_v22  ;;  %v493_v1 = vcombine.high %v485_v61, %v485_v61  ;;  %v10813_v3 = vrot.slane %v96_v5, %v10206_v33  ;;  %v509_v2 = vrot.slane %v495_v18, %v10206_v33 }
  0xd6   :  { %v2001_v53 = vsel %vm1970_vm7, %v1819_v38, %v2000_v29  ;;  %v510_v31 = vcombine.high %v502_v28, %v502_v28  ;;  %v10818_v20 = vrot.slane %v512_v19, %v10206_v33  ;;  %v494_v41 = vcombine.high %v492_v16, %v492_v16 }
  0xd7   :  { %v2002_v17 = vsel %vm1972_vm8, %v1822_v26, %v2001_v53  ;;  %v527_v15 = vcombine.high %v10813_v3, %v10813_v3  ;;  %v529_v27 = vcombine.high %v97_v36, %v97_v36  ;;  %v511_v58 = vcombine.high %v509_v2, %v509_v2 }
  0xd8   :  { %v2003_v40 = vsel %vm1974_vm9, %v1825_v34, %v2002_v17  ;;  %v528_v47 = vcombine.high %v10818_v20, %v10818_v20  ;;  %v10827_v39 = vrot.slane %v97_v36, %v10206_v33  ;;  %v1370_v42 = vsel %vm34_vm2, %v485_v61, -inf }
  0xd9   :  { %2038 = vst.msk [vmem:[#allocation2 + $0x51] sm:$0xff] %vm32_vm1, %v2003_v40  ;;  %v10831_v52 = vrot.slane %v529_v27, %v10206_v33  ;;  %v1377_v23 = vsel %vm34_vm2, %v493_v1, -inf  ;;  %v1384_v21 = vsel %vm34_vm2, %v492_v16, -inf  ;;  %v1371_v48 = vrot.slane %v1370_v42, 4 }
  0xda   :  { %v544_v0 = vcombine.high %v10827_v39, %v10827_v39  ;;  %v1378_v43 = vrot.slane %v1377_v23, 4  ;;  %v1385_v14 = vrot.slane %v1384_v21, 4  ;;  %v1391_v51 = vsel %vm34_vm2, %v494_v41, -inf }
  0xdb   :  { %v545_v50 = vcombine.high %v10831_v52, %v10831_v52  ;;  %v1398_v12 = vsel %vm34_vm2, %v502_v28, -inf  ;;  %v1405_v35 = vsel %vm34_vm2, %v510_v31, -inf  ;;  %v1372_v44 = vmax.f32 %v1370_v42, %v1371_v48 }
  0xdc   :  { %v1379_v62 = vmax.f32 %v1377_v23, %v1378_v43  ;;  %v1386_v49 = vmax.f32 %v1384_v21, %v1385_v14  ;;  %v1392_v4 = vrot.slane %v1391_v51, 4  ;;  %v1399_v24 = vrot.slane %v1398_v12, 4 }
  0xdd   :  { %v1406_v8 = vrot.slane %v1405_v35, 4  ;;  %v1412_v32 = vsel %vm34_vm2, %v509_v2, -inf  ;;  %v1419_v59 = vsel %vm34_vm2, %v511_v58, -inf  ;;  %v1373_v9 = vrot.slane %v1372_v44, 2 }
  0xde   :  { %v1380_v56 = vrot.slane %v1379_v62, 2  ;;  %v1387_v6 = vrot.slane %v1386_v49, 2  ;;  %v1393_v63 = vmax.f32 %v1391_v51, %v1392_v4  ;;  %v1400_v54 = vmax.f32 %v1398_v12, %v1399_v24 }
  0xdf   :  { %v1407_v37 = vmax.f32 %v1405_v35, %v1406_v8  ;;  %v1413_v11 = vrot.slane %v1412_v32, 4  ;;  %v1420_v30 = vrot.slane %v1419_v59, 4  ;;  %v1374_v13 = vmax.f32 %v1372_v44, %v1373_v9 }
  0xe0   :  { %v4026_v38 = vld [vmem:[#allocation2 + $0x51] sm:$0xff]  ;;  %v1381_v60 = vmax.f32 %v1379_v62, %v1380_v56  ;;  %v1388_v57 = vmax.f32 %v1386_v49, %v1387_v6  ;;  %v1394_v5 = vrot.slane %v1393_v63, 2  ;;  %v1401_v26 = vrot.slane %v1400_v54, 2 }
  0xe1   :  { %9189 = vmatmul.mubr.msk.f32.gmra.mrb[4].mxu0 %vm32_vm1, %v4026_v38  ;;  %v1408_v7 = vrot.slane %v1407_v37, 2  ;;  %v1414_v46 = vmax.f32 %v1412_v32, %v1413_v11  ;;  %v1421_v55 = vmax.f32 %v1419_v59, %v1420_v30  ;;  %v1375_v34 = vrot.slane %v1374_v13, 1 }
  0xe2   :  { %v1382_v45 = vrot.slane %v1381_v60, 1  ;;  %v1389_v25 = vrot.slane %v1388_v57, 1  ;;  %v1395_v61 = vmax.f32 %v1393_v63, %v1394_v5  ;;  %v1402_v22 = vmax.f32 %v1400_v54, %v1401_v26 }
  0xe3   :  { %v1409_v36 = vmax.f32 %v1407_v37, %v1408_v7  ;;  %v1415_v18 = vrot.slane %v1414_v46, 2  ;;  %v1422_v28 = vrot.slane %v1421_v55, 2  ;;  %v10846_v19 = vmax.f32 %v1374_v13, %v1375_v34 }
  0xe4   :  { %v10848_v29 = vmax.f32 %v1381_v60, %v1382_v45  ;;  %v10850_v16 = vmax.f32 %v1388_v57, %v1389_v25  ;;  %v1396_v1 = vrot.slane %v1395_v61, 1  ;;  %v1403_v53 = vrot.slane %v1402_v22, 1 }
  0xe5   :  { %v1410_v2 = vrot.slane %v1409_v36, 1  ;;  %v1416_v31 = vmax.f32 %v1414_v46, %v1415_v18  ;;  %v1423_v17 = vmax.f32 %v1421_v55, %v1422_v28  ;;  %v1426_v27 = vsel %vm34_vm2, %v10813_v3, -inf }
  0xe6   :  { %v10852_v41 = vmax.f32 %v1395_v61, %v1396_v1  ;;  %v1433_v40 = vsel %vm34_vm2, %v527_v15, -inf  ;;  %v1440_v58 = vsel %vm34_vm2, %v10818_v20, -inf  ;;  %v10862_v42 = vmax.f32 %v1402_v22, %v1403_v53 }
  0xe7   :  { %v10864_v23 = vmax.f32 %v1409_v36, %v1410_v2  ;;  %v1417_v21 = vrot.slane %v1416_v31, 1  ;;  %v1424_v48 = vrot.slane %v1423_v17, 1  ;;  %v1427_v43 = vrot.slane %v1426_v27, 4 }
  0xe8   :  { %v1434_v14 = vrot.slane %v1433_v40, 4  ;;  %v1441_v51 = vrot.slane %v1440_v58, 4  ;;  %v1447_v12 = vsel %vm34_vm2, %v528_v47, -inf  ;;  %v1454_v44 = vsel %vm34_vm2, %v10827_v39, -inf }
  0xe9   :  { %v10870_v3 = vmax.f32 %v1416_v31, %v1417_v21  ;;  %v10872_v15 = vmax.f32 %v1423_v17, %v1424_v48  ;;  %v1448_v35 = vrot.slane %v1447_v12, 4  ;;  %v1428_v62 = vmax.f32 %v1426_v27, %v1427_v43 }
  0xea   :  { %v1435_v49 = vmax.f32 %v1433_v40, %v1434_v14  ;;  %v1442_v4 = vmax.f32 %v1440_v58, %v1441_v51  ;;  %v1455_v24 = vrot.slane %v1454_v44, 4  ;;  %v1461_v20 = vsel %vm34_vm2, %v544_v0, -inf }
  0xeb   :  { %v1449_v8 = vmax.f32 %v1447_v12, %v1448_v35  ;;  %v1468_v47 = vsel %vm34_vm2, %v10831_v52, -inf  ;;  %v1475_v32 = vsel %vm34_vm2, %v545_v50, -inf  ;;  %v1429_v59 = vrot.slane %v1428_v62, 2 }
  0xec   :  { %v1436_v9 = vrot.slane %v1435_v49, 2  ;;  %v1443_v56 = vrot.slane %v1442_v4, 2  ;;  %v1456_v6 = vmax.f32 %v1454_v44, %v1455_v24  ;;  %v1462_v54 = vrot.slane %v1461_v20, 4 }
  0xed   :  { %v1450_v63 = vrot.slane %v1449_v8, 2  ;;  %v1469_v37 = vrot.slane %v1468_v47, 4  ;;  %v1476_v11 = vrot.slane %v1475_v32, 4  ;;  %v1430_v30 = vmax.f32 %v1428_v62, %v1429_v59 }
  0xee   :  { %v1437_v39 = vmax.f32 %v1435_v49, %v1436_v9  ;;  %v1444_v38 = vmax.f32 %v1442_v4, %v1443_v56  ;;  %v1457_v0 = vrot.slane %v1456_v6, 2  ;;  %v1463_v60 = vmax.f32 %v1461_v20, %v1462_v54 }
  0xef   :  { %v1451_v13 = vmax.f32 %v1449_v8, %v1450_v63  ;;  %v1470_v57 = vmax.f32 %v1468_v47, %v1469_v37  ;;  %v1477_v5 = vmax.f32 %v1475_v32, %v1476_v11  ;;  %v1431_v26 = vrot.slane %v1430_v30, 1  ;;  %v99_v32 = vld [vmem:[%s13273_s0 + $0xc8] sm:$0xff] }
  0xf0   :  { %v1438_v52 = vrot.slane %v1437_v39, 1  ;;  %v1445_v7 = vrot.slane %v1444_v38, 1  ;;  %v1458_v50 = vmax.f32 %v1456_v6, %v1457_v0  ;;  %v1464_v55 = vrot.slane %v1463_v60, 2  ;;  %v100_v6 = vld [vmem:[%s13273_s0 + $0xd0] sm:$0xff] }
  0xf1   :  { %v1452_v46 = vrot.slane %v1451_v13, 1  ;;  %v1471_v34 = vrot.slane %v1470_v57, 2  ;;  %v1478_v45 = vrot.slane %v1477_v5, 2  ;;  %v1432_v25 = vmax.f32 %v1430_v30, %v1431_v26 }
  0xf2   :  { %v1439_v61 = vmax.f32 %v1437_v39, %v1438_v52  ;;  %v1446_v22 = vmax.f32 %v1444_v38, %v1445_v7  ;;  %v1459_v36 = vrot.slane %v1458_v50, 1  ;;  %v1465_v28 = vmax.f32 %v1463_v60, %v1464_v55 }
  0xf3   :  { %v1453_v18 = vmax.f32 %v1451_v13, %v1452_v46  ;;  %v1472_v1 = vmax.f32 %v1470_v57, %v1471_v34  ;;  %v1479_v53 = vmax.f32 %v1477_v5, %v1478_v45  ;;  %v1826_v31 = vsel %vm32_vm1, %v10846_v19, -inf }
  0xf4   :  { %v1460_v2 = vmax.f32 %v1458_v50, %v1459_v36  ;;  %v1827_v17 = vsel %vm32_vm1, %v1432_v25, -inf  ;;  %v1829_v27 = vsel %vm32_vm1, %v10848_v29, -inf  ;;  %v1466_v40 = vrot.slane %v1465_v28, 1 }
  0xf5   :  { %v1473_v58 = vrot.slane %v1472_v1, 1  ;;  %v1480_v21 = vrot.slane %v1479_v53, 1  ;;  %v1828_v48 = vmax.f32 %v1826_v31, %v1827_v17  ;;  %v1830_v43 = vsel %vm32_vm1, %v1439_v61, -inf }
  0xf6   :  { %v1832_v14 = vsel %vm32_vm1, %v10850_v16, -inf  ;;  %v1833_v51 = vsel %vm32_vm1, %v1446_v22, -inf  ;;  %v1835_v12 = vsel %vm32_vm1, %v10852_v41, -inf  ;;  %v1467_v19 = vmax.f32 %v1465_v28, %v1466_v40  ;;  %v98_v16 = vld [vmem:[%s13273_s0 + $0xc0] sm:$0xff] }
  0xf7   :  { %v1474_v35 = vmax.f32 %v1472_v1, %v1473_v58  ;;  %v1481_v44 = vmax.f32 %v1479_v53, %v1480_v21  ;;  %v1831_v62 = vmax.f32 %v1829_v27, %v1830_v43  ;;  %v1834_v49 = vmax.f32 %v1832_v14, %v1833_v51 }
  0xf8   :  { %v1836_v29 = vsel %vm32_vm1, %v1453_v18, -inf  ;;  %v1838_v4 = vsel %vm32_vm1, %v10862_v42, -inf  ;;  %v1839_v24 = vsel %vm32_vm1, %v1460_v2, -inf  ;;  %v1841_v41 = vsel %vm32_vm1, %v10864_v23, -inf }
  0xf9   :  { %v1837_v8 = vmax.f32 %v1835_v12, %v1836_v29  ;;  %v1840_v20 = vmax.f32 %v1838_v4, %v1839_v24  ;;  %v1842_v47 = vsel %vm32_vm1, %v1467_v19, -inf  ;;  %v1844_v42 = vsel %vm32_vm1, %v10870_v3, -inf }
  0xfa   :  { %v1843_v59 = vmax.f32 %v1841_v41, %v1842_v47  ;;  %v1845_v9 = vsel %vm32_vm1, %v1474_v35, -inf  ;;  %v1847_v56 = vsel %vm32_vm1, %v10872_v15, -inf  ;;  %v1848_v63 = vsel %vm32_vm1, %v1481_v44, -inf  ;;  %v101_v15 = vld [vmem:[%s13273_s0 + $0xd8] sm:$0xff] }
  0xfb   :  { %v1846_v23 = vmax.f32 %v1844_v42, %v1845_v9  ;;  %v2004_v54 = vsel %vm1962_vm3, %v1831_v62, %v1828_v48  ;;  %v546_v37 = vcombine.high %v98_v16, %v98_v16  ;;  %v1849_v11 = vmax.f32 %v1847_v56, %v1848_v63 }
  0xfc   :  { %v2005_v30 = vsel %vm1964_vm4, %v1834_v49, %v2004_v54  ;;  %v553_v3 = vrot.slane %v98_v16, %v10206_v33  ;;  %v563_v39 = vcombine.high %v99_v32, %v99_v32  ;;  %v570_v13 = vrot.slane %v99_v32, %v10206_v33 }
  0xfd   :  { %v2006_v38 = vsel %vm1966_vm5, %v1837_v8, %v2005_v30  ;;  %v560_v0 = vrot.slane %v546_v37, %v10206_v33  ;;  %v580_v60 = vcombine.high %v100_v6, %v100_v6  ;;  %v10931_v52 = vrot.slane %v100_v6, %v10206_v33 }
  0xfe   :  { %v2007_v57 = vsel %vm1968_vm6, %v1840_v20, %v2006_v38  ;;  %v561_v5 = vcombine.high %v553_v3, %v553_v3  ;;  %v577_v26 = vrot.slane %v563_v39, %v10206_v33  ;;  %v578_v46 = vcombine.high %v570_v13, %v570_v13 }
  0xff   :  { %v2008_v7 = vsel %vm1970_vm7, %v1843_v59, %v2007_v57  ;;  %v562_v50 = vcombine.high %v560_v0, %v560_v0  ;;  %v10935_v55 = vrot.slane %v580_v60, %v10206_v33  ;;  %v595_v25 = vcombine.high %v10931_v52, %v10931_v52 }
 0x100   :  { %v2009_v34 = vsel %vm1972_vm8, %v1846_v23, %v2008_v7  ;;  %v579_v45 = vcombine.high %v577_v26, %v577_v26  ;;  %v597_v61 = vcombine.high %v101_v15, %v101_v15  ;;  %v10944_v18 = vrot.slane %v101_v15, %v10206_v33 }
 0x101   :  { %v2010_v22 = vsel %vm1974_vm9, %v1849_v11, %v2009_v34  ;;  %v596_v36 = vcombine.high %v10935_v55, %v10935_v55  ;;  %v1482_v28 = vsel %vm34_vm2, %v553_v3, -inf  ;;  %v1489_v2 = vsel %vm34_vm2, %v561_v5, -inf }
 0x102   :  { %2039 = vst.msk [vmem:[#allocation2 + $0x61] sm:$0xff] %vm32_vm1, %v2010_v22  ;;  %v10949_v1 = vrot.slane %v597_v61, %v10206_v33  ;;  %v1483_v53 = vrot.slane %v1482_v28, 4  ;;  %v1496_v31 = vsel %vm34_vm2, %v560_v0, -inf  ;;  %v612_v17 = vcombine.high %v10944_v18, %v10944_v18 }
 0x103   :  { %v1490_v27 = vrot.slane %v1489_v2, 4  ;;  %v1497_v40 = vrot.slane %v1496_v31, 4  ;;  %v1503_v58 = vsel %vm34_vm2, %v562_v50, -inf  ;;  %v1510_v14 = vsel %vm34_vm2, %v570_v13, -inf }
 0x104   :  { %v613_v21 = vcombine.high %v10949_v1, %v10949_v1  ;;  %v1484_v48 = vmax.f32 %v1482_v28, %v1483_v53  ;;  %v1504_v43 = vrot.slane %v1503_v58, 4  ;;  %v1511_v19 = vrot.slane %v1510_v14, 4 }
 0x105   :  { %v1491_v51 = vmax.f32 %v1489_v2, %v1490_v27  ;;  %v1498_v12 = vmax.f32 %v1496_v31, %v1497_v40  ;;  %v1517_v35 = vsel %vm34_vm2, %v578_v46, -inf  ;;  %v1524_v29 = vsel %vm34_vm2, %v577_v26, -inf }
 0x106   :  { %v1485_v44 = vrot.slane %v1484_v48, 2  ;;  %v1505_v62 = vmax.f32 %v1503_v58, %v1504_v43  ;;  %v1518_v49 = vrot.slane %v1517_v35, 4  ;;  %v1512_v16 = vmax.f32 %v1510_v14, %v1511_v19 }
 0x107   :  { %v1492_v4 = vrot.slane %v1491_v51, 2  ;;  %v1499_v24 = vrot.slane %v1498_v12, 2  ;;  %v1525_v8 = vrot.slane %v1524_v29, 4  ;;  %v1531_v32 = vsel %vm34_vm2, %v579_v45, -inf }
 0x108   :  { %v1486_v20 = vmax.f32 %v1484_v48, %v1485_v44  ;;  %v1506_v41 = vrot.slane %v1505_v62, 2  ;;  %v1519_v47 = vmax.f32 %v1517_v35, %v1518_v49  ;;  %v1513_v56 = vrot.slane %v1512_v16, 2 }
 0x109   :  { %v4027_v59 = vld [vmem:[#allocation2 + $0x61] sm:$0xff]  ;;  %v1493_v42 = vmax.f32 %v1491_v51, %v1492_v4  ;;  %v1500_v9 = vmax.f32 %v1498_v12, %v1499_v24  ;;  %v1526_v6 = vmax.f32 %v1524_v29, %v1525_v8  ;;  %v1532_v37 = vrot.slane %v1531_v32, 4 }
 0x10a   :  { %9191 = vmatprep.mubr.msk.f32.mxu0 %vm32_vm1, %v4027_v59  ;;  %v1487_v23 = vrot.slane %v1486_v20, 1  ;;  %v1507_v63 = vmax.f32 %v1505_v62, %v1506_v41  ;;  %v1520_v54 = vrot.slane %v1519_v47, 2  ;;  %v1514_v3 = vmax.f32 %v1512_v16, %v1513_v56 }
 0x10b   :  { %v1494_v11 = vrot.slane %v1493_v42, 1  ;;  %v1501_v30 = vrot.slane %v1500_v9, 1  ;;  %v1527_v39 = vrot.slane %v1526_v6, 2  ;;  %v1533_v13 = vmax.f32 %v1531_v32, %v1532_v37 }
 0x10c   :  { %v10963_v38 = vmax.f32 %v1486_v20, %v1487_v23  ;;  %v1508_v15 = vrot.slane %v1507_v63, 1  ;;  %v1521_v0 = vmax.f32 %v1519_v47, %v1520_v54  ;;  %v1515_v5 = vrot.slane %v1514_v3, 1 }
 0x10d   :  { %v10965_v60 = vmax.f32 %v1493_v42, %v1494_v11  ;;  %v10967_v57 = vmax.f32 %v1500_v9, %v1501_v30  ;;  %v1528_v26 = vmax.f32 %v1526_v6, %v1527_v39  ;;  %v1534_v46 = vrot.slane %v1533_v13, 2 }
 0x10e   :  { %v10969_v7 = vmax.f32 %v1507_v63, %v1508_v15  ;;  %v1522_v50 = vrot.slane %v1521_v0, 1  ;;  %v1538_v34 = vsel %vm34_vm2, %v10931_v52, -inf  ;;  %v10973_v45 = vmax.f32 %v1514_v3, %v1515_v5 }
 0x10f   :  { %v1529_v61 = vrot.slane %v1528_v26, 1  ;;  %v1539_v22 = vrot.slane %v1538_v34, 4  ;;  %v1545_v28 = vsel %vm34_vm2, %v595_v25, -inf  ;;  %v1535_v2 = vmax.f32 %v1533_v13, %v1534_v46 }
 0x110   :  { %v10979_v53 = vmax.f32 %v1521_v0, %v1522_v50  ;;  %v1546_v31 = vrot.slane %v1545_v28, 4  ;;  %v1552_v27 = vsel %vm34_vm2, %v10935_v55, -inf  ;;  %v1559_v43 = vsel %vm34_vm2, %v596_v36, -inf }
 0x111   :  { %v10983_v40 = vmax.f32 %v1528_v26, %v1529_v61  ;;  %v1540_v58 = vmax.f32 %v1538_v34, %v1539_v22  ;;  %v1553_v48 = vrot.slane %v1552_v27, 4  ;;  %v1536_v14 = vrot.slane %v1535_v2, 1 }
 0x112   :  { %v1547_v52 = vmax.f32 %v1545_v28, %v1546_v31  ;;  %v1560_v51 = vrot.slane %v1559_v43, 4  ;;  %v1566_v25 = vsel %vm34_vm2, %v10944_v18, -inf  ;;  %v1573_v44 = vsel %vm34_vm2, %v612_v17, -inf }
 0x113   :  { %v1541_v12 = vrot.slane %v1540_v58, 2  ;;  %v1554_v19 = vmax.f32 %v1552_v27, %v1553_v48  ;;  %v1567_v35 = vrot.slane %v1566_v25, 4  ;;  %v10995_v62 = vmax.f32 %v1535_v2, %v1536_v14 }
 0x114   :  { %v1548_v49 = vrot.slane %v1547_v52, 2  ;;  %v1561_v55 = vmax.f32 %v1559_v43, %v1560_v51  ;;  %v1574_v29 = vrot.slane %v1573_v44, 4  ;;  %v1580_v16 = vsel %vm34_vm2, %v10949_v1, -inf }
 0x115   :  { %v1542_v36 = vmax.f32 %v1540_v58, %v1541_v12  ;;  %v1555_v4 = vrot.slane %v1554_v19, 2  ;;  %v1568_v24 = vmax.f32 %v1566_v25, %v1567_v35  ;;  %v1581_v47 = vrot.slane %v1580_v16, 4  ;;  %v8525_v35 = vld [vmem:[%s13273_s0 + $0x100] sm:$0xff] }
 0x116   :  { %v1549_v8 = vmax.f32 %v1547_v52, %v1548_v49  ;;  %v1562_v20 = vrot.slane %v1561_v55, 2  ;;  %v1575_v41 = vmax.f32 %v1573_v44, %v1574_v29  ;;  %v1587_v17 = vsel %vm34_vm2, %v613_v21, -inf }
 0x117   :  { %v1543_v32 = vrot.slane %v1542_v36, 1  ;;  %v1556_v59 = vmax.f32 %v1554_v19, %v1555_v4  ;;  %v1569_v18 = vrot.slane %v1568_v24, 2  ;;  %v1582_v6 = vmax.f32 %v1580_v16, %v1581_v47 }
 0x118   :  { %v1550_v42 = vrot.slane %v1549_v8, 1  ;;  %v1563_v9 = vmax.f32 %v1561_v55, %v1562_v20  ;;  %v1576_v56 = vrot.slane %v1575_v41, 2  ;;  %v1588_v37 = vrot.slane %v1587_v17, 4 }
 0x119   :  { %v1544_v23 = vmax.f32 %v1542_v36, %v1543_v32  ;;  %v1557_v63 = vrot.slane %v1556_v59, 1  ;;  %v1570_v54 = vmax.f32 %v1568_v24, %v1569_v18  ;;  %v1583_v39 = vrot.slane %v1582_v6, 2  ;;  %v8528_v32 = vld [vmem:[%s13273_s0 + $0x118] sm:$0xff] }
 0x11a   :  { %v1551_v11 = vmax.f32 %v1549_v8, %v1550_v42  ;;  %v1564_v30 = vrot.slane %v1563_v9, 1  ;;  %v1577_v3 = vmax.f32 %v1575_v41, %v1576_v56  ;;  %v1589_v13 = vmax.f32 %v1587_v17, %v1588_v37 }
 0x11b   :  { %v1558_v15 = vmax.f32 %v1556_v59, %v1557_v63  ;;  %v1571_v0 = vrot.slane %v1570_v54, 1  ;;  %v1850_v1 = vsel %vm32_vm1, %v10963_v38, -inf  ;;  %v1584_v26 = vmax.f32 %v1582_v6, %v1583_v39 }
 0x11c   :  { %v1565_v5 = vmax.f32 %v1563_v9, %v1564_v30  ;;  %v1578_v21 = vrot.slane %v1577_v3, 1  ;;  %v1851_v50 = vsel %vm32_vm1, %v1544_v23, -inf  ;;  %v1590_v34 = vrot.slane %v1589_v13, 2 }
 0x11d   :  { %v1572_v46 = vmax.f32 %v1570_v54, %v1571_v0  ;;  %v1852_v61 = vmax.f32 %v1850_v1, %v1851_v50  ;;  %v1853_v22 = vsel %vm32_vm1, %v10965_v60, -inf  ;;  %v1585_v2 = vrot.slane %v1584_v26, 1 }
 0x11e   :  { %v1579_v28 = vmax.f32 %v1577_v3, %v1578_v21  ;;  %v1854_v31 = vsel %vm32_vm1, %v1551_v11, -inf  ;;  %v1856_v27 = vsel %vm32_vm1, %v10967_v57, -inf  ;;  %v1591_v58 = vmax.f32 %v1589_v13, %v1590_v34 }
 0x11f   :  { %v1855_v38 = vmax.f32 %v1853_v22, %v1854_v31  ;;  %v1857_v48 = vsel %vm32_vm1, %v1558_v15, -inf  ;;  %v1859_v43 = vsel %vm32_vm1, %v10969_v7, -inf  ;;  %v1586_v14 = vmax.f32 %v1584_v26, %v1585_v2  ;;  %v8526_v7 = vld [vmem:[%s13273_s0 + $0x108] sm:$0xff] }
 0x120   :  { %v1858_v52 = vmax.f32 %v1856_v27, %v1857_v48  ;;  %v1860_v51 = vsel %vm32_vm1, %v1565_v5, -inf  ;;  %v1862_v60 = vsel %vm32_vm1, %v10973_v45, -inf  ;;  %v1592_v25 = vrot.slane %v1591_v58, 1 }
 0x121   :  { %v1861_v12 = vmax.f32 %v1859_v43, %v1860_v51  ;;  %v1863_v19 = vsel %vm32_vm1, %v1572_v46, -inf  ;;  %v1865_v57 = vsel %vm32_vm1, %v10979_v53, -inf  ;;  %v1866_v49 = vsel %vm32_vm1, %v1579_v28, -inf  ;;  %v8527_v53 = vld [vmem:[%s13273_s0 + $0x110] sm:$0xff] }
 0x122   :  { %v1864_v44 = vmax.f32 %v1862_v60, %v1863_v19  ;;  %v1868_v45 = vsel %vm32_vm1, %v10983_v40, -inf  ;;  %v1869_v55 = vsel %vm32_vm1, %v1586_v14, -inf  ;;  %v1593_v29 = vmax.f32 %v1591_v58, %v1592_v25 }
 0x123   :  { %v1867_v36 = vmax.f32 %v1865_v57, %v1866_v49  ;;  %v1870_v4 = vmax.f32 %v1868_v45, %v1869_v55  ;;  %v1871_v24 = vsel %vm32_vm1, %v10995_v62, -inf  ;;  %v2011_v16 = vsel %vm1962_vm3, %v1855_v38, %v1852_v61 }
 0x124   :  { %v2107_v8 = vcombine.high %v8525_v35, %v8525_v35  ;;  %v2114_v20 = vrot.slane %v8525_v35, %v10206_v33  ;;  %v2124_v41 = vcombine.high %v8526_v7, %v8526_v7  ;;  %v1872_v40 = vsel %vm32_vm1, %v1593_v29, -inf }
 0x125   :  { %v2012_v47 = vsel %vm1964_vm4, %v1858_v52, %v2011_v16  ;;  %v2131_v59 = vrot.slane %v8526_v7, %v10206_v33  ;;  %v2141_v18 = vcombine.high %v8527_v53, %v8527_v53  ;;  %v1873_v17 = vmax.f32 %v1871_v24, %v1872_v40 }
 0x126   :  { %v2013_v62 = vsel %vm1966_vm5, %v1861_v12, %v2012_v47  ;;  %v2121_v42 = vrot.slane %v2107_v8, %v10206_v33  ;;  %v2122_v9 = vcombine.high %v2114_v20, %v2114_v20  ;;  %v2138_v6 = vrot.slane %v2124_v41, %v10206_v33 }
 0x127   :  { %v2014_v56 = vsel %vm1968_vm6, %v1864_v44, %v2013_v62  ;;  %v2139_v23 = vcombine.high %v2131_v59, %v2131_v59  ;;  %v11048_v63 = vrot.slane %v8527_v53, %v10206_v33  ;;  %v11052_v11 = vrot.slane %v2141_v18, %v10206_v33  ;;  %v4029_v44 = vld [vmem:[#allocation2 + $0xa1] sm:$0xff] }
 0x128   :  { %v2015_v54 = vsel %vm1970_vm7, %v1867_v36, %v2014_v56  ;;  %v2123_v37 = vcombine.high %v2121_v42, %v2121_v42  ;;  %v2158_v30 = vcombine.high %v8528_v32, %v8528_v32  ;;  %v2140_v39 = vcombine.high %v2138_v6, %v2138_v6 }
 0x129   :  { %v2016_v3 = vsel %vm1972_vm8, %v1870_v4, %v2015_v54  ;;  %v2156_v15 = vcombine.high %v11048_v63, %v11048_v63  ;;  %v11058_v0 = vrot.slane %v8528_v32, %v10206_v33  ;;  %v2157_v1 = vcombine.high %v11052_v11, %v11052_v11 }
 0x12a   :  { %v2017_v13 = vsel %vm1974_vm9, %v1873_v17, %v2016_v3  ;;  %v11064_v5 = vrot.slane %v2158_v30, %v10206_v33  ;;  %v2779_v21 = vsel %vm34_vm2, %v2114_v20, -inf  ;;  %v2786_v46 = vsel %vm34_vm2, %v2122_v9, -inf }
 0x12b   :  { %2040 = vst.msk [vmem:[#allocation2 + $0x71] sm:$0xff] %vm32_vm1, %v2017_v13  ;;  %v2173_v26 = vcombine.high %v11058_v0, %v11058_v0  ;;  %v2780_v50 = vrot.slane %v2779_v21, 4  ;;  %v2793_v34 = vsel %vm34_vm2, %v2121_v42, -inf  ;;  %v2787_v22 = vrot.slane %v2786_v46, 4 }
 0x12c   :  { %v2174_v61 = vcombine.high %v11064_v5, %v11064_v5  ;;  %v2794_v28 = vrot.slane %v2793_v34, 4  ;;  %v2800_v2 = vsel %vm34_vm2, %v2123_v37, -inf  ;;  %v2807_v58 = vsel %vm34_vm2, %v2131_v59, -inf }
 0x12d   :  { %v2781_v31 = vmax.f32 %v2779_v21, %v2780_v50  ;;  %v2801_v27 = vrot.slane %v2800_v2, 4  ;;  %v2814_v38 = vsel %vm34_vm2, %v2139_v23, -inf  ;;  %v2788_v48 = vmax.f32 %v2786_v46, %v2787_v22 }
 0x12e   :  { %v2795_v43 = vmax.f32 %v2793_v34, %v2794_v28  ;;  %v2808_v14 = vrot.slane %v2807_v58, 4  ;;  %v2815_v52 = vrot.slane %v2814_v38, 4  ;;  %v2821_v25 = vsel %vm34_vm2, %v2138_v6, -inf }
 0x12f   :  { %v2782_v51 = vrot.slane %v2781_v31, 2  ;;  %v2802_v60 = vmax.f32 %v2800_v2, %v2801_v27  ;;  %v2828_v12 = vsel %vm34_vm2, %v2140_v39, -inf  ;;  %v2789_v19 = vrot.slane %v2788_v48, 2 }
 0x130   :  { %v2796_v57 = vrot.slane %v2795_v43, 2  ;;  %v2809_v35 = vmax.f32 %v2807_v58, %v2808_v14  ;;  %v2816_v7 = vmax.f32 %v2814_v38, %v2815_v52  ;;  %v2822_v55 = vrot.slane %v2821_v25, 4 }
 0x131   :  { %v2783_v49 = vmax.f32 %v2781_v31, %v2782_v51  ;;  %v2803_v45 = vrot.slane %v2802_v60, 2  ;;  %v2829_v53 = vrot.slane %v2828_v12, 4  ;;  %v2790_v36 = vmax.f32 %v2788_v48, %v2789_v19 }
 0x132   :  { %v4028_v29 = vld [vmem:[#allocation2 + $0x71] sm:$0xff]  ;;  %v2797_v4 = vmax.f32 %v2795_v43, %v2796_v57  ;;  %v2810_v24 = vrot.slane %v2809_v35, 2  ;;  %v2817_v16 = vrot.slane %v2816_v7, 2  ;;  %v2823_v41 = vmax.f32 %v2821_v25, %v2822_v55 }
 0x133   :  { %9192 = vmatmul.mubr.msk.f32.gmra.mrb[6].mxu0 %vm32_vm1, %v4028_v29  ;;  %v2784_v8 = vrot.slane %v2783_v49, 1  ;;  %v2804_v20 = vmax.f32 %v2802_v60, %v2803_v45  ;;  %v2830_v40 = vmax.f32 %v2828_v12, %v2829_v53  ;;  %v2791_v47 = vrot.slane %v2790_v36, 1 }
 0x134   :  { %9194 = vmatprep.mubr.msk.f32.mxu0 %vm32_vm1, %v4029_v44  ;;  %v2798_v32 = vrot.slane %v2797_v4, 1  ;;  %v2811_v59 = vmax.f32 %v2809_v35, %v2810_v24  ;;  %v2818_v18 = vmax.f32 %v2816_v7, %v2817_v16  ;;  %v2824_v42 = vrot.slane %v2823_v41, 2 }
 0x135   :  { %v11081_v17 = vmax.f32 %v2783_v49, %v2784_v8  ;;  %v2805_v62 = vrot.slane %v2804_v20, 1  ;;  %v2831_v9 = vrot.slane %v2830_v40, 2  ;;  %v11083_v56 = vmax.f32 %v2790_v36, %v2791_v47 }
 0x136   :  { %v11085_v6 = vmax.f32 %v2797_v4, %v2798_v32  ;;  %v2812_v23 = vrot.slane %v2811_v59, 1  ;;  %v2819_v54 = vrot.slane %v2818_v18, 1  ;;  %v2825_v30 = vmax.f32 %v2823_v41, %v2824_v42 }
 0x137   :  { %v11087_v37 = vmax.f32 %v2804_v20, %v2805_v62  ;;  %v2832_v3 = vmax.f32 %v2830_v40, %v2831_v9  ;;  %v2835_v39 = vsel %vm34_vm2, %v11048_v63, -inf  ;;  %v2842_v46 = vsel %vm34_vm2, %v2156_v15, -inf }
 0x138   :  { %v11091_v13 = vmax.f32 %v2811_v59, %v2812_v23  ;;  %v11093_v21 = vmax.f32 %v2818_v18, %v2819_v54  ;;  %v2836_v50 = vrot.slane %v2835_v39, 4  ;;  %v2826_v34 = vrot.slane %v2825_v30, 1 }
 0x139   :  { %v2833_v22 = vrot.slane %v2832_v3, 1  ;;  %v2843_v28 = vrot.slane %v2842_v46, 4  ;;  %v2849_v2 = vsel %vm34_vm2, %v11052_v11, -inf  ;;  %v2856_v58 = vsel %vm34_vm2, %v2157_v1, -inf }
 0x13a   :  { %v2837_v31 = vmax.f32 %v2835_v39, %v2836_v50  ;;  %v2850_v27 = vrot.slane %v2849_v2, 4  ;;  %v2863_v38 = vsel %vm34_vm2, %v11058_v0, -inf  ;;  %v11107_v48 = vmax.f32 %v2825_v30, %v2826_v34 }
 0x13b   :  { %v11109_v63 = vmax.f32 %v2832_v3, %v2833_v22  ;;  %v2844_v15 = vmax.f32 %v2842_v46, %v2843_v28  ;;  %v2857_v43 = vrot.slane %v2856_v58, 4  ;;  %v2864_v51 = vrot.slane %v2863_v38, 4 }
 0x13c   :  { %v2838_v14 = vrot.slane %v2837_v31, 2  ;;  %v2851_v52 = vmax.f32 %v2849_v2, %v2850_v27  ;;  %v2870_v60 = vsel %vm34_vm2, %v2173_v26, -inf  ;;  %v2877_v12 = vsel %vm34_vm2, %v11064_v5, -inf }
 0x13d   :  { %v2845_v11 = vrot.slane %v2844_v15, 2  ;;  %v2858_v25 = vmax.f32 %v2856_v58, %v2857_v43  ;;  %v2871_v1 = vrot.slane %v2870_v60, 4  ;;  %v2865_v35 = vmax.f32 %v2863_v38, %v2864_v51 }
 0x13e   :  { %v2839_v19 = vmax.f32 %v2837_v31, %v2838_v14  ;;  %v2852_v57 = vrot.slane %v2851_v52, 2  ;;  %v2878_v7 = vrot.slane %v2877_v12, 4  ;;  %v2884_v0 = vsel %vm34_vm2, %v2174_v61, -inf  ;;  %v8529_v14 = vld [vmem:[%s13273_s0 + $0x120] sm:$0xff] }
 0x13f   :  { %v2846_v44 = vmax.f32 %v2844_v15, %v2845_v11  ;;  %v2859_v49 = vrot.slane %v2858_v25, 2  ;;  %v2872_v45 = vmax.f32 %v2870_v60, %v2871_v1  ;;  %v2866_v53 = vrot.slane %v2865_v35, 2 }
 0x140   :  { %v2840_v55 = vrot.slane %v2839_v19, 1  ;;  %v2853_v26 = vmax.f32 %v2851_v52, %v2852_v57  ;;  %v2879_v29 = vmax.f32 %v2877_v12, %v2878_v7  ;;  %v2885_v16 = vrot.slane %v2884_v0, 4 }
 0x141   :  { %v2847_v36 = vrot.slane %v2846_v44, 1  ;;  %v2860_v4 = vmax.f32 %v2858_v25, %v2859_v49  ;;  %v2873_v24 = vrot.slane %v2872_v45, 2  ;;  %v2867_v41 = vmax.f32 %v2865_v35, %v2866_v53 }
 0x142   :  { %v2841_v8 = vmax.f32 %v2839_v19, %v2840_v55  ;;  %v2854_v20 = vrot.slane %v2853_v26, 1  ;;  %v2880_v40 = vrot.slane %v2879_v29, 2  ;;  %v2886_v18 = vmax.f32 %v2884_v0, %v2885_v16 }
 0x143   :  { %v2848_v47 = vmax.f32 %v2846_v44, %v2847_v36  ;;  %v2861_v32 = vrot.slane %v2860_v4, 1  ;;  %v2874_v59 = vmax.f32 %v2872_v45, %v2873_v24  ;;  %v2868_v5 = vrot.slane %v2867_v41, 1 }
 0x144   :  { %v2855_v62 = vmax.f32 %v2853_v26, %v2854_v20  ;;  %v2881_v42 = vmax.f32 %v2879_v29, %v2880_v40  ;;  %v3675_v61 = vsel %vm32_vm1, %v11081_v17, -inf  ;;  %v2887_v54 = vrot.slane %v2886_v18, 2 }
 0x145   :  { %v2862_v9 = vmax.f32 %v2860_v4, %v2861_v32  ;;  %v2875_v23 = vrot.slane %v2874_v59, 1  ;;  %v3676_v30 = vsel %vm32_vm1, %v2841_v8, -inf  ;;  %v2869_v3 = vmax.f32 %v2867_v41, %v2868_v5 }
 0x146   :  { %v2882_v39 = vrot.slane %v2881_v42, 1  ;;  %v3677_v50 = vmax.f32 %v3675_v61, %v3676_v30  ;;  %v3678_v46 = vsel %vm32_vm1, %v11083_v56, -inf  ;;  %v2888_v22 = vmax.f32 %v2886_v18, %v2887_v54 }
 0x147   :  { %v2876_v34 = vmax.f32 %v2874_v59, %v2875_v23  ;;  %v3679_v28 = vsel %vm32_vm1, %v2848_v47, -inf  ;;  %v3681_v2 = vsel %vm32_vm1, %v11085_v6, -inf  ;;  %v3682_v27 = vsel %vm32_vm1, %v2855_v62, -inf }
 0x148   :  { %v2883_v31 = vmax.f32 %v2881_v42, %v2882_v39  ;;  %v3680_v17 = vmax.f32 %v3678_v46, %v3679_v28  ;;  %v3684_v58 = vsel %vm32_vm1, %v11087_v37, -inf  ;;  %v2889_v38 = vrot.slane %v2888_v22, 1 }
 0x149   :  { %v3683_v15 = vmax.f32 %v3681_v2, %v3682_v27  ;;  %v3685_v43 = vsel %vm32_vm1, %v2862_v9, -inf  ;;  %v3687_v56 = vsel %vm32_vm1, %v11091_v13, -inf  ;;  %v3688_v6 = vsel %vm32_vm1, %v2869_v3, -inf  ;;  %v8530_v13 = vld [vmem:[%s13273_s0 + $0x128] sm:$0xff] }
 0x14a   :  { %v3686_v52 = vmax.f32 %v3684_v58, %v3685_v43  ;;  %v3690_v51 = vsel %vm32_vm1, %v11093_v21, -inf  ;;  %v3691_v60 = vsel %vm32_vm1, %v2876_v34, -inf  ;;  %v2890_v37 = vmax.f32 %v2888_v22, %v2889_v38  ;;  %v8531_v21 = vld [vmem:[%s13273_s0 + $0x130] sm:$0xff] }
 0x14b   :  { %v3689_v11 = vmax.f32 %v3687_v56, %v3688_v6  ;;  %v3692_v25 = vmax.f32 %v3690_v51, %v3691_v60  ;;  %v3693_v1 = vsel %vm32_vm1, %v11107_v48, -inf  ;;  %v3694_v12 = vsel %vm32_vm1, %v2883_v31, -inf }
 0x14c   :  { %v3696_v19 = vsel %vm32_vm1, %v11109_v63, -inf  ;;  %v3931_v57 = vsel %vm1962_vm3, %v3680_v17, %v3677_v50  ;;  %v2175_v35 = vcombine.high %v8529_v14, %v8529_v14  ;;  %v3695_v7 = vmax.f32 %v3693_v1, %v3694_v12  ;;  %v8532_v63 = vld [vmem:[%s13273_s0 + $0x138] sm:$0xff] }
 0x14d   :  { %v3697_v44 = vsel %vm32_vm1, %v2890_v37, -inf  ;;  %v3932_v48 = vsel %vm1964_vm4, %v3683_v15, %v3931_v57  ;;  %v2182_v49 = vrot.slane %v8529_v14, %v10206_v33  ;;  %v2192_v26 = vcombine.high %v8530_v13, %v8530_v13 }
 0x14e   :  { %v3698_v45 = vmax.f32 %v3696_v19, %v3697_v44  ;;  %v3933_v0 = vsel %vm1966_vm5, %v3686_v52, %v3932_v48  ;;  %v2189_v55 = vrot.slane %v2175_v35, %v10206_v33  ;;  %v2199_v36 = vrot.slane %v8530_v13, %v10206_v33 }
 0x14f   :  { %v3934_v53 = vsel %vm1968_vm6, %v3689_v11, %v3933_v0  ;;  %v2190_v29 = vcombine.high %v2182_v49, %v2182_v49  ;;  %v2209_v4 = vcombine.high %v8531_v21, %v8531_v21  ;;  %v2206_v8 = vrot.slane %v2192_v26, %v10206_v33 }
 0x150   :  { %v3935_v24 = vsel %vm1970_vm7, %v3692_v25, %v3934_v53  ;;  %v2191_v16 = vcombine.high %v2189_v55, %v2189_v55  ;;  %v11167_v20 = vrot.slane %v8531_v21, %v10206_v33  ;;  %v2207_v40 = vcombine.high %v2199_v36, %v2199_v36 }
 0x151   :  { %v3936_v41 = vsel %vm1972_vm8, %v3695_v7, %v3935_v24  ;;  %v11171_v47 = vrot.slane %v2209_v4, %v10206_v33  ;;  %v2226_v32 = vcombine.high %v8532_v63, %v8532_v63  ;;  %v2208_v18 = vcombine.high %v2206_v8, %v2206_v8 }
 0x152   :  { %v3937_v59 = vsel %vm1974_vm9, %v3698_v45, %v3936_v41  ;;  %v2224_v62 = vcombine.high %v11167_v20, %v11167_v20  ;;  %v11177_v5 = vrot.slane %v8532_v63, %v10206_v33  ;;  %v2891_v9 = vsel %vm34_vm2, %v2182_v49, -inf }
 0x153   :  { %3996 = vst.msk [vmem:[#allocation2 + $0xb1] sm:$0xff] %vm32_vm1, %v3937_v59  ;;  %v2225_v42 = vcombine.high %v11171_v47, %v11171_v47  ;;  %v11183_v61 = vrot.slane %v2226_v32, %v10206_v33  ;;  %v2898_v23 = vsel %vm34_vm2, %v2190_v29, -inf  ;;  %v2892_v30 = vrot.slane %v2891_v9, 4 }
 0x154   :  { %v2241_v54 = vcombine.high %v11177_v5, %v11177_v5  ;;  %v2899_v3 = vrot.slane %v2898_v23, 4  ;;  %v2905_v39 = vsel %vm34_vm2, %v2189_v55, -inf  ;;  %v2912_v34 = vsel %vm34_vm2, %v2191_v16, -inf }
 0x155   :  { %v2242_v50 = vcombine.high %v11183_v61, %v11183_v61  ;;  %v2906_v46 = vrot.slane %v2905_v39, 4  ;;  %v2919_v22 = vsel %vm34_vm2, %v2199_v36, -inf  ;;  %v2893_v28 = vmax.f32 %v2891_v9, %v2892_v30 }
 0x156   :  { %v2900_v2 = vmax.f32 %v2898_v23, %v2899_v3  ;;  %v2913_v31 = vrot.slane %v2912_v34, 4  ;;  %v2920_v17 = vrot.slane %v2919_v22, 4  ;;  %v2926_v58 = vsel %vm34_vm2, %v2207_v40, -inf }
 0x157   :  { %v2907_v27 = vmax.f32 %v2905_v39, %v2906_v46  ;;  %v2933_v38 = vsel %vm34_vm2, %v2206_v8, -inf  ;;  %v2940_v15 = vsel %vm34_vm2, %v2208_v18, -inf  ;;  %v2894_v43 = vrot.slane %v2893_v28, 2 }
 0x158   :  { %v2901_v56 = vrot.slane %v2900_v2, 2  ;;  %v2914_v14 = vmax.f32 %v2912_v34, %v2913_v31  ;;  %v2921_v52 = vmax.f32 %v2919_v22, %v2920_v17  ;;  %v2927_v51 = vrot.slane %v2926_v58, 4 }
 0x159   :  { %v2908_v6 = vrot.slane %v2907_v27, 2  ;;  %v2934_v60 = vrot.slane %v2933_v38, 4  ;;  %v2941_v37 = vrot.slane %v2940_v15, 4  ;;  %v2895_v25 = vmax.f32 %v2893_v28, %v2894_v43 }
 0x15a   :  { %v4030_v11 = vld [vmem:[#allocation2 + $0xb1] sm:$0xff]  ;;  %v2902_v1 = vmax.f32 %v2900_v2, %v2901_v56  ;;  %v2915_v13 = vrot.slane %v2914_v14, 2  ;;  %v2922_v12 = vrot.slane %v2921_v52, 2  ;;  %v2928_v57 = vmax.f32 %v2926_v58, %v2927_v51 }
 0x15b   :  { %9195 = vmatmul.mubr.msk.f32.gmra.mrb[8].mxu0 %vm32_vm1, %v4030_v11  ;;  %v2909_v19 = vmax.f32 %v2907_v27, %v2908_v6  ;;  %v2935_v21 = vmax.f32 %v2933_v38, %v2934_v60  ;;  %v2942_v35 = vmax.f32 %v2940_v15, %v2941_v37  ;;  %v2896_v7 = vrot.slane %v2895_v25, 1 }
 0x15c   :  { %v2903_v44 = vrot.slane %v2902_v1, 1  ;;  %v2916_v48 = vmax.f32 %v2914_v14, %v2915_v13  ;;  %v2923_v49 = vmax.f32 %v2921_v52, %v2922_v12  ;;  %v2929_v0 = vrot.slane %v2928_v57, 2 }
 0x15d   :  { %v2910_v45 = vrot.slane %v2909_v19, 1  ;;  %v2936_v63 = vrot.slane %v2935_v21, 2  ;;  %v2943_v55 = vrot.slane %v2942_v35, 2  ;;  %v11198_v26 = vmax.f32 %v2895_v25, %v2896_v7 }
 0x15e   :  { %v11200_v53 = vmax.f32 %v2902_v1, %v2903_v44  ;;  %v2917_v29 = vrot.slane %v2916_v48, 1  ;;  %v2924_v36 = vrot.slane %v2923_v49, 1  ;;  %v2930_v24 = vmax.f32 %v2928_v57, %v2929_v0 }
 0x15f   :  { %v11202_v4 = vmax.f32 %v2909_v19, %v2910_v45  ;;  %v2937_v16 = vmax.f32 %v2935_v21, %v2936_v63  ;;  %v2944_v8 = vmax.f32 %v2942_v35, %v2943_v55  ;;  %v2947_v32 = vsel %vm34_vm2, %v11167_v20, -inf }
 0x160   :  { %v11204_v41 = vmax.f32 %v2916_v48, %v2917_v29  ;;  %v11206_v40 = vmax.f32 %v2923_v49, %v2924_v36  ;;  %v2954_v59 = vsel %vm34_vm2, %v2224_v62, -inf  ;;  %v2931_v18 = vrot.slane %v2930_v24, 1 }
 0x161   :  { %v2938_v9 = vrot.slane %v2937_v16, 1  ;;  %v2945_v23 = vrot.slane %v2944_v8, 1  ;;  %v2948_v30 = vrot.slane %v2947_v32, 4  ;;  %v2955_v3 = vrot.slane %v2954_v59, 4 }
 0x162   :  { %v2961_v39 = vsel %vm34_vm2, %v11171_v47, -inf  ;;  %v2968_v46 = vsel %vm34_vm2, %v2225_v42, -inf  ;;  %v2975_v34 = vsel %vm34_vm2, %v11177_v5, -inf  ;;  %v11219_v22 = vmax.f32 %v2930_v24, %v2931_v18 }
 0x163   :  { %v11221_v20 = vmax.f32 %v2937_v16, %v2938_v9  ;;  %v11223_v62 = vmax.f32 %v2944_v8, %v2945_v23  ;;  %v2949_v28 = vmax.f32 %v2947_v32, %v2948_v30  ;;  %v2956_v2 = vmax.f32 %v2954_v59, %v2955_v3 }
 0x164   :  { %v2962_v31 = vrot.slane %v2961_v39, 4  ;;  %v2969_v17 = vrot.slane %v2968_v46, 4  ;;  %v2976_v27 = vrot.slane %v2975_v34, 4  ;;  %v2982_v47 = vsel %vm34_vm2, %v2241_v54, -inf }
 0x165   :  { %v2950_v58 = vrot.slane %v2949_v28, 2  ;;  %v2989_v42 = vsel %vm34_vm2, %v11183_v61, -inf  ;;  %v2996_v38 = vsel %vm34_vm2, %v2242_v50, -inf  ;;  %v2957_v15 = vrot.slane %v2956_v2, 2 }
 0x166   :  { %v2963_v43 = vmax.f32 %v2961_v39, %v2962_v31  ;;  %v2970_v56 = vmax.f32 %v2968_v46, %v2969_v17  ;;  %v2977_v14 = vmax.f32 %v2975_v34, %v2976_v27  ;;  %v2983_v6 = vrot.slane %v2982_v47, 4 }
 0x167   :  { %v2951_v52 = vmax.f32 %v2949_v28, %v2950_v58  ;;  %v2990_v51 = vrot.slane %v2989_v42, 4  ;;  %v2997_v60 = vrot.slane %v2996_v38, 4  ;;  %v2958_v37 = vmax.f32 %v2956_v2, %v2957_v15 }
 0x168   :  { %v2964_v5 = vrot.slane %v2963_v43, 2  ;;  %v2971_v11 = vrot.slane %v2970_v56, 2  ;;  %v2978_v54 = vrot.slane %v2977_v14, 2  ;;  %v2984_v1 = vmax.f32 %v2982_v47, %v2983_v6 }
 0x169   :  { %v2952_v25 = vrot.slane %v2951_v52, 1  ;;  %v2991_v13 = vmax.f32 %v2989_v42, %v2990_v51  ;;  %v2998_v12 = vmax.f32 %v2996_v38, %v2997_v60  ;;  %v2959_v19 = vrot.slane %v2958_v37, 1  ;;  %v8533_v38 = vld [vmem:[%s13273_s0 + $0x140] sm:$0xff] }
 0x16a   :  { %v2965_v61 = vmax.f32 %v2963_v43, %v2964_v5  ;;  %v2972_v57 = vmax.f32 %v2970_v56, %v2971_v11  ;;  %v2979_v50 = vmax.f32 %v2977_v14, %v2978_v54  ;;  %v2985_v35 = vrot.slane %v2984_v1, 2  ;;  %v8536_v54 = vld [vmem:[%s13273_s0 + $0x158] sm:$0xff] }
 0x16b   :  { %v2953_v21 = vmax.f32 %v2951_v52, %v2952_v25  ;;  %v2992_v7 = vrot.slane %v2991_v13, 2  ;;  %v2999_v44 = vrot.slane %v2998_v12, 2  ;;  %v2960_v48 = vmax.f32 %v2958_v37, %v2959_v19 }
 0x16c   :  { %v2966_v49 = vrot.slane %v2965_v61, 1  ;;  %v2973_v45 = vrot.slane %v2972_v57, 1  ;;  %v2980_v0 = vrot.slane %v2979_v50, 1  ;;  %v2986_v63 = vmax.f32 %v2984_v1, %v2985_v35 }
 0x16d   :  { %v2993_v55 = vmax.f32 %v2991_v13, %v2992_v7  ;;  %v3000_v29 = vmax.f32 %v2998_v12, %v2999_v44  ;;  %v3699_v36 = vsel %vm32_vm1, %v11198_v26, -inf  ;;  %v3700_v32 = vsel %vm32_vm1, %v2953_v21, -inf }
 0x16e   :  { %v2967_v24 = vmax.f32 %v2965_v61, %v2966_v49  ;;  %v2974_v16 = vmax.f32 %v2972_v57, %v2973_v45  ;;  %v2981_v8 = vmax.f32 %v2979_v50, %v2980_v0  ;;  %v2987_v59 = vrot.slane %v2986_v63, 1 }
 0x16f   :  { %v2994_v18 = vrot.slane %v2993_v55, 1  ;;  %v3001_v9 = vrot.slane %v3000_v29, 1  ;;  %v3701_v23 = vmax.f32 %v3699_v36, %v3700_v32  ;;  %v3702_v30 = vsel %vm32_vm1, %v11200_v53, -inf }
 0x170   :  { %v3703_v3 = vsel %vm32_vm1, %v2960_v48, -inf  ;;  %v3705_v39 = vsel %vm32_vm1, %v11202_v4, -inf  ;;  %v3706_v46 = vsel %vm32_vm1, %v2967_v24, -inf  ;;  %v2988_v26 = vmax.f32 %v2986_v63, %v2987_v59 }
 0x171   :  { %v2995_v34 = vmax.f32 %v2993_v55, %v2994_v18  ;;  %v3002_v28 = vmax.f32 %v3000_v29, %v3001_v9  ;;  %v3704_v2 = vmax.f32 %v3702_v30, %v3703_v3  ;;  %v3707_v31 = vmax.f32 %v3705_v39, %v3706_v46 }
 0x172   :  { %v3708_v17 = vsel %vm32_vm1, %v11204_v41, -inf  ;;  %v3709_v27 = vsel %vm32_vm1, %v2974_v16, -inf  ;;  %v3711_v53 = vsel %vm32_vm1, %v11206_v40, -inf  ;;  %v3712_v47 = vsel %vm32_vm1, %v2981_v8, -inf  ;;  %v8534_v40 = vld [vmem:[%s13273_s0 + $0x148] sm:$0xff] }
 0x173   :  { %v3710_v58 = vmax.f32 %v3708_v17, %v3709_v27  ;;  %v3714_v4 = vsel %vm32_vm1, %v11219_v22, -inf  ;;  %v3715_v42 = vsel %vm32_vm1, %v2988_v26, -inf  ;;  %v3713_v15 = vmax.f32 %v3711_v53, %v3712_v47  ;;  %v8535_v22 = vld [vmem:[%s13273_s0 + $0x150] sm:$0xff] }
 0x174   :  { %v3716_v43 = vmax.f32 %v3714_v4, %v3715_v42  ;;  %v3717_v41 = vsel %vm32_vm1, %v11221_v20, -inf  ;;  %v3718_v56 = vsel %vm32_vm1, %v2995_v34, -inf  ;;  %v3720_v52 = vsel %vm32_vm1, %v11223_v62, -inf }
 0x175   :  { %v3719_v14 = vmax.f32 %v3717_v41, %v3718_v56  ;;  %v3721_v6 = vsel %vm32_vm1, %v3002_v28, -inf  ;;  %v3938_v51 = vsel %vm1962_vm3, %v3704_v2, %v3701_v23  ;;  %v2243_v37 = vcombine.high %v8533_v38, %v8533_v38 }
 0x176   :  { %v3722_v60 = vmax.f32 %v3720_v52, %v3721_v6  ;;  %v3939_v20 = vsel %vm1964_vm4, %v3707_v31, %v3938_v51  ;;  %v2250_v5 = vrot.slane %v8533_v38, %v10206_v33  ;;  %v2260_v25 = vcombine.high %v8534_v40, %v8534_v40 }
 0x177   :  { %v3940_v11 = vsel %vm1966_vm5, %v3710_v58, %v3939_v20  ;;  %v2267_v1 = vrot.slane %v8534_v40, %v10206_v33  ;;  %v2277_v62 = vcombine.high %v8535_v22, %v8535_v22  ;;  %v2257_v12 = vrot.slane %v2243_v37, %v10206_v33 }
 0x178   :  { %v3941_v13 = vsel %vm1968_vm6, %v3713_v15, %v3940_v11  ;;  %v2258_v19 = vcombine.high %v2250_v5, %v2250_v5  ;;  %v11279_v61 = vrot.slane %v8535_v22, %v10206_v33  ;;  %v2274_v50 = vrot.slane %v2260_v25, %v10206_v33 }
 0x179   :  { %v3942_v57 = vsel %vm1970_vm7, %v3716_v43, %v3941_v13  ;;  %v2275_v21 = vcombine.high %v2267_v1, %v2267_v1  ;;  %v11284_v35 = vrot.slane %v2277_v62, %v10206_v33  ;;  %v2259_v44 = vcombine.high %v2257_v12, %v2257_v12 }
 0x17a   :  { %v3943_v7 = vsel %vm1972_vm8, %v3719_v14, %v3942_v57  ;;  %v2292_v48 = vcombine.high %v11279_v61, %v11279_v61  ;;  %v2294_v49 = vcombine.high %v8536_v54, %v8536_v54  ;;  %v2276_v0 = vcombine.high %v2274_v50, %v2274_v50 }
 0x17b   :  { %v3944_v45 = vsel %vm1974_vm9, %v3722_v60, %v3943_v7  ;;  %v2293_v63 = vcombine.high %v11284_v35, %v11284_v35  ;;  %v11293_v55 = vrot.slane %v8536_v54, %v10206_v33  ;;  %v3003_v36 = vsel %vm34_vm2, %v2250_v5, -inf }
 0x17c   :  { %3997 = vst.msk [vmem:[#allocation2 + $0xc1] sm:$0xff] %vm32_vm1, %v3944_v45  ;;  %v11297_v29 = vrot.slane %v2294_v49, %v10206_v33  ;;  %v3010_v24 = vsel %vm34_vm2, %v2258_v19, -inf  ;;  %v3017_v16 = vsel %vm34_vm2, %v2257_v12, -inf  ;;  %v3004_v32 = vrot.slane %v3003_v36, 4 }
 0x17d   :  { %v2309_v8 = vcombine.high %v11293_v55, %v11293_v55  ;;  %v3011_v59 = vrot.slane %v3010_v24, 4  ;;  %v3018_v18 = vrot.slane %v3017_v16, 4  ;;  %v3024_v23 = vsel %vm34_vm2, %v2259_v44, -inf }
 0x17e   :  { %v2310_v9 = vcombine.high %v11297_v29, %v11297_v29  ;;  %v3031_v30 = vsel %vm34_vm2, %v2267_v1, -inf  ;;  %v3038_v3 = vsel %vm34_vm2, %v2275_v21, -inf  ;;  %v3005_v39 = vmax.f32 %v3003_v36, %v3004_v32 }
 0x17f   :  { %v3012_v46 = vmax.f32 %v3010_v24, %v3011_v59  ;;  %v3019_v26 = vmax.f32 %v3017_v16, %v3018_v18  ;;  %v3025_v34 = vrot.slane %v3024_v23, 4  ;;  %v3032_v28 = vrot.slane %v3031_v30, 4 }
 0x180   :  { %v3039_v2 = vrot.slane %v3038_v3, 4  ;;  %v3045_v31 = vsel %vm34_vm2, %v2274_v50, -inf  ;;  %v3052_v17 = vsel %vm34_vm2, %v2276_v0, -inf  ;;  %v3006_v27 = vrot.slane %v3005_v39, 2 }
 0x181   :  { %v3013_v53 = vrot.slane %v3012_v46, 2  ;;  %v3020_v58 = vrot.slane %v3019_v26, 2  ;;  %v3026_v47 = vmax.f32 %v3024_v23, %v3025_v34  ;;  %v3033_v4 = vmax.f32 %v3031_v30, %v3032_v28 }
 0x182   :  { %v3040_v42 = vmax.f32 %v3038_v3, %v3039_v2  ;;  %v3046_v38 = vrot.slane %v3045_v31, 4  ;;  %v3053_v15 = vrot.slane %v3052_v17, 4  ;;  %v3007_v41 = vmax.f32 %v3005_v39, %v3006_v27 }
 0x183   :  { %v4031_v43 = vld [vmem:[#allocation2 + $0xc1] sm:$0xff]  ;;  %v3014_v56 = vmax.f32 %v3012_v46, %v3013_v53  ;;  %v3021_v40 = vmax.f32 %v3019_v26, %v3020_v58  ;;  %v3027_v22 = vrot.slane %v3026_v47, 2  ;;  %v3034_v14 = vrot.slane %v3033_v4, 2 }
 0x184   :  { %9197 = vmatprep.mubr.msk.f32.mxu0 %vm32_vm1, %v4031_v43  ;;  %v3041_v52 = vrot.slane %v3040_v42, 2  ;;  %v3047_v6 = vmax.f32 %v3045_v31, %v3046_v38  ;;  %v3054_v51 = vmax.f32 %v3052_v17, %v3053_v15  ;;  %v3008_v60 = vrot.slane %v3007_v41, 1 }
 0x185   :  { %v3015_v20 = vrot.slane %v3014_v56, 1  ;;  %v3022_v37 = vrot.slane %v3021_v40, 1  ;;  %v3028_v5 = vmax.f32 %v3026_v47, %v3027_v22  ;;  %v3035_v11 = vmax.f32 %v3033_v4, %v3034_v14 }
 0x186   :  { %v3042_v54 = vmax.f32 %v3040_v42, %v3041_v52  ;;  %v3048_v25 = vrot.slane %v3047_v6, 2  ;;  %v3055_v1 = vrot.slane %v3054_v51, 2  ;;  %v11312_v62 = vmax.f32 %v3007_v41, %v3008_v60 }
 0x187   :  { %v11314_v13 = vmax.f32 %v3014_v56, %v3015_v20  ;;  %v11316_v12 = vmax.f32 %v3021_v40, %v3022_v37  ;;  %v3029_v19 = vrot.slane %v3028_v5, 1  ;;  %v3036_v57 = vrot.slane %v3035_v11, 1 }
 0x188   :  { %v3043_v50 = vrot.slane %v3042_v54, 1  ;;  %v3049_v21 = vmax.f32 %v3047_v6, %v3048_v25  ;;  %v3056_v7 = vmax.f32 %v3054_v51, %v3055_v1  ;;  %v3059_v49 = vsel %vm34_vm2, %v11279_v61, -inf }
 0x189   :  { %v11318_v44 = vmax.f32 %v3028_v5, %v3029_v19  ;;  %v3066_v45 = vsel %vm34_vm2, %v2292_v48, -inf  ;;  %v3073_v0 = vsel %vm34_vm2, %v11284_v35, -inf  ;;  %v11328_v36 = vmax.f32 %v3035_v11, %v3036_v57 }
 0x18a   :  { %v11330_v24 = vmax.f32 %v3042_v54, %v3043_v50  ;;  %v3050_v16 = vrot.slane %v3049_v21, 1  ;;  %v3057_v32 = vrot.slane %v3056_v7, 1  ;;  %v3060_v59 = vrot.slane %v3059_v49, 4 }
 0x18b   :  { %v3067_v18 = vrot.slane %v3066_v45, 4  ;;  %v3074_v23 = vrot.slane %v3073_v0, 4  ;;  %v3080_v30 = vsel %vm34_vm2, %v2293_v63, -inf  ;;  %v3087_v39 = vsel %vm34_vm2, %v11293_v55, -inf }
 0x18c   :  { %v11336_v61 = vmax.f32 %v3049_v21, %v3050_v16  ;;  %v11338_v48 = vmax.f32 %v3056_v7, %v3057_v32  ;;  %v3081_v3 = vrot.slane %v3080_v30, 4  ;;  %v3061_v46 = vmax.f32 %v3059_v49, %v3060_v59 }
 0x18d   :  { %v3068_v26 = vmax.f32 %v3066_v45, %v3067_v18  ;;  %v3075_v34 = vmax.f32 %v3073_v0, %v3074_v23  ;;  %v3088_v28 = vrot.slane %v3087_v39, 4  ;;  %v3094_v35 = vsel %vm34_vm2, %v2309_v8, -inf }
 0x18e   :  { %v3082_v2 = vmax.f32 %v3080_v30, %v3081_v3  ;;  %v3101_v63 = vsel %vm34_vm2, %v11297_v29, -inf  ;;  %v3108_v31 = vsel %vm34_vm2, %v2310_v9, -inf  ;;  %v3062_v17 = vrot.slane %v3061_v46, 2 }
 0x18f   :  { %v3069_v27 = vrot.slane %v3068_v26, 2  ;;  %v3076_v53 = vrot.slane %v3075_v34, 2  ;;  %v3089_v58 = vmax.f32 %v3087_v39, %v3088_v28  ;;  %v3095_v4 = vrot.slane %v3094_v35, 4 }
 0x190   :  { %v3083_v47 = vrot.slane %v3082_v2, 2  ;;  %v3102_v42 = vrot.slane %v3101_v63, 4  ;;  %v3109_v38 = vrot.slane %v3108_v31, 4  ;;  %v3063_v15 = vmax.f32 %v3061_v46, %v3062_v17 }
 0x191   :  { %v3070_v55 = vmax.f32 %v3068_v26, %v3069_v27  ;;  %v3077_v43 = vmax.f32 %v3075_v34, %v3076_v53  ;;  %v3090_v8 = vrot.slane %v3089_v58, 2  ;;  %v3096_v56 = vmax.f32 %v3094_v35, %v3095_v4 }
 0x192   :  { %v3084_v41 = vmax.f32 %v3082_v2, %v3083_v47  ;;  %v3103_v40 = vmax.f32 %v3101_v63, %v3102_v42  ;;  %v3110_v22 = vmax.f32 %v3108_v31, %v3109_v38  ;;  %v3064_v14 = vrot.slane %v3063_v15, 1  ;;  %v8538_v31 = vld [vmem:[%s13273_s0 + $0x168] sm:$0xff] }
 0x193   :  { %v3071_v29 = vrot.slane %v3070_v55, 1  ;;  %v3078_v52 = vrot.slane %v3077_v43, 1  ;;  %v3091_v9 = vmax.f32 %v3089_v58, %v3090_v8  ;;  %v3097_v51 = vrot.slane %v3096_v56, 2  ;;  %v8539_v58 = vld [vmem:[%s13273_s0 + $0x170] sm:$0xff] }
 0x194   :  { %v3085_v6 = vrot.slane %v3084_v41, 1  ;;  %v3104_v60 = vrot.slane %v3103_v40, 2  ;;  %v3111_v20 = vrot.slane %v3110_v22, 2  ;;  %v3065_v37 = vmax.f32 %v3063_v15, %v3064_v14 }
 0x195   :  { %v3072_v5 = vmax.f32 %v3070_v55, %v3071_v29  ;;  %v3079_v11 = vmax.f32 %v3077_v43, %v3078_v52  ;;  %v3092_v54 = vrot.slane %v3091_v9, 1  ;;  %v3098_v1 = vmax.f32 %v3096_v56, %v3097_v51 }
 0x196   :  { %v3086_v25 = vmax.f32 %v3084_v41, %v3085_v6  ;;  %v3105_v19 = vmax.f32 %v3103_v40, %v3104_v60  ;;  %v3112_v57 = vmax.f32 %v3110_v22, %v3111_v20  ;;  %v3723_v21 = vsel %vm32_vm1, %v11312_v62, -inf }
 0x197   :  { %v3093_v50 = vmax.f32 %v3091_v9, %v3092_v54  ;;  %v3724_v7 = vsel %vm32_vm1, %v3065_v37, -inf  ;;  %v3726_v49 = vsel %vm32_vm1, %v11314_v13, -inf  ;;  %v3099_v45 = vrot.slane %v3098_v1, 1 }
 0x198   :  { %v3106_v0 = vrot.slane %v3105_v19, 1  ;;  %v3113_v16 = vrot.slane %v3112_v57, 1  ;;  %v3725_v32 = vmax.f32 %v3723_v21, %v3724_v7  ;;  %v3727_v59 = vsel %vm32_vm1, %v3072_v5, -inf }
 0x199   :  { %v3729_v18 = vsel %vm32_vm1, %v11316_v12, -inf  ;;  %v3730_v23 = vsel %vm32_vm1, %v3079_v11, -inf  ;;  %v3732_v30 = vsel %vm32_vm1, %v11318_v44, -inf  ;;  %v3100_v62 = vmax.f32 %v3098_v1, %v3099_v45  ;;  %v8537_v12 = vld [vmem:[%s13273_s0 + $0x160] sm:$0xff] }
 0x19a   :  { %v3107_v3 = vmax.f32 %v3105_v19, %v3106_v0  ;;  %v3114_v39 = vmax.f32 %v3112_v57, %v3113_v16  ;;  %v3728_v46 = vmax.f32 %v3726_v49, %v3727_v59  ;;  %v3731_v26 = vmax.f32 %v3729_v18, %v3730_v23 }
 0x19b   :  { %v3733_v13 = vsel %vm32_vm1, %v3086_v25, -inf  ;;  %v3735_v34 = vsel %vm32_vm1, %v11328_v36, -inf  ;;  %v3736_v28 = vsel %vm32_vm1, %v3093_v50, -inf  ;;  %v3738_v44 = vsel %vm32_vm1, %v11330_v24, -inf }
 0x19c   :  { %v3734_v2 = vmax.f32 %v3732_v30, %v3733_v13  ;;  %v3737_v35 = vmax.f32 %v3735_v34, %v3736_v28  ;;  %v3739_v63 = vsel %vm32_vm1, %v3100_v62, -inf  ;;  %v3741_v36 = vsel %vm32_vm1, %v11336_v61, -inf }
 0x19d   :  { %v3740_v17 = vmax.f32 %v3738_v44, %v3739_v63  ;;  %v3742_v27 = vsel %vm32_vm1, %v3107_v3, -inf  ;;  %v3744_v53 = vsel %vm32_vm1, %v11338_v48, -inf  ;;  %v3745_v47 = vsel %vm32_vm1, %v3114_v39, -inf  ;;  %v8540_v48 = vld [vmem:[%s13273_s0 + $0x178] sm:$0xff] }
 0x19e   :  { %v3743_v24 = vmax.f32 %v3741_v36, %v3742_v27  ;;  %v3945_v4 = vsel %vm1962_vm3, %v3728_v46, %v3725_v32  ;;  %v2311_v42 = vcombine.high %v8537_v12, %v8537_v12  ;;  %v3746_v38 = vmax.f32 %v3744_v53, %v3745_v47 }
 0x19f   :  { %v3946_v15 = vsel %vm1964_vm4, %v3731_v26, %v3945_v4  ;;  %v2318_v61 = vrot.slane %v8537_v12, %v10206_v33  ;;  %v2328_v55 = vcombine.high %v8538_v31, %v8538_v31  ;;  %v2335_v41 = vrot.slane %v8538_v31, %v10206_v33 }
 0x1a0   :  { %v3947_v43 = vsel %vm1966_vm5, %v3734_v2, %v3946_v15  ;;  %v2325_v8 = vrot.slane %v2311_v42, %v10206_v33  ;;  %v2345_v56 = vcombine.high %v8539_v58, %v8539_v58  ;;  %v11397_v29 = vrot.slane %v8539_v58, %v10206_v33 }
 0x1a1   :  { %v3948_v40 = vsel %vm1968_vm6, %v3737_v35, %v3947_v43  ;;  %v2326_v22 = vcombine.high %v2318_v61, %v2318_v61  ;;  %v2342_v14 = vrot.slane %v2328_v55, %v10206_v33  ;;  %v2343_v6 = vcombine.high %v2335_v41, %v2335_v41 }
 0x1a2   :  { %v3949_v52 = vsel %vm1970_vm7, %v3740_v17, %v3948_v40  ;;  %v2327_v9 = vcombine.high %v2325_v8, %v2325_v8  ;;  %v11401_v51 = vrot.slane %v2345_v56, %v10206_v33  ;;  %v2360_v37 = vcombine.high %v11397_v29, %v11397_v29 }
 0x1a3   :  { %v3950_v60 = vsel %vm1972_vm8, %v3743_v24, %v3949_v52  ;;  %v2344_v20 = vcombine.high %v2342_v14, %v2342_v14  ;;  %v2362_v5 = vcombine.high %v8540_v48, %v8540_v48  ;;  %v11410_v25 = vrot.slane %v8540_v48, %v10206_v33 }
 0x1a4   :  { %v3951_v11 = vsel %vm1974_vm9, %v3746_v38, %v3950_v60  ;;  %v2361_v54 = vcombine.high %v11401_v51, %v11401_v51  ;;  %v3115_v1 = vsel %vm34_vm2, %v2318_v61, -inf  ;;  %v3122_v50 = vsel %vm34_vm2, %v2326_v22, -inf }
 0x1a5   :  { %3998 = vst.msk [vmem:[#allocation2 + $0xd1] sm:$0xff] %vm32_vm1, %v3951_v11  ;;  %v11415_v19 = vrot.slane %v2362_v5, %v10206_v33  ;;  %v3116_v57 = vrot.slane %v3115_v1, 4  ;;  %v3129_v21 = vsel %vm34_vm2, %v2325_v8, -inf  ;;  %v2377_v7 = vcombine.high %v11410_v25, %v11410_v25 }
 0x1a6   :  { %v3123_v49 = vrot.slane %v3122_v50, 4  ;;  %v3130_v45 = vrot.slane %v3129_v21, 4  ;;  %v3136_v0 = vsel %vm34_vm2, %v2327_v9, -inf  ;;  %v3143_v18 = vsel %vm34_vm2, %v2335_v41, -inf }
 0x1a7   :  { %v2378_v16 = vcombine.high %v11415_v19, %v11415_v19  ;;  %v3117_v32 = vmax.f32 %v3115_v1, %v3116_v57  ;;  %v3137_v59 = vrot.slane %v3136_v0, 4  ;;  %v3144_v62 = vrot.slane %v3143_v18, 4 }
 0x1a8   :  { %v3124_v23 = vmax.f32 %v3122_v50, %v3123_v49  ;;  %v3131_v30 = vmax.f32 %v3129_v21, %v3130_v45  ;;  %v3150_v3 = vsel %vm34_vm2, %v2343_v6, -inf  ;;  %v3157_v13 = vsel %vm34_vm2, %v2342_v14, -inf }
 0x1a9   :  { %v3118_v39 = vrot.slane %v3117_v32, 2  ;;  %v3138_v46 = vmax.f32 %v3136_v0, %v3137_v59  ;;  %v3151_v26 = vrot.slane %v3150_v3, 4  ;;  %v3145_v12 = vmax.f32 %v3143_v18, %v3144_v62 }
 0x1aa   :  { %v3125_v34 = vrot.slane %v3124_v23, 2  ;;  %v3132_v28 = vrot.slane %v3131_v30, 2  ;;  %v3158_v2 = vrot.slane %v3157_v13, 4  ;;  %v3164_v31 = vsel %vm34_vm2, %v2344_v20, -inf }
 0x1ab   :  { %v3119_v35 = vmax.f32 %v3117_v32, %v3118_v39  ;;  %v3139_v44 = vrot.slane %v3138_v46, 2  ;;  %v3152_v63 = vmax.f32 %v3150_v3, %v3151_v26  ;;  %v3146_v53 = vrot.slane %v3145_v12, 2 }
 0x1ac   :  { %v4032_v17 = vld [vmem:[#allocation2 + $0xd1] sm:$0xff]  ;;  %v3126_v36 = vmax.f32 %v3124_v23, %v3125_v34  ;;  %v3133_v27 = vmax.f32 %v3131_v30, %v3132_v28  ;;  %v3159_v58 = vmax.f32 %v3157_v13, %v3158_v2  ;;  %v3165_v42 = vrot.slane %v3164_v31, 4 }
 0x1ad   :  { %9198 = vmatmul.mubr.msk.f32.gmra.mrb[10].mxu0 %vm32_vm1, %v4032_v17  ;;  %v3120_v24 = vrot.slane %v3119_v35, 1  ;;  %v3140_v47 = vmax.f32 %v3138_v46, %v3139_v44  ;;  %v3153_v4 = vrot.slane %v3152_v63, 2  ;;  %v3147_v61 = vmax.f32 %v3145_v12, %v3146_v53 }
 0x1ae   :  { %v3127_v38 = vrot.slane %v3126_v36, 1  ;;  %v3134_v15 = vrot.slane %v3133_v27, 1  ;;  %v3160_v55 = vrot.slane %v3159_v58, 2  ;;  %v3166_v41 = vmax.f32 %v3164_v31, %v3165_v42 }
 0x1af   :  { %v11429_v43 = vmax.f32 %v3119_v35, %v3120_v24  ;;  %v3141_v48 = vrot.slane %v3140_v47, 1  ;;  %v3154_v8 = vmax.f32 %v3152_v63, %v3153_v4  ;;  %v3148_v22 = vrot.slane %v3147_v61, 1 }
 0x1b0   :  { %v11431_v56 = vmax.f32 %v3126_v36, %v3127_v38  ;;  %v11433_v40 = vmax.f32 %v3133_v27, %v3134_v15  ;;  %v3161_v14 = vmax.f32 %v3159_v58, %v3160_v55  ;;  %v3167_v6 = vrot.slane %v3166_v41, 2 }
 0x1b1   :  { %v11435_v52 = vmax.f32 %v3140_v47, %v3141_v48  ;;  %v3155_v9 = vrot.slane %v3154_v8, 1  ;;  %v3171_v60 = vsel %vm34_vm2, %v11397_v29, -inf  ;;  %v11439_v20 = vmax.f32 %v3147_v61, %v3148_v22 }
 0x1b2   :  { %v3162_v5 = vrot.slane %v3161_v14, 1  ;;  %v3172_v11 = vrot.slane %v3171_v60, 4  ;;  %v3178_v1 = vsel %vm34_vm2, %v2360_v37, -inf  ;;  %v3168_v50 = vmax.f32 %v3166_v41, %v3167_v6 }
 0x1b3   :  { %v11445_v57 = vmax.f32 %v3154_v8, %v3155_v9  ;;  %v3179_v21 = vrot.slane %v3178_v1, 4  ;;  %v3185_v49 = vsel %vm34_vm2, %v11401_v51, -inf  ;;  %v3192_v59 = vsel %vm34_vm2, %v2361_v54, -inf }
 0x1b4   :  { %v11449_v45 = vmax.f32 %v3161_v14, %v3162_v5  ;;  %v3173_v0 = vmax.f32 %v3171_v60, %v3172_v11  ;;  %v3186_v32 = vrot.slane %v3185_v49, 4  ;;  %v3169_v18 = vrot.slane %v3168_v50, 1 }
 0x1b5   :  { %v3180_v29 = vmax.f32 %v3178_v1, %v3179_v21  ;;  %v3193_v23 = vrot.slane %v3192_v59, 4  ;;  %v3199_v37 = vsel %vm34_vm2, %v11410_v25, -inf  ;;  %v3206_v39 = vsel %vm34_vm2, %v2377_v7, -inf }
 0x1b6   :  { %v3174_v30 = vrot.slane %v3173_v0, 2  ;;  %v3187_v62 = vmax.f32 %v3185_v49, %v3186_v32  ;;  %v3200_v3 = vrot.slane %v3199_v37, 4  ;;  %v11461_v46 = vmax.f32 %v3168_v50, %v3169_v18 }
 0x1b7   :  { %v3181_v26 = vrot.slane %v3180_v29, 2  ;;  %v3194_v51 = vmax.f32 %v3192_v59, %v3193_v23  ;;  %v3207_v13 = vrot.slane %v3206_v39, 4  ;;  %v3213_v12 = vsel %vm34_vm2, %v11415_v19, -inf }
 0x1b8   :  { %v3175_v54 = vmax.f32 %v3173_v0, %v3174_v30  ;;  %v3188_v34 = vrot.slane %v3187_v62, 2  ;;  %v3201_v28 = vmax.f32 %v3199_v37, %v3200_v3  ;;  %v3214_v63 = vrot.slane %v3213_v12, 4  ;;  %v8541_v3 = vld [vmem:[%s13273_s0 + $0x180] sm:$0xff] }
 0x1b9   :  { %v3182_v2 = vmax.f32 %v3180_v29, %v3181_v26  ;;  %v3195_v35 = vrot.slane %v3194_v51, 2  ;;  %v3208_v44 = vmax.f32 %v3206_v39, %v3207_v13  ;;  %v3220_v7 = vsel %vm34_vm2, %v2378_v16, -inf }
 0x1ba   :  { %v3176_v31 = vrot.slane %v3175_v54, 1  ;;  %v3189_v17 = vmax.f32 %v3187_v62, %v3188_v34  ;;  %v3202_v25 = vrot.slane %v3201_v28, 2  ;;  %v3215_v58 = vmax.f32 %v3213_v12, %v3214_v63 }
 0x1bb   :  { %v3183_v36 = vrot.slane %v3182_v2, 1  ;;  %v3196_v27 = vmax.f32 %v3194_v51, %v3195_v35  ;;  %v3209_v53 = vrot.slane %v3208_v44, 2  ;;  %v3221_v42 = vrot.slane %v3220_v7, 4 }
 0x1bc   :  { %v3177_v24 = vmax.f32 %v3175_v54, %v3176_v31  ;;  %v3190_v47 = vrot.slane %v3189_v17, 1  ;;  %v3203_v4 = vmax.f32 %v3201_v28, %v3202_v25  ;;  %v3216_v55 = vrot.slane %v3215_v58, 2  ;;  %v8544_v31 = vld [vmem:[%s13273_s0 + $0x198] sm:$0xff] }
 0x1bd   :  { %v3184_v38 = vmax.f32 %v3182_v2, %v3183_v36  ;;  %v3197_v15 = vrot.slane %v3196_v27, 1  ;;  %v3210_v61 = vmax.f32 %v3208_v44, %v3209_v53  ;;  %v3222_v41 = vmax.f32 %v3220_v7, %v3221_v42 }
 0x1be   :  { %v3191_v48 = vmax.f32 %v3189_v17, %v3190_v47  ;;  %v3204_v8 = vrot.slane %v3203_v4, 1  ;;  %v3747_v19 = vsel %vm32_vm1, %v11429_v43, -inf  ;;  %v3217_v14 = vmax.f32 %v3215_v58, %v3216_v55 }
 0x1bf   :  { %v3198_v22 = vmax.f32 %v3196_v27, %v3197_v15  ;;  %v3211_v16 = vrot.slane %v3210_v61, 1  ;;  %v3748_v9 = vsel %vm32_vm1, %v3177_v24, -inf  ;;  %v3223_v60 = vrot.slane %v3222_v41, 2 }
 0x1c0   :  { %v3205_v6 = vmax.f32 %v3203_v4, %v3204_v8  ;;  %v3749_v5 = vmax.f32 %v3747_v19, %v3748_v9  ;;  %v3750_v11 = vsel %vm32_vm1, %v11431_v56, -inf  ;;  %v3218_v50 = vrot.slane %v3217_v14, 1 }
 0x1c1   :  { %v3212_v1 = vmax.f32 %v3210_v61, %v3211_v16  ;;  %v3751_v21 = vsel %vm32_vm1, %v3184_v38, -inf  ;;  %v3753_v49 = vsel %vm32_vm1, %v11433_v40, -inf  ;;  %v3224_v0 = vmax.f32 %v3222_v41, %v3223_v60 }
 0x1c2   :  { %v3752_v43 = vmax.f32 %v3750_v11, %v3751_v21  ;;  %v3754_v32 = vsel %vm32_vm1, %v3191_v48, -inf  ;;  %v3756_v59 = vsel %vm32_vm1, %v11435_v52, -inf  ;;  %v3219_v18 = vmax.f32 %v3217_v14, %v3218_v50  ;;  %v8542_v52 = vld [vmem:[%s13273_s0 + $0x188] sm:$0xff] }
 0x1c3   :  { %v3755_v29 = vmax.f32 %v3753_v49, %v3754_v32  ;;  %v3757_v23 = vsel %vm32_vm1, %v3198_v22, -inf  ;;  %v3759_v56 = vsel %vm32_vm1, %v11439_v20, -inf  ;;  %v3225_v37 = vrot.slane %v3224_v0, 1 }
 0x1c4   :  { %v3758_v30 = vmax.f32 %v3756_v59, %v3757_v23  ;;  %v3760_v62 = vsel %vm32_vm1, %v3205_v6, -inf  ;;  %v3762_v40 = vsel %vm32_vm1, %v11445_v57, -inf  ;;  %v3763_v26 = vsel %vm32_vm1, %v3212_v1, -inf  ;;  %v8543_v57 = vld [vmem:[%s13273_s0 + $0x190] sm:$0xff]  ;;  %v8592_v23 = vld [vmem:[%s13272_s1 + $0x8] sm:$0xf] }
 0x1c5   :  { %v3761_v39 = vmax.f32 %v3759_v56, %v3760_v62  ;;  %v3765_v20 = vsel %vm32_vm1, %v11449_v45, -inf  ;;  %v3766_v51 = vsel %vm32_vm1, %v3219_v18, -inf  ;;  %v3226_v13 = vmax.f32 %v3224_v0, %v3225_v37  ;;  %9232 = vmatprep.subr.msk.mxu0 %vm4087_vm0, %v8592_v23 }
 0x1c6   :  { %v3764_v54 = vmax.f32 %v3762_v40, %v3763_v26  ;;  %v3767_v34 = vmax.f32 %v3765_v20, %v3766_v51  ;;  %v3768_v28 = vsel %vm32_vm1, %v11461_v46, -inf  ;;  %v3952_v12 = vsel %vm1962_vm3, %v3752_v43, %v3749_v5 }
 0x1c7   :  { %v2379_v2 = vcombine.high %v8541_v3, %v8541_v3  ;;  %v2386_v35 = vrot.slane %v8541_v3, %v10206_v33  ;;  %v2396_v44 = vcombine.high %v8542_v52, %v8542_v52  ;;  %v3769_v45 = vsel %vm32_vm1, %v3226_v13, -inf }
 0x1c8   :  { %v3953_v63 = vsel %vm1964_vm4, %v3755_v29, %v3952_v12  ;;  %v2403_v17 = vrot.slane %v8542_v52, %v10206_v33  ;;  %v2413_v25 = vcombine.high %v8543_v57, %v8543_v57  ;;  %v3770_v7 = vmax.f32 %v3768_v28, %v3769_v45 }
 0x1c9   :  { %v3954_v46 = vsel %vm1966_vm5, %v3758_v30, %v3953_v63  ;;  %v2393_v36 = vrot.slane %v2379_v2, %v10206_v33  ;;  %v2394_v27 = vcombine.high %v2386_v35, %v2386_v35  ;;  %v2410_v58 = vrot.slane %v2396_v44, %v10206_v33 }
 0x1ca   :  { %v3955_v53 = vsel %vm1968_vm6, %v3761_v39, %v3954_v46  ;;  %v2411_v24 = vcombine.high %v2403_v17, %v2403_v17  ;;  %v11514_v47 = vrot.slane %v8543_v57, %v10206_v33  ;;  %v11518_v38 = vrot.slane %v2413_v25, %v10206_v33 }
 0x1cb   :  { %v3956_v4 = vsel %vm1970_vm7, %v3764_v54, %v3955_v53  ;;  %v2395_v42 = vcombine.high %v2393_v36, %v2393_v36  ;;  %v2430_v15 = vcombine.high %v8544_v31, %v8544_v31  ;;  %v2412_v55 = vcombine.high %v2410_v58, %v2410_v58 }
 0x1cc   :  { %v3957_v61 = vsel %vm1972_vm8, %v3767_v34, %v3956_v4  ;;  %v2428_v48 = vcombine.high %v11514_v47, %v11514_v47  ;;  %v11524_v8 = vrot.slane %v8544_v31, %v10206_v33  ;;  %v2429_v19 = vcombine.high %v11518_v38, %v11518_v38 }
 0x1cd   :  { %v3958_v41 = vsel %vm1974_vm9, %v3770_v7, %v3957_v61  ;;  %v11530_v22 = vrot.slane %v2430_v15, %v10206_v33  ;;  %v3227_v16 = vsel %vm34_vm2, %v2386_v35, -inf  ;;  %v3234_v6 = vsel %vm34_vm2, %v2394_v27, -inf }
 0x1ce   :  { %3999 = vst.msk [vmem:[#allocation2 + $0xe1] sm:$0xff] %vm32_vm1, %v3958_v41  ;;  %v2445_v14 = vcombine.high %v11524_v8, %v11524_v8  ;;  %v3228_v9 = vrot.slane %v3227_v16, 4  ;;  %v3241_v60 = vsel %vm34_vm2, %v2393_v36, -inf  ;;  %v3235_v11 = vrot.slane %v3234_v6, 4 }
 0x1cf   :  { %v2446_v5 = vcombine.high %v11530_v22, %v11530_v22  ;;  %v3242_v1 = vrot.slane %v3241_v60, 4  ;;  %v3248_v50 = vsel %vm34_vm2, %v2395_v42, -inf  ;;  %v3255_v0 = vsel %vm34_vm2, %v2403_v17, -inf }
 0x1d0   :  { %v3229_v21 = vmax.f32 %v3227_v16, %v3228_v9  ;;  %v3249_v49 = vrot.slane %v3248_v50, 4  ;;  %v3262_v43 = vsel %vm34_vm2, %v2411_v24, -inf  ;;  %v3236_v32 = vmax.f32 %v3234_v6, %v3235_v11 }
 0x1d1   :  { %v3243_v59 = vmax.f32 %v3241_v60, %v3242_v1  ;;  %v3256_v18 = vrot.slane %v3255_v0, 4  ;;  %v3263_v29 = vrot.slane %v3262_v43, 4  ;;  %v3269_v30 = vsel %vm34_vm2, %v2410_v58, -inf }
 0x1d2   :  { %v3230_v56 = vrot.slane %v3229_v21, 2  ;;  %v3250_v37 = vmax.f32 %v3248_v50, %v3249_v49  ;;  %v3276_v62 = vsel %vm34_vm2, %v2412_v55, -inf  ;;  %v3237_v40 = vrot.slane %v3236_v32, 2 }
 0x1d3   :  { %v3244_v3 = vrot.slane %v3243_v59, 2  ;;  %v3257_v52 = vmax.f32 %v3255_v0, %v3256_v18  ;;  %v3264_v39 = vmax.f32 %v3262_v43, %v3263_v29  ;;  %v3270_v51 = vrot.slane %v3269_v30, 4 }
 0x1d4   :  { %v3231_v26 = vmax.f32 %v3229_v21, %v3230_v56  ;;  %v3251_v20 = vrot.slane %v3250_v37, 2  ;;  %v3277_v57 = vrot.slane %v3276_v62, 4  ;;  %v3238_v54 = vmax.f32 %v3236_v32, %v3237_v40 }
 0x1d5   :  { %v4033_v13 = vld [vmem:[#allocation2 + $0xe1] sm:$0xff]  ;;  %v3245_v34 = vmax.f32 %v3243_v59, %v3244_v3  ;;  %v3258_v28 = vrot.slane %v3257_v52, 2  ;;  %v3265_v12 = vrot.slane %v3264_v39, 2  ;;  %v3271_v44 = vmax.f32 %v3269_v30, %v3270_v51 }
 0x1d6   :  { %9200 = vmatprep.mubr.msk.f32.mxu0 %vm32_vm1, %v4033_v13  ;;  %v3232_v2 = vrot.slane %v3231_v26, 1  ;;  %v3252_v35 = vmax.f32 %v3250_v37, %v3251_v20  ;;  %v3278_v45 = vmax.f32 %v3276_v62, %v3277_v57  ;;  %v3239_v63 = vrot.slane %v3238_v54, 1 }
 0x1d7   :  { %v3246_v31 = vrot.slane %v3245_v34, 1  ;;  %v3259_v17 = vmax.f32 %v3257_v52, %v3258_v28  ;;  %v3266_v25 = vmax.f32 %v3264_v39, %v3265_v12  ;;  %v3272_v36 = vrot.slane %v3271_v44, 2 }
 0x1d8   :  { %v11550_v7 = vmax.f32 %v3231_v26, %v3232_v2  ;;  %v3253_v46 = vrot.slane %v3252_v35, 1  ;;  %v3279_v27 = vrot.slane %v3278_v45, 2  ;;  %v11552_v53 = vmax.f32 %v3238_v54, %v3239_v63 }
 0x1d9   :  { %v11554_v58 = vmax.f32 %v3245_v34, %v3246_v31  ;;  %v3260_v24 = vrot.slane %v3259_v17, 1  ;;  %v3267_v4 = vrot.slane %v3266_v25, 1  ;;  %v3273_v15 = vmax.f32 %v3271_v44, %v3272_v36 }
 0x1da   :  { %v11556_v42 = vmax.f32 %v3252_v35, %v3253_v46  ;;  %v3280_v61 = vmax.f32 %v3278_v45, %v3279_v27  ;;  %v3283_v55 = vsel %vm34_vm2, %v11514_v47, -inf  ;;  %v3290_v6 = vsel %vm34_vm2, %v2428_v48, -inf }
 0x1db   :  { %v11560_v41 = vmax.f32 %v3259_v17, %v3260_v24  ;;  %v11562_v16 = vmax.f32 %v3266_v25, %v3267_v4  ;;  %v3284_v9 = vrot.slane %v3283_v55, 4  ;;  %v3274_v60 = vrot.slane %v3273_v15, 1 }
 0x1dc   :  { %v3281_v11 = vrot.slane %v3280_v61, 1  ;;  %v3291_v1 = vrot.slane %v3290_v6, 4  ;;  %v3297_v50 = vsel %vm34_vm2, %v11518_v38, -inf  ;;  %v3304_v0 = vsel %vm34_vm2, %v2429_v19, -inf }
 0x1dd   :  { %v3285_v21 = vmax.f32 %v3283_v55, %v3284_v9  ;;  %v3298_v49 = vrot.slane %v3297_v50, 4  ;;  %v3311_v43 = vsel %vm34_vm2, %v11524_v8, -inf  ;;  %v11576_v32 = vmax.f32 %v3273_v15, %v3274_v60 }
 0x1de   :  { %v11578_v47 = vmax.f32 %v3280_v61, %v3281_v11  ;;  %v3292_v48 = vmax.f32 %v3290_v6, %v3291_v1  ;;  %v3305_v59 = vrot.slane %v3304_v0, 4  ;;  %v3312_v23 = vrot.slane %v3311_v43, 4 }
 0x1df   :  { %v3286_v18 = vrot.slane %v3285_v21, 2  ;;  %v3299_v29 = vmax.f32 %v3297_v50, %v3298_v49  ;;  %v3318_v56 = vsel %vm34_vm2, %v2445_v14, -inf  ;;  %v3325_v30 = vsel %vm34_vm2, %v11530_v22, -inf }
 0x1e0   :  { %v3293_v38 = vrot.slane %v3292_v48, 2  ;;  %v3306_v37 = vmax.f32 %v3304_v0, %v3305_v59  ;;  %v3319_v19 = vrot.slane %v3318_v56, 4  ;;  %v3313_v3 = vmax.f32 %v3311_v43, %v3312_v23 }
 0x1e1   :  { %v3287_v62 = vmax.f32 %v3285_v21, %v3286_v18  ;;  %v3300_v40 = vrot.slane %v3299_v29, 2  ;;  %v3326_v52 = vrot.slane %v3325_v30, 4  ;;  %v3332_v8 = vsel %vm34_vm2, %v2446_v5, -inf  ;;  %v8545_v18 = vld [vmem:[%s13273_s0 + $0x1a0] sm:$0xff] }
 0x1e2   :  { %v3294_v39 = vmax.f32 %v3292_v48, %v3293_v38  ;;  %v3307_v26 = vrot.slane %v3306_v37, 2  ;;  %v3320_v20 = vmax.f32 %v3318_v56, %v3319_v19  ;;  %v3314_v57 = vrot.slane %v3313_v3, 2 }
 0x1e3   :  { %v3288_v51 = vrot.slane %v3287_v62, 1  ;;  %v3301_v14 = vmax.f32 %v3299_v29, %v3300_v40  ;;  %v3327_v13 = vmax.f32 %v3325_v30, %v3326_v52  ;;  %v3333_v12 = vrot.slane %v3332_v8, 4 }
 0x1e4   :  { %v3295_v54 = vrot.slane %v3294_v39, 1  ;;  %v3308_v34 = vmax.f32 %v3306_v37, %v3307_v26  ;;  %v3321_v28 = vrot.slane %v3320_v20, 2  ;;  %v3315_v44 = vmax.f32 %v3313_v3, %v3314_v57 }
 0x1e5   :  { %v3289_v2 = vmax.f32 %v3287_v62, %v3288_v51  ;;  %v3302_v35 = vrot.slane %v3301_v14, 1  ;;  %v3328_v45 = vrot.slane %v3327_v13, 2  ;;  %v3334_v25 = vmax.f32 %v3332_v8, %v3333_v12 }
 0x1e6   :  { %v3296_v63 = vmax.f32 %v3294_v39, %v3295_v54  ;;  %v3309_v31 = vrot.slane %v3308_v34, 1  ;;  %v3322_v17 = vmax.f32 %v3320_v20, %v3321_v28  ;;  %v3316_v22 = vrot.slane %v3315_v44, 1 }
 0x1e7   :  { %v3303_v46 = vmax.f32 %v3301_v14, %v3302_v35  ;;  %v3329_v36 = vmax.f32 %v3327_v13, %v3328_v45  ;;  %v3771_v5 = vsel %vm32_vm1, %v11550_v7, -inf  ;;  %v3335_v4 = vrot.slane %v3334_v25, 2 }
 0x1e8   :  { %v3310_v27 = vmax.f32 %v3308_v34, %v3309_v31  ;;  %v3323_v24 = vrot.slane %v3322_v17, 1  ;;  %v3772_v15 = vsel %vm32_vm1, %v3289_v2, -inf  ;;  %v3317_v61 = vmax.f32 %v3315_v44, %v3316_v22 }
 0x1e9   :  { %v3330_v55 = vrot.slane %v3329_v36, 1  ;;  %v3773_v9 = vmax.f32 %v3771_v5, %v3772_v15  ;;  %v3774_v6 = vsel %vm32_vm1, %v11552_v53, -inf  ;;  %v3336_v11 = vmax.f32 %v3334_v25, %v3335_v4 }
 0x1ea   :  { %v3324_v60 = vmax.f32 %v3322_v17, %v3323_v24  ;;  %v3775_v1 = vsel %vm32_vm1, %v3296_v63, -inf  ;;  %v3777_v50 = vsel %vm32_vm1, %v11554_v58, -inf  ;;  %v3778_v49 = vsel %vm32_vm1, %v3303_v46, -inf }
 0x1eb   :  { %v3331_v21 = vmax.f32 %v3329_v36, %v3330_v55  ;;  %v3776_v7 = vmax.f32 %v3774_v6, %v3775_v1  ;;  %v3780_v0 = vsel %vm32_vm1, %v11556_v42, -inf  ;;  %v3337_v43 = vrot.slane %v3336_v11, 1 }
 0x1ec   :  { %v3779_v48 = vmax.f32 %v3777_v50, %v3778_v49  ;;  %v3781_v59 = vsel %vm32_vm1, %v3310_v27, -inf  ;;  %v3783_v53 = vsel %vm32_vm1, %v11560_v41, -inf  ;;  %v3784_v58 = vsel %vm32_vm1, %v3317_v61, -inf  ;;  %v8546_v41 = vld [vmem:[%s13273_s0 + $0x1a8] sm:$0xff] }
 0x1ed   :  { %v3782_v29 = vmax.f32 %v3780_v0, %v3781_v59  ;;  %v3786_v23 = vsel %vm32_vm1, %v11562_v16, -inf  ;;  %v3787_v56 = vsel %vm32_vm1, %v3324_v60, -inf  ;;  %v3338_v42 = vmax.f32 %v3336_v11, %v3337_v43  ;;  %v8547_v16 = vld [vmem:[%s13273_s0 + $0x1b0] sm:$0xff] }
 0x1ee   :  { %v3785_v38 = vmax.f32 %v3783_v53, %v3784_v58  ;;  %v3788_v37 = vmax.f32 %v3786_v23, %v3787_v56  ;;  %v3789_v19 = vsel %vm32_vm1, %v11576_v32, -inf  ;;  %v3790_v30 = vsel %vm32_vm1, %v3331_v21, -inf }
 0x1ef   :  { %v3792_v62 = vsel %vm32_vm1, %v11578_v47, -inf  ;;  %v3959_v40 = vsel %vm1962_vm3, %v3776_v7, %v3773_v9  ;;  %v2447_v3 = vcombine.high %v8545_v18, %v8545_v18  ;;  %v3791_v52 = vmax.f32 %v3789_v19, %v3790_v30  ;;  %v8548_v47 = vld [vmem:[%s13273_s0 + $0x1b8] sm:$0xff] }
 0x1f0   :  { %v3793_v39 = vsel %vm32_vm1, %v3338_v42, -inf  ;;  %v3960_v32 = vsel %vm1964_vm4, %v3779_v48, %v3959_v40  ;;  %v2454_v26 = vrot.slane %v8545_v18, %v10206_v33  ;;  %v2464_v14 = vcombine.high %v8546_v41, %v8546_v41 }
 0x1f1   :  { %v3794_v20 = vmax.f32 %v3792_v62, %v3793_v39  ;;  %v3961_v8 = vsel %vm1966_vm5, %v3782_v29, %v3960_v32  ;;  %v2461_v51 = vrot.slane %v2447_v3, %v10206_v33  ;;  %v2471_v54 = vrot.slane %v8546_v41, %v10206_v33 }
 0x1f2   :  { %v3962_v57 = vsel %vm1968_vm6, %v3785_v38, %v3961_v8  ;;  %v2462_v13 = vcombine.high %v2454_v26, %v2454_v26  ;;  %v2481_v34 = vcombine.high %v8547_v16, %v8547_v16  ;;  %v2478_v2 = vrot.slane %v2464_v14, %v10206_v33 }
 0x1f3   :  { %v3963_v28 = vsel %vm1970_vm7, %v3788_v37, %v3962_v57  ;;  %v2463_v12 = vcombine.high %v2461_v51, %v2461_v51  ;;  %v11636_v35 = vrot.slane %v8547_v16, %v10206_v33  ;;  %v2479_v45 = vcombine.high %v2471_v54, %v2471_v54 }
 0x1f4   :  { %v3964_v44 = vsel %vm1972_vm8, %v3791_v52, %v3963_v28  ;;  %v11640_v63 = vrot.slane %v2481_v34, %v10206_v33  ;;  %v2498_v31 = vcombine.high %v8548_v47, %v8548_v47  ;;  %v2480_v25 = vcombine.high %v2478_v2, %v2478_v2 }
 0x1f5   :  { %v3965_v17 = vsel %vm1974_vm9, %v3794_v20, %v3964_v44  ;;  %v2496_v46 = vcombine.high %v11636_v35, %v11636_v35  ;;  %v11646_v22 = vrot.slane %v8548_v47, %v10206_v33  ;;  %v3339_v27 = vsel %vm34_vm2, %v2454_v26, -inf }
 0x1f6   :  { %4000 = vst.msk [vmem:[#allocation2 + $0xf1] sm:$0xff] %vm32_vm1, %v3965_v17  ;;  %v2497_v36 = vcombine.high %v11640_v63, %v11640_v63  ;;  %v11652_v5 = vrot.slane %v2498_v31, %v10206_v33  ;;  %v3346_v24 = vsel %vm34_vm2, %v2462_v13, -inf  ;;  %v3340_v15 = vrot.slane %v3339_v27, 4 }
 0x1f7   :  { %v2513_v4 = vcombine.high %v11646_v22, %v11646_v22  ;;  %v3347_v61 = vrot.slane %v3346_v24, 4  ;;  %v3353_v55 = vsel %vm34_vm2, %v2461_v51, -inf  ;;  %v3360_v60 = vsel %vm34_vm2, %v2463_v12, -inf }
 0x1f8   :  { %v2514_v9 = vcombine.high %v11652_v5, %v11652_v5  ;;  %v3354_v6 = vrot.slane %v3353_v55, 4  ;;  %v3367_v11 = vsel %vm34_vm2, %v2471_v54, -inf  ;;  %v3341_v1 = vmax.f32 %v3339_v27, %v3340_v15 }
 0x1f9   :  { %v3348_v50 = vmax.f32 %v3346_v24, %v3347_v61  ;;  %v3361_v21 = vrot.slane %v3360_v60, 4  ;;  %v3368_v7 = vrot.slane %v3367_v11, 4  ;;  %v3374_v0 = vsel %vm34_vm2, %v2479_v45, -inf }
 0x1fa   :  { %v3355_v49 = vmax.f32 %v3353_v55, %v3354_v6  ;;  %v3381_v43 = vsel %vm34_vm2, %v2478_v2, -inf  ;;  %v3388_v48 = vsel %vm34_vm2, %v2480_v25, -inf  ;;  %v3342_v59 = vrot.slane %v3341_v1, 2 }
 0x1fb   :  { %v3349_v53 = vrot.slane %v3348_v50, 2  ;;  %v3362_v18 = vmax.f32 %v3360_v60, %v3361_v21  ;;  %v3369_v29 = vmax.f32 %v3367_v11, %v3368_v7  ;;  %v3375_v23 = vrot.slane %v3374_v0, 4 }
 0x1fc   :  { %v3356_v58 = vrot.slane %v3355_v49, 2  ;;  %v3382_v56 = vrot.slane %v3381_v43, 4  ;;  %v3389_v42 = vrot.slane %v3388_v48, 4  ;;  %v3343_v37 = vmax.f32 %v3341_v1, %v3342_v59 }
 0x1fd   :  { %v4034_v38 = vld [vmem:[#allocation2 + $0xf1] sm:$0xff]  ;;  %v3350_v19 = vmax.f32 %v3348_v50, %v3349_v53  ;;  %v3363_v41 = vrot.slane %v3362_v18, 2  ;;  %v3370_v30 = vrot.slane %v3369_v29, 2  ;;  %v3376_v40 = vmax.f32 %v3374_v0, %v3375_v23 }
 0x1fe   :  { %9201 = vmatmul.mubr.msk.f32.gmra.mrb[12].mxu0 %vm32_vm1, %v4034_v38  ;;  %v3357_v62 = vmax.f32 %v3355_v49, %v3356_v58  ;;  %v3383_v16 = vmax.f32 %v3381_v43, %v3382_v56  ;;  %v3390_v3 = vmax.f32 %v3388_v48, %v3389_v42  ;;  %v3344_v52 = vrot.slane %v3343_v37, 1 }
 0x1ff   :  { %v3351_v39 = vrot.slane %v3350_v19, 1  ;;  %v3364_v32 = vmax.f32 %v3362_v18, %v3363_v41  ;;  %v3371_v26 = vmax.f32 %v3369_v29, %v3370_v30  ;;  %v3377_v8 = vrot.slane %v3376_v40, 2 }
 0x200   :  { %v3358_v20 = vrot.slane %v3357_v62, 1  ;;  %v3384_v47 = vrot.slane %v3383_v16, 2  ;;  %v3391_v51 = vrot.slane %v3390_v3, 2  ;;  %v11667_v14 = vmax.f32 %v3343_v37, %v3344_v52 }
 0x201   :  { %v11669_v57 = vmax.f32 %v3350_v19, %v3351_v39  ;;  %v3365_v13 = vrot.slane %v3364_v32, 1  ;;  %v3372_v54 = vrot.slane %v3371_v26, 1  ;;  %v3378_v28 = vmax.f32 %v3376_v40, %v3377_v8 }
 0x202   :  { %v11671_v34 = vmax.f32 %v3357_v62, %v3358_v20  ;;  %v3385_v12 = vmax.f32 %v3383_v16, %v3384_v47  ;;  %v3392_v2 = vmax.f32 %v3390_v3, %v3391_v51  ;;  %v3395_v31 = vsel %vm34_vm2, %v11636_v35, -inf }
 0x203   :  { %v11673_v44 = vmax.f32 %v3364_v32, %v3365_v13  ;;  %v11675_v45 = vmax.f32 %v3371_v26, %v3372_v54  ;;  %v3402_v17 = vsel %vm34_vm2, %v2496_v46, -inf  ;;  %v3379_v25 = vrot.slane %v3378_v28, 1 }
 0x204   :  { %v3386_v27 = vrot.slane %v3385_v12, 1  ;;  %v3393_v24 = vrot.slane %v3392_v2, 1  ;;  %v3396_v15 = vrot.slane %v3395_v31, 4  ;;  %v3403_v61 = vrot.slane %v3402_v17, 4 }
 0x205   :  { %v3409_v55 = vsel %vm34_vm2, %v11640_v63, -inf  ;;  %v3416_v6 = vsel %vm34_vm2, %v2497_v36, -inf  ;;  %v3423_v60 = vsel %vm34_vm2, %v11646_v22, -inf  ;;  %v11688_v11 = vmax.f32 %v3378_v28, %v3379_v25 }
 0x206   :  { %v11690_v35 = vmax.f32 %v3385_v12, %v3386_v27  ;;  %v11692_v46 = vmax.f32 %v3392_v2, %v3393_v24  ;;  %v3397_v1 = vmax.f32 %v3395_v31, %v3396_v15  ;;  %v3404_v50 = vmax.f32 %v3402_v17, %v3403_v61 }
 0x207   :  { %v3410_v21 = vrot.slane %v3409_v55, 4  ;;  %v3417_v7 = vrot.slane %v3416_v6, 4  ;;  %v3424_v49 = vrot.slane %v3423_v60, 4  ;;  %v3430_v63 = vsel %vm34_vm2, %v2513_v4, -inf }
 0x208   :  { %v3398_v0 = vrot.slane %v3397_v1, 2  ;;  %v3437_v36 = vsel %vm34_vm2, %v11652_v5, -inf  ;;  %v3444_v43 = vsel %vm34_vm2, %v2514_v9, -inf  ;;  %v3405_v48 = vrot.slane %v3404_v50, 2 }
 0x209   :  { %v3411_v59 = vmax.f32 %v3409_v55, %v3410_v21  ;;  %v3418_v53 = vmax.f32 %v3416_v6, %v3417_v7  ;;  %v3425_v18 = vmax.f32 %v3423_v60, %v3424_v49  ;;  %v3431_v58 = vrot.slane %v3430_v63, 4 }
 0x20a   :  { %v3399_v29 = vmax.f32 %v3397_v1, %v3398_v0  ;;  %v3438_v23 = vrot.slane %v3437_v36, 4  ;;  %v3445_v56 = vrot.slane %v3444_v43, 4  ;;  %v3406_v42 = vmax.f32 %v3404_v50, %v3405_v48 }
 0x20b   :  { %v3412_v22 = vrot.slane %v3411_v59, 2  ;;  %v3419_v38 = vrot.slane %v3418_v53, 2  ;;  %v3426_v4 = vrot.slane %v3425_v18, 2  ;;  %v3432_v19 = vmax.f32 %v3430_v63, %v3431_v58 }
 0x20c   :  { %v3400_v37 = vrot.slane %v3399_v29, 1  ;;  %v3439_v41 = vmax.f32 %v3437_v36, %v3438_v23  ;;  %v3446_v30 = vmax.f32 %v3444_v43, %v3445_v56  ;;  %v3407_v62 = vrot.slane %v3406_v42, 1  ;;  %v8549_v43 = vld [vmem:[%s13273_s0 + $0x1c0] sm:$0xff] }
 0x20d   :  { %v3413_v5 = vmax.f32 %v3411_v59, %v3412_v22  ;;  %v3420_v40 = vmax.f32 %v3418_v53, %v3419_v38  ;;  %v3427_v9 = vmax.f32 %v3425_v18, %v3426_v4  ;;  %v3433_v3 = vrot.slane %v3432_v19, 2  ;;  %v8552_v4 = vld [vmem:[%s13273_s0 + $0x1d8] sm:$0xff] }
 0x20e   :  { %v3401_v16 = vmax.f32 %v3399_v29, %v3400_v37  ;;  %v3440_v52 = vrot.slane %v3439_v41, 2  ;;  %v3447_v39 = vrot.slane %v3446_v30, 2  ;;  %v3408_v32 = vmax.f32 %v3406_v42, %v3407_v62 }
 0x20f   :  { %v3414_v26 = vrot.slane %v3413_v5, 1  ;;  %v3421_v20 = vrot.slane %v3420_v40, 1  ;;  %v3428_v8 = vrot.slane %v3427_v9, 1  ;;  %v3434_v47 = vmax.f32 %v3432_v19, %v3433_v3 }
 0x210   :  { %v3441_v51 = vmax.f32 %v3439_v41, %v3440_v52  ;;  %v3448_v13 = vmax.f32 %v3446_v30, %v3447_v39  ;;  %v3795_v54 = vsel %vm32_vm1, %v11667_v14, -inf  ;;  %v3796_v31 = vsel %vm32_vm1, %v3401_v16, -inf }
 0x211   :  { %v3415_v28 = vmax.f32 %v3413_v5, %v3414_v26  ;;  %v3422_v12 = vmax.f32 %v3420_v40, %v3421_v20  ;;  %v3429_v2 = vmax.f32 %v3427_v9, %v3428_v8  ;;  %v3435_v17 = vrot.slane %v3434_v47, 1 }
 0x212   :  { %v3442_v25 = vrot.slane %v3441_v51, 1  ;;  %v3449_v27 = vrot.slane %v3448_v13, 1  ;;  %v3797_v24 = vmax.f32 %v3795_v54, %v3796_v31  ;;  %v3798_v15 = vsel %vm32_vm1, %v11669_v57, -inf }
 0x213   :  { %v3799_v61 = vsel %vm32_vm1, %v3408_v32, -inf  ;;  %v3801_v55 = vsel %vm32_vm1, %v11671_v34, -inf  ;;  %v3802_v6 = vsel %vm32_vm1, %v3415_v28, -inf  ;;  %v3436_v14 = vmax.f32 %v3434_v47, %v3435_v17 }
 0x214   :  { %v3443_v60 = vmax.f32 %v3441_v51, %v3442_v25  ;;  %v3450_v1 = vmax.f32 %v3448_v13, %v3449_v27  ;;  %v3800_v50 = vmax.f32 %v3798_v15, %v3799_v61  ;;  %v3803_v21 = vmax.f32 %v3801_v55, %v3802_v6 }
 0x215   :  { %v3804_v7 = vsel %vm32_vm1, %v11673_v44, -inf  ;;  %v3805_v49 = vsel %vm32_vm1, %v3422_v12, -inf  ;;  %v3807_v57 = vsel %vm32_vm1, %v11675_v45, -inf  ;;  %v3808_v63 = vsel %vm32_vm1, %v3429_v2, -inf  ;;  %v8550_v45 = vld [vmem:[%s13273_s0 + $0x1c8] sm:$0xff] }
 0x216   :  { %v3806_v0 = vmax.f32 %v3804_v7, %v3805_v49  ;;  %v3810_v34 = vsel %vm32_vm1, %v11688_v11, -inf  ;;  %v3811_v36 = vsel %vm32_vm1, %v3436_v14, -inf  ;;  %v3809_v48 = vmax.f32 %v3807_v57, %v3808_v63  ;;  %v8551_v11 = vld [vmem:[%s13273_s0 + $0x1d0] sm:$0xff] }
 0x217   :  { %v3812_v59 = vmax.f32 %v3810_v34, %v3811_v36  ;;  %v3813_v44 = vsel %vm32_vm1, %v11690_v35, -inf  ;;  %v3814_v53 = vsel %vm32_vm1, %v3443_v60, -inf  ;;  %v3816_v29 = vsel %vm32_vm1, %v11692_v46, -inf }
 0x218   :  { %v3815_v18 = vmax.f32 %v3813_v44, %v3814_v53  ;;  %v3817_v58 = vsel %vm32_vm1, %v3450_v1, -inf  ;;  %v3966_v23 = vsel %vm1962_vm3, %v3800_v50, %v3797_v24  ;;  %v2515_v42 = vcombine.high %v8549_v43, %v8549_v43 }
 0x219   :  { %v3818_v56 = vmax.f32 %v3816_v29, %v3817_v58  ;;  %v3967_v35 = vsel %vm1964_vm4, %v3803_v21, %v3966_v23  ;;  %v2522_v22 = vrot.slane %v8549_v43, %v10206_v33  ;;  %v2532_v37 = vcombine.high %v8550_v45, %v8550_v45 }
 0x21a   :  { %v3968_v38 = vsel %vm1966_vm5, %v3806_v0, %v3967_v35  ;;  %v2539_v19 = vrot.slane %v8550_v45, %v10206_v33  ;;  %v2549_v46 = vcombine.high %v8551_v11, %v8551_v11  ;;  %v2529_v30 = vrot.slane %v2515_v42, %v10206_v33 }
 0x21b   :  { %v3969_v41 = vsel %vm1968_vm6, %v3809_v48, %v3968_v38  ;;  %v2530_v62 = vcombine.high %v2522_v22, %v2522_v22  ;;  %v11748_v5 = vrot.slane %v8551_v11, %v10206_v33  ;;  %v2546_v9 = vrot.slane %v2532_v37, %v10206_v33 }
 0x21c   :  { %v3970_v40 = vsel %vm1970_vm7, %v3812_v59, %v3969_v41  ;;  %v2547_v16 = vcombine.high %v2539_v19, %v2539_v19  ;;  %v11753_v3 = vrot.slane %v2549_v46, %v10206_v33  ;;  %v2531_v39 = vcombine.high %v2529_v30, %v2529_v30 }
 0x21d   :  { %v3971_v52 = vsel %vm1972_vm8, %v3815_v18, %v3970_v40  ;;  %v2564_v32 = vcombine.high %v11748_v5, %v11748_v5  ;;  %v2566_v26 = vcombine.high %v8552_v4, %v8552_v4  ;;  %v2548_v8 = vcombine.high %v2546_v9, %v2546_v9 }
 0x21e   :  { %v3972_v20 = vsel %vm1974_vm9, %v3818_v56, %v3971_v52  ;;  %v2565_v47 = vcombine.high %v11753_v3, %v11753_v3  ;;  %v11762_v51 = vrot.slane %v8552_v4, %v10206_v33  ;;  %v3451_v54 = vsel %vm34_vm2, %v2522_v22, -inf }
 0x21f   :  { %4001 = vst.msk [vmem:[#allocation2 + $0x101] sm:$0xff] %vm32_vm1, %v3972_v20  ;;  %v11766_v13 = vrot.slane %v2566_v26, %v10206_v33  ;;  %v3458_v28 = vsel %vm34_vm2, %v2530_v62, -inf  ;;  %v3465_v12 = vsel %vm34_vm2, %v2529_v30, -inf  ;;  %v3452_v31 = vrot.slane %v3451_v54, 4 }
 0x220   :  { %v2581_v2 = vcombine.high %v11762_v51, %v11762_v51  ;;  %v3459_v17 = vrot.slane %v3458_v28, 4  ;;  %v3466_v25 = vrot.slane %v3465_v12, 4  ;;  %v3472_v24 = vsel %vm34_vm2, %v2531_v39, -inf }
 0x221   :  { %v2582_v27 = vcombine.high %v11766_v13, %v11766_v13  ;;  %v3479_v15 = vsel %vm34_vm2, %v2539_v19, -inf  ;;  %v3486_v61 = vsel %vm34_vm2, %v2547_v16, -inf  ;;  %v3453_v55 = vmax.f32 %v3451_v54, %v3452_v31 }
 0x222   :  { %v3460_v6 = vmax.f32 %v3458_v28, %v3459_v17  ;;  %v3467_v14 = vmax.f32 %v3465_v12, %v3466_v25  ;;  %v3473_v60 = vrot.slane %v3472_v24, 4  ;;  %v3480_v1 = vrot.slane %v3479_v15, 4 }
 0x223   :  { %v3487_v50 = vrot.slane %v3486_v61, 4  ;;  %v3493_v21 = vsel %vm34_vm2, %v2546_v9, -inf  ;;  %v3500_v7 = vsel %vm34_vm2, %v2548_v8, -inf  ;;  %v3454_v49 = vrot.slane %v3453_v55, 2 }
 0x224   :  { %v3461_v57 = vrot.slane %v3460_v6, 2  ;;  %v3468_v0 = vrot.slane %v3467_v14, 2  ;;  %v3474_v63 = vmax.f32 %v3472_v24, %v3473_v60  ;;  %v3481_v34 = vmax.f32 %v3479_v15, %v3480_v1 }
 0x225   :  { %v3488_v36 = vmax.f32 %v3486_v61, %v3487_v50  ;;  %v3494_v43 = vrot.slane %v3493_v21, 4  ;;  %v3501_v48 = vrot.slane %v3500_v7, 4  ;;  %v3455_v44 = vmax.f32 %v3453_v55, %v3454_v49 }
 0x226   :  { %v4035_v59 = vld [vmem:[#allocation2 + $0x101] sm:$0xff]  ;;  %v3462_v53 = vmax.f32 %v3460_v6, %v3461_v57  ;;  %v3469_v45 = vmax.f32 %v3467_v14, %v3468_v0  ;;  %v3475_v11 = vrot.slane %v3474_v63, 2  ;;  %v3482_v18 = vrot.slane %v3481_v34, 2 }
 0x227   :  { %9203 = vmatprep.mubr.msk.f32.mxu0 %vm32_vm1, %v4035_v59  ;;  %v3489_v29 = vrot.slane %v3488_v36, 2  ;;  %v3495_v58 = vmax.f32 %v3493_v21, %v3494_v43  ;;  %v3502_v23 = vmax.f32 %v3500_v7, %v3501_v48  ;;  %v3456_v56 = vrot.slane %v3455_v44, 1 }
 0x228   :  { %v3463_v35 = vrot.slane %v3462_v53, 1  ;;  %v3470_v42 = vrot.slane %v3469_v45, 1  ;;  %v3476_v22 = vmax.f32 %v3474_v63, %v3475_v11  ;;  %v3483_v38 = vmax.f32 %v3481_v34, %v3482_v18 }
 0x229   :  { %v3490_v4 = vmax.f32 %v3488_v36, %v3489_v29  ;;  %v3496_v37 = vrot.slane %v3495_v58, 2  ;;  %v3503_v19 = vrot.slane %v3502_v23, 2  ;;  %v11781_v46 = vmax.f32 %v3455_v44, %v3456_v56 }
 0x22a   :  { %v11783_v41 = vmax.f32 %v3462_v53, %v3463_v35  ;;  %v11785_v30 = vmax.f32 %v3469_v45, %v3470_v42  ;;  %v3477_v62 = vrot.slane %v3476_v22, 1  ;;  %v3484_v40 = vrot.slane %v3483_v38, 1 }
 0x22b   :  { %v3491_v9 = vrot.slane %v3490_v4, 1  ;;  %v3497_v16 = vmax.f32 %v3495_v58, %v3496_v37  ;;  %v3504_v52 = vmax.f32 %v3502_v23, %v3503_v19  ;;  %v3507_v26 = vsel %vm34_vm2, %v11748_v5, -inf }
 0x22c   :  { %v11787_v39 = vmax.f32 %v3476_v22, %v3477_v62  ;;  %v3514_v20 = vsel %vm34_vm2, %v2564_v32, -inf  ;;  %v3521_v8 = vsel %vm34_vm2, %v11753_v3, -inf  ;;  %v11797_v54 = vmax.f32 %v3483_v38, %v3484_v40 }
 0x22d   :  { %v11799_v28 = vmax.f32 %v3490_v4, %v3491_v9  ;;  %v3498_v12 = vrot.slane %v3497_v16, 1  ;;  %v3505_v31 = vrot.slane %v3504_v52, 1  ;;  %v3508_v17 = vrot.slane %v3507_v26, 4 }
 0x22e   :  { %v3515_v25 = vrot.slane %v3514_v20, 4  ;;  %v3522_v24 = vrot.slane %v3521_v8, 4  ;;  %v3528_v15 = vsel %vm34_vm2, %v2565_v47, -inf  ;;  %v3535_v55 = vsel %vm34_vm2, %v11762_v51, -inf }
 0x22f   :  { %v11805_v5 = vmax.f32 %v3497_v16, %v3498_v12  ;;  %v11807_v32 = vmax.f32 %v3504_v52, %v3505_v31  ;;  %v3529_v61 = vrot.slane %v3528_v15, 4  ;;  %v3509_v6 = vmax.f32 %v3507_v26, %v3508_v17 }
 0x230   :  { %v3516_v14 = vmax.f32 %v3514_v20, %v3515_v25  ;;  %v3523_v60 = vmax.f32 %v3521_v8, %v3522_v24  ;;  %v3536_v1 = vrot.slane %v3535_v55, 4  ;;  %v3542_v3 = vsel %vm34_vm2, %v2581_v2, -inf }
 0x231   :  { %v3530_v50 = vmax.f32 %v3528_v15, %v3529_v61  ;;  %v3549_v47 = vsel %vm34_vm2, %v11766_v13, -inf  ;;  %v3556_v21 = vsel %vm34_vm2, %v2582_v27, -inf  ;;  %v3510_v7 = vrot.slane %v3509_v6, 2 }
 0x232   :  { %v3517_v49 = vrot.slane %v3516_v14, 2  ;;  %v3524_v57 = vrot.slane %v3523_v60, 2  ;;  %v3537_v0 = vmax.f32 %v3535_v55, %v3536_v1  ;;  %v3543_v34 = vrot.slane %v3542_v3, 4 }
 0x233   :  { %v3531_v63 = vrot.slane %v3530_v50, 2  ;;  %v3550_v36 = vrot.slane %v3549_v47, 4  ;;  %v3557_v43 = vrot.slane %v3556_v21, 4  ;;  %v3511_v48 = vmax.f32 %v3509_v6, %v3510_v7 }
 0x234   :  { %v3518_v51 = vmax.f32 %v3516_v14, %v3517_v49  ;;  %v3525_v59 = vmax.f32 %v3523_v60, %v3524_v57  ;;  %v3538_v2 = vrot.slane %v3537_v0, 2  ;;  %v3544_v53 = vmax.f32 %v3542_v3, %v3543_v34 }
 0x235   :  { %v3532_v44 = vmax.f32 %v3530_v50, %v3531_v63  ;;  %v3551_v45 = vmax.f32 %v3549_v47, %v3550_v36  ;;  %v3558_v11 = vmax.f32 %v3556_v21, %v3557_v43  ;;  %v3512_v18 = vrot.slane %v3511_v48, 1  ;;  %v103_v21 = vld [vmem:[%s13273_s0 + $0xe8] sm:$0xff] }
 0x236   :  { %v3519_v13 = vrot.slane %v3518_v51, 1  ;;  %v3526_v29 = vrot.slane %v3525_v59, 1  ;;  %v3539_v27 = vmax.f32 %v3537_v0, %v3538_v2  ;;  %v3545_v23 = vrot.slane %v3544_v53, 2  ;;  %v104_v0 = vld [vmem:[%s13273_s0 + $0xf0] sm:$0xff] }
 0x237   :  { %v3533_v58 = vrot.slane %v3532_v44, 1  ;;  %v3552_v56 = vrot.slane %v3551_v45, 2  ;;  %v3559_v35 = vrot.slane %v3558_v11, 2  ;;  %v3513_v42 = vmax.f32 %v3511_v48, %v3512_v18 }
 0x238   :  { %v3520_v22 = vmax.f32 %v3518_v51, %v3519_v13  ;;  %v3527_v38 = vmax.f32 %v3525_v59, %v3526_v29  ;;  %v3540_v4 = vrot.slane %v3539_v27, 1  ;;  %v3546_v19 = vmax.f32 %v3544_v53, %v3545_v23 }
 0x239   :  { %v3534_v37 = vmax.f32 %v3532_v44, %v3533_v58  ;;  %v3553_v62 = vmax.f32 %v3551_v45, %v3552_v56  ;;  %v3560_v40 = vmax.f32 %v3558_v11, %v3559_v35  ;;  %v3819_v16 = vsel %vm32_vm1, %v11781_v46, -inf }
 0x23a   :  { %v3541_v9 = vmax.f32 %v3539_v27, %v3540_v4  ;;  %v3820_v52 = vsel %vm32_vm1, %v3513_v42, -inf  ;;  %v3822_v26 = vsel %vm32_vm1, %v11783_v41, -inf  ;;  %v3547_v20 = vrot.slane %v3546_v19, 1 }
 0x23b   :  { %v3554_v8 = vrot.slane %v3553_v62, 1  ;;  %v3561_v12 = vrot.slane %v3560_v40, 1  ;;  %v3821_v31 = vmax.f32 %v3819_v16, %v3820_v52  ;;  %v3823_v17 = vsel %vm32_vm1, %v3520_v22, -inf }
 0x23c   :  { %v3825_v25 = vsel %vm32_vm1, %v11785_v30, -inf  ;;  %v3826_v24 = vsel %vm32_vm1, %v3527_v38, -inf  ;;  %v3828_v15 = vsel %vm32_vm1, %v11787_v39, -inf  ;;  %v3548_v46 = vmax.f32 %v3546_v19, %v3547_v20  ;;  %v102_v30 = vld [vmem:[%s13273_s0 + $0xe0] sm:$0xff] }
 0x23d   :  { %v3555_v61 = vmax.f32 %v3553_v62, %v3554_v8  ;;  %v3562_v55 = vmax.f32 %v3560_v40, %v3561_v12  ;;  %v3824_v6 = vmax.f32 %v3822_v26, %v3823_v17  ;;  %v3827_v14 = vmax.f32 %v3825_v25, %v3826_v24 }
 0x23e   :  { %v3829_v41 = vsel %vm32_vm1, %v3534_v37, -inf  ;;  %v3831_v60 = vsel %vm32_vm1, %v11797_v54, -inf  ;;  %v3832_v1 = vsel %vm32_vm1, %v3541_v9, -inf  ;;  %v3834_v39 = vsel %vm32_vm1, %v11799_v28, -inf }
 0x23f   :  { %v3830_v50 = vmax.f32 %v3828_v15, %v3829_v41  ;;  %v3833_v3 = vmax.f32 %v3831_v60, %v3832_v1  ;;  %v3835_v47 = vsel %vm32_vm1, %v3548_v46, -inf  ;;  %v3837_v54 = vsel %vm32_vm1, %v11805_v5, -inf }
 0x240   :  { %v3836_v7 = vmax.f32 %v3834_v39, %v3835_v47  ;;  %v3838_v49 = vsel %vm32_vm1, %v3555_v61, -inf  ;;  %v3840_v57 = vsel %vm32_vm1, %v11807_v32, -inf  ;;  %v3841_v63 = vsel %vm32_vm1, %v3562_v55, -inf  ;;  %v105_v32 = vld [vmem:[%s13273_s0 + $0xf8] sm:$0xff] }
 0x241   :  { %v3839_v28 = vmax.f32 %v3837_v54, %v3838_v49  ;;  %v3973_v34 = vsel %vm1962_vm3, %v3824_v6, %v3821_v31  ;;  %v614_v36 = vcombine.high %v102_v30, %v102_v30  ;;  %v3842_v43 = vmax.f32 %v3840_v57, %v3841_v63 }
 0x242   :  { %v3974_v48 = vsel %vm1964_vm4, %v3827_v14, %v3973_v34  ;;  %v621_v5 = vrot.slane %v102_v30, %v10206_v33  ;;  %v631_v51 = vcombine.high %v103_v21, %v103_v21  ;;  %v638_v44 = vrot.slane %v103_v21, %v10206_v33 }
 0x243   :  { %v3975_v59 = vsel %vm1966_vm5, %v3830_v50, %v3974_v48  ;;  %v628_v2 = vrot.slane %v614_v36, %v10206_v33  ;;  %v648_v53 = vcombine.high %v104_v0, %v104_v0  ;;  %v11866_v13 = vrot.slane %v104_v0, %v10206_v33  ;;  %v11902_v48 = vld [vmem:[#allocation2 + $0x10] sm:$0xff] }
 0x244   :  { %v3976_v45 = vsel %vm1968_vm6, %v3833_v3, %v3975_v59  ;;  %v629_v11 = vcombine.high %v621_v5, %v621_v5  ;;  %v645_v18 = vrot.slane %v631_v51, %v10206_v33  ;;  %v646_v58 = vcombine.high %v638_v44, %v638_v44  ;;  %v4004_v3 = vld [vmem:[#allocation2] sm:$0xff] }
 0x245   :  { %v3977_v29 = vsel %vm1970_vm7, %v3836_v7, %v3976_v45  ;;  %v630_v27 = vcombine.high %v628_v2, %v628_v2  ;;  %v11870_v23 = vrot.slane %v648_v53, %v10206_v33  ;;  %v663_v42 = vcombine.high %v11866_v13, %v11866_v13 }
 0x246   :  { %v3978_v56 = vsel %vm1972_vm8, %v3839_v28, %v3977_v29  ;;  %v647_v35 = vcombine.high %v645_v18, %v645_v18  ;;  %v665_v22 = vcombine.high %v105_v32, %v105_v32  ;;  %v11879_v37 = vrot.slane %v105_v32, %v10206_v33 }
 0x247   :  { %v3979_v38 = vsel %vm1974_vm9, %v3842_v43, %v3978_v56  ;;  %v664_v4 = vcombine.high %v11870_v23, %v11870_v23  ;;  %v1594_v19 = vsel %vm34_vm2, %v621_v5, -inf  ;;  %v1601_v9 = vsel %vm34_vm2, %v629_v11, -inf }
 0x248   :  { %4002 = vst.msk [vmem:[#allocation2 + $0x111] sm:$0xff] %vm32_vm1, %v3979_v38  ;;  %v11884_v62 = vrot.slane %v665_v22, %v10206_v33  ;;  %v1595_v40 = vrot.slane %v1594_v19, 4  ;;  %v1608_v16 = vsel %vm34_vm2, %v628_v2, -inf  ;;  %v680_v52 = vcombine.high %v11879_v37, %v11879_v37  ;;  %v11904_v2 = vld [vmem:[#allocation2 + $0x20] sm:$0xff] }
 0x249   :  { %v1602_v26 = vrot.slane %v1601_v9, 4  ;;  %v1609_v20 = vrot.slane %v1608_v16, 4  ;;  %v1615_v8 = vsel %vm34_vm2, %v630_v27, -inf  ;;  %v1622_v25 = vsel %vm34_vm2, %v638_v44, -inf }
 0x24a   :  { %v681_v12 = vcombine.high %v11884_v62, %v11884_v62  ;;  %v1596_v31 = vmax.f32 %v1594_v19, %v1595_v40  ;;  %v1616_v17 = vrot.slane %v1615_v8, 4  ;;  %v1623_v46 = vrot.slane %v1622_v25, 4  ;;  %v9975_v40 = vld [vmem:[%s13272_s1 + $0x8] sm:$0xf] }
 0x24b   :  { %v1603_v24 = vmax.f32 %v1601_v9, %v1602_v26  ;;  %v1610_v15 = vmax.f32 %v1608_v16, %v1609_v20  ;;  %v1629_v61 = vsel %vm34_vm2, %v646_v58, -inf  ;;  %v1636_v41 = vsel %vm34_vm2, %v645_v18, -inf  ;;  %v11911_v18 = vld [vmem:[%s13272_s1 + $0xc] sm:$0xf]  ;;  %v11929_v9 = vld [vmem:[#allocation2 + $0x30] sm:$0xff] }
 0x24c   :  { %v1597_v55 = vrot.slane %v1596_v31, 2  ;;  %v1617_v6 = vmax.f32 %v1615_v8, %v1616_v17  ;;  %v1630_v14 = vrot.slane %v1629_v61, 4  ;;  %v1624_v30 = vmax.f32 %v1622_v25, %v1623_v46 }
 0x24d   :  { %v1604_v60 = vrot.slane %v1603_v24, 2  ;;  %v1611_v1 = vrot.slane %v1610_v15, 2  ;;  %v1637_v50 = vrot.slane %v1636_v41, 4  ;;  %v1643_v7 = vsel %vm34_vm2, %v647_v35, -inf }
 0x24e   :  { %v1598_v39 = vmax.f32 %v1596_v31, %v1597_v55  ;;  %v1618_v47 = vrot.slane %v1617_v6, 2  ;;  %v1631_v21 = vmax.f32 %v1629_v61, %v1630_v14  ;;  %v1625_v0 = vrot.slane %v1624_v30, 2  ;;  %v11937_v31 = vld [vmem:[#allocation2 + $0x40] sm:$0xff] }
 0x24f   :  { %v11897_v54 = vld [vmem:[#allocation2 + $0x111] sm:$0xff]  ;;  %v1605_v49 = vmax.f32 %v1603_v24, %v1604_v60  ;;  %v1612_v57 = vmax.f32 %v1610_v15, %v1611_v1  ;;  %v1638_v28 = vmax.f32 %v1636_v41, %v1637_v50  ;;  %v1644_v43 = vrot.slane %v1643_v7, 4 }
 0x250   :  { %9204 = vmatmul.mubr.msk.f32.gmra.mrb[14].mxu0 %vm32_vm1, %v11897_v54  ;;  %v1599_v63 = vrot.slane %v1598_v39, 1  ;;  %v1619_v34 = vmax.f32 %v1617_v6, %v1618_v47  ;;  %v1632_v36 = vrot.slane %v1631_v21, 2  ;;  %v1626_v59 = vmax.f32 %v1624_v30, %v1625_v0  ;;  %v11957_v60 = vld [vmem:[#allocation2 + $0x50] sm:$0xff] }
 0x251   :  { %9208 = vmatprep.mubr.msk.f32.mxu0 %vm32_vm1, %v4004_v3  ;;  %v1606_v5 = vrot.slane %v1605_v49, 1  ;;  %v1613_v51 = vrot.slane %v1612_v57, 1  ;;  %v1639_v32 = vrot.slane %v1638_v28, 2  ;;  %v1645_v11 = vmax.f32 %v1643_v7, %v1644_v43 }
 0x252   :  { %v11906_v44 = vmax.f32 %v1598_v39, %v1599_v63  ;;  %v1620_v53 = vrot.slane %v1619_v34, 1  ;;  %v1633_v45 = vmax.f32 %v1631_v21, %v1632_v36  ;;  %v1627_v58 = vrot.slane %v1626_v59, 1 }
 0x253   :  { %v11913_v29 = vmax.f32 %v1605_v49, %v1606_v5  ;;  %v11915_v27 = vmax.f32 %v1612_v57, %v1613_v51  ;;  %v1640_v56 = vmax.f32 %v1638_v28, %v1639_v32  ;;  %v1646_v38 = vrot.slane %v1645_v11, 2 }
 0x254   :  { %9209 = vmatmul.mubr.msk.f32.vlgmr.msra.gmra.mrb[0].mxu0 %vm32_vm1, %v11902_v48  ;;  %v11919_v35 = vmax.f32 %v1619_v34, %v1620_v53  ;;  %v1634_v22 = vrot.slane %v1633_v45, 1  ;;  %v1650_v19 = vsel %vm34_vm2, %v11866_v13, -inf  ;;  %v11931_v16 = vmax.f32 %v1626_v59, %v1627_v58  ;;  %v11973_v34 = vld [vmem:[#allocation2 + $0x70] sm:$0xff]  ;;  %v4012_v59 = vld [vmem:[#allocation2 + $0xa0] sm:$0xff] }
 0x255   :  { %9233 = vmatpush3.msk.msra.mxu0 %vm4087_vm0, %v9975_v40  ;;  %9211 = vmatprep.mubr.msk.f32.mxu0 %vm32_vm1, %v11904_v2  ;;  %v1641_v26 = vrot.slane %v1640_v56, 1  ;;  %v1651_v20 = vrot.slane %v1650_v19, 4  ;;  %v1657_v8 = vsel %vm34_vm2, %v663_v42, -inf  ;;  %v1647_v25 = vmax.f32 %v1645_v11, %v1646_v38 }
 0x256   :  { %9258 = vmatprep.subr.msk.mxu0 %vm4087_vm0, %v11911_v18  ;;  %v11941_v17 = vmax.f32 %v1633_v45, %v1634_v22  ;;  %v1658_v24 = vrot.slane %v1657_v8, 4  ;;  %v1664_v15 = vsel %vm34_vm2, %v11870_v23, -inf  ;;  %v1671_v13 = vsel %vm34_vm2, %v664_v4, -inf  ;;  %v11963_v4 = vld [vmem:[#allocation2 + $0x60] sm:$0xff] }
 0x257   :  { %v11945_v46 = vmax.f32 %v1640_v56, %v1641_v26  ;;  %v1652_v61 = vmax.f32 %v1650_v19, %v1651_v20  ;;  %v1665_v55 = vrot.slane %v1664_v15, 4  ;;  %v1648_v42 = vrot.slane %v1647_v25, 1 }
 0x258   :  { %9212 = vmatmul.mubr.msk.f32.gmra.mrb[2].mxu0 %vm32_vm1, %v11929_v9  ;;  %v1659_v6 = vmax.f32 %v1657_v8, %v1658_v24  ;;  %v1672_v14 = vrot.slane %v1671_v13, 4  ;;  %v1678_v41 = vsel %vm34_vm2, %v11879_v37, -inf  ;;  %v1685_v23 = vsel %vm34_vm2, %v680_v52, -inf }
 0x259   :  { %9214 = vmatprep.mubr.msk.f32.mxu0 %vm32_vm1, %v11937_v31  ;;  %v1653_v1 = vrot.slane %v1652_v61, 2  ;;  %v1666_v30 = vmax.f32 %v1664_v15, %v1665_v55  ;;  %v1679_v50 = vrot.slane %v1678_v41, 4  ;;  %v11965_v3 = vmax.f32 %v1647_v25, %v1648_v42  ;;  %v11986_v15 = vld [vmem:[#allocation2 + $0xc0] sm:$0xff] }
 0x25a   :  { %v1660_v39 = vrot.slane %v1659_v6, 2  ;;  %v1673_v47 = vmax.f32 %v1671_v13, %v1672_v14  ;;  %v1686_v21 = vrot.slane %v1685_v23, 4  ;;  %v1692_v0 = vsel %vm34_vm2, %v11884_v62, -inf  ;;  %v11982_v62 = vld [vmem:[#allocation2 + $0xb0] sm:$0xff] }
 0x25b   :  { %v1654_v7 = vmax.f32 %v1652_v61, %v1653_v1  ;;  %v1667_v49 = vrot.slane %v1666_v30, 2  ;;  %v1680_v57 = vmax.f32 %v1678_v41, %v1679_v50  ;;  %v1693_v52 = vrot.slane %v1692_v0, 4 }
 0x25c   :  { %9215 = vmatmul.mubr.msk.f32.gmra.mrb[4].mxu0 %vm32_vm1, %v11957_v60  ;;  %v1661_v28 = vmax.f32 %v1659_v6, %v1660_v39  ;;  %v1674_v37 = vrot.slane %v1673_v47, 2  ;;  %v1687_v63 = vmax.f32 %v1685_v23, %v1686_v21  ;;  %v1699_v51 = vsel %vm34_vm2, %v681_v12, -inf  ;;  %v11998_v39 = vld [vmem:[#allocation2 + $0xd0] sm:$0xff] }
 0x25d   :  { %9217 = vmatprep.mubr.msk.f32.mxu0 %vm32_vm1, %v11963_v4  ;;  %v1655_v36 = vrot.slane %v1654_v7, 1  ;;  %v1668_v43 = vmax.f32 %v1666_v30, %v1667_v49  ;;  %v1681_v5 = vrot.slane %v1680_v57, 2  ;;  %v1694_v11 = vmax.f32 %v1692_v0, %v1693_v52  ;;  %v12003_v49 = vld [vmem:[#allocation2 + $0xe0] sm:$0xff] }
 0x25e   :  { %v1662_v32 = vrot.slane %v1661_v28, 1  ;;  %v1675_v53 = vmax.f32 %v1673_v47, %v1674_v37  ;;  %v1688_v45 = vrot.slane %v1687_v63, 2  ;;  %v1700_v38 = vrot.slane %v1699_v51, 4 }
 0x25f   :  { %v1656_v58 = vmax.f32 %v1654_v7, %v1655_v36  ;;  %v1669_v56 = vrot.slane %v1668_v43, 1  ;;  %v1682_v22 = vmax.f32 %v1680_v57, %v1681_v5  ;;  %v1695_v20 = vrot.slane %v1694_v11, 2 }
 0x260   :  { %9218 = vmatmul.mubr.msk.f32.gmra.mrb[6].mxu0 %vm32_vm1, %v11973_v34  ;;  %v1663_v19 = vmax.f32 %v1661_v28, %v1662_v32  ;;  %v1676_v40 = vrot.slane %v1675_v53, 1  ;;  %v1689_v26 = vmax.f32 %v1687_v63, %v1688_v45  ;;  %v1701_v25 = vmax.f32 %v1699_v51, %v1700_v38  ;;  %v12028_v32 = vld [vmem:[#allocation2 + $0xf0] sm:$0xff] }
 0x261   :  { %9220 = vmatprep.mubr.msk.f32.mxu0 %vm32_vm1, %v4012_v59  ;;  %v1670_v12 = vmax.f32 %v1668_v43, %v1669_v56  ;;  %v1683_v8 = vrot.slane %v1682_v22, 1  ;;  %v1874_v24 = vsel %vm32_vm1, %v11906_v44, -inf  ;;  %v1696_v13 = vmax.f32 %v1694_v11, %v1695_v20  ;;  %v8554_v43 = vld [vmem:[%s13273_s0 + $0x1e8] sm:$0xff]  ;;  %v12032_v56 = vld [vmem:[#allocation2 + $0x100] sm:$0xff]  ;;  %v8556_v20 = vld [vmem:[%s13273_s0 + $0x1f8] sm:$0xff] }
 0x262   :  { %v1677_v61 = vmax.f32 %v1675_v53, %v1676_v40  ;;  %v1690_v55 = vrot.slane %v1689_v26, 1  ;;  %v1875_v42 = vsel %vm32_vm1, %v1656_v58, -inf  ;;  %v1702_v14 = vrot.slane %v1701_v25, 2 }
 0x263   :  { %v1684_v6 = vmax.f32 %v1682_v22, %v1683_v8  ;;  %v1876_v41 = vmax.f32 %v1874_v24, %v1875_v42  ;;  %v1877_v1 = vsel %vm32_vm1, %v11913_v29, -inf  ;;  %v1697_v50 = vrot.slane %v1696_v13, 1 }
 0x264   :  { %9221 = vmatmul.mubr.msk.f32.gmra.mrb[8].mxu0 %vm32_vm1, %v11982_v62  ;;  %v1691_v30 = vmax.f32 %v1689_v26, %v1690_v55  ;;  %v1878_v44 = vsel %vm32_vm1, %v1663_v19, -inf  ;;  %v1880_v23 = vsel %vm32_vm1, %v11915_v27, -inf  ;;  %v1703_v47 = vmax.f32 %v1701_v25, %v1702_v14  ;;  %v12048_v55 = vld [vmem:[#allocation2 + $0x110] sm:$0xff] }
 0x265   :  { %9223 = vmatprep.mubr.msk.f32.mxu0 %vm32_vm1, %v11986_v15  ;;  %v1879_v21 = vmax.f32 %v1877_v1, %v1878_v44  ;;  %v1881_v7 = vsel %vm32_vm1, %v1670_v12, -inf  ;;  %v1883_v29 = vsel %vm32_vm1, %v11919_v35, -inf  ;;  %v1698_v57 = vmax.f32 %v1696_v13, %v1697_v50  ;;  %v8553_v35 = vld [vmem:[%s13273_s0 + $0x1e0] sm:$0xff] }
 0x266   :  { %v1882_v0 = vmax.f32 %v1880_v23, %v1881_v7  ;;  %v1884_v28 = vsel %vm32_vm1, %v1677_v61, -inf  ;;  %v1886_v27 = vsel %vm32_vm1, %v11931_v16, -inf  ;;  %v1704_v37 = vrot.slane %v1703_v47, 1 }
 0x267   :  { %v1885_v63 = vmax.f32 %v1883_v29, %v1884_v28  ;;  %v1887_v52 = vsel %vm32_vm1, %v1684_v6, -inf  ;;  %v1889_v36 = vsel %vm32_vm1, %v11941_v17, -inf  ;;  %v1890_v16 = vsel %vm32_vm1, %v1691_v30, -inf  ;;  %v8555_v17 = vld [vmem:[%s13273_s0 + $0x1f0] sm:$0xff] }
 0x268   :  { %9224 = vmatmul.mubr.msk.f32.gmra.mrb[10].mxu0 %vm32_vm1, %v11998_v39  ;;  %v1888_v5 = vmax.f32 %v1886_v27, %v1887_v52  ;;  %v1892_v51 = vsel %vm32_vm1, %v11945_v46, -inf  ;;  %v1893_v59 = vsel %vm32_vm1, %v1698_v57, -inf  ;;  %v1705_v53 = vmax.f32 %v1703_v47, %v1704_v37  ;;  %v12075_v27 = vld [vmem:[#allocation2 + $0x12] sm:$0xff] }
 0x269   :  { %9226 = vmatprep.mubr.msk.f32.mxu0 %vm32_vm1, %v12003_v49  ;;  %v1891_v45 = vmax.f32 %v1889_v36, %v1890_v16  ;;  %v1894_v11 = vmax.f32 %v1892_v51, %v1893_v59  ;;  %v1895_v58 = vsel %vm32_vm1, %v11965_v3, -inf  ;;  %v2018_v46 = vsel %vm1962_vm3, %v1879_v21, %v1876_v41  ;;  %v4432_v41 = vld [vmem:[#allocation2 + $0x2] sm:$0xff]  ;;  %v12090_v51 = vld [vmem:[%s13272_s1 + $0x10] sm:$0xf] }
 0x26a   :  { %v2583_v22 = vcombine.high %v8553_v35, %v8553_v35  ;;  %v2590_v38 = vrot.slane %v8553_v35, %v10206_v33  ;;  %v2600_v19 = vcombine.high %v8554_v43, %v8554_v43  ;;  %v1896_v40 = vsel %vm32_vm1, %v1705_v53, -inf  ;;  %v12082_v35 = vld [vmem:[#allocation2 + $0x22] sm:$0xff] }
 0x26b   :  { %v2019_v26 = vsel %vm1964_vm4, %v1882_v0, %v2018_v46  ;;  %v2607_v12 = vrot.slane %v8554_v43, %v10206_v33  ;;  %v2617_v8 = vcombine.high %v8555_v17, %v8555_v17  ;;  %v1897_v3 = vmax.f32 %v1895_v58, %v1896_v40 }
 0x26c   :  { %9227 = vmatmul.mubr.msk.f32.gmra.mrb[12].mxu0 %vm32_vm1, %v12028_v32  ;;  %v2020_v25 = vsel %vm1966_vm5, %v1885_v63, %v2019_v26  ;;  %v2597_v24 = vrot.slane %v2583_v22, %v10206_v33  ;;  %v2598_v61 = vcombine.high %v2590_v38, %v2590_v38  ;;  %v2614_v42 = vrot.slane %v2600_v19, %v10206_v33 }
 0x26d   :  { %9229 = vmatprep.mubr.msk.f32.mxu0 %vm32_vm1, %v12032_v56  ;;  %v2021_v13 = vsel %vm1968_vm6, %v1888_v5, %v2020_v25  ;;  %v2615_v6 = vcombine.high %v2607_v12, %v2607_v12  ;;  %v12053_v14 = vrot.slane %v8555_v17, %v10206_v33  ;;  %v12057_v50 = vrot.slane %v2617_v8, %v10206_v33 }
 0x26e   :  { %v2022_v1 = vsel %vm1970_vm7, %v1891_v45, %v2021_v13  ;;  %v2599_v30 = vcombine.high %v2597_v24, %v2597_v24  ;;  %v2634_v44 = vcombine.high %v8556_v20, %v8556_v20  ;;  %v2616_v47 = vcombine.high %v2614_v42, %v2614_v42 }
 0x26f   :  { %v2023_v23 = vsel %vm1972_vm8, %v1894_v11, %v2022_v1  ;;  %v2632_v21 = vcombine.high %v12053_v14, %v12053_v14  ;;  %v12063_v7 = vrot.slane %v8556_v20, %v10206_v33  ;;  %v2633_v57 = vcombine.high %v12057_v50, %v12057_v50 }
 0x270   :  { %9230 = vmatmul.mubr.msk.f32.gmra.mrb[14].mxu0 %vm32_vm1, %v12048_v55  ;;  %v2024_v29 = vsel %vm1974_vm9, %v1897_v3, %v2023_v23  ;;  %v12071_v0 = vrot.slane %v2634_v44, %v10206_v33  ;;  %v3563_v28 = vsel %vm34_vm2, %v2590_v38, -inf  ;;  %v3570_v52 = vsel %vm34_vm2, %v2598_v61, -inf  ;;  %v12100_v38 = vld [vmem:[#allocation2 + $0x32] sm:$0xff] }
 0x271   :  { %9234 = vmatprep.mubr.msk.f32.mxu0 %vm32_vm1, %v4432_v41  ;;  %2041 = vst.msk [vmem:[#allocation2 + $0x81] sm:$0xff] %vm32_vm1, %v2024_v29  ;;  %v2649_v37 = vcombine.high %v12063_v7, %v12063_v7  ;;  %v3564_v63 = vrot.slane %v3563_v28, 4  ;;  %v3577_v36 = vsel %vm34_vm2, %v2597_v24, -inf  ;;  %v3571_v43 = vrot.slane %v3570_v52, 4  ;;  %v12112_v44 = vld [vmem:[#allocation2 + $0x52] sm:$0xff] }
 0x272   :  { %v2650_v33 = vcombine.high %v12071_v0, %v12071_v0  ;;  %v3578_v5 = vrot.slane %v3577_v36, 4  ;;  %v3584_v16 = vsel %vm34_vm2, %v2599_v30, -inf  ;;  %v3591_v53 = vsel %vm34_vm2, %v2607_v12, -inf  ;;  %v12104_v12 = vld [vmem:[#allocation2 + $0x42] sm:$0xff] }
 0x273   :  { %v3565_v59 = vmax.f32 %v3563_v28, %v3564_v63  ;;  %v3585_v17 = vrot.slane %v3584_v16, 4  ;;  %v3598_v45 = vsel %vm34_vm2, %v2615_v6, -inf  ;;  %v3572_v11 = vmax.f32 %v3570_v52, %v3571_v43  ;;  %v12114_v63 = vld [vmem:[#allocation2 + $0x62] sm:$0xff] }
 0x274   :  { %9235 = vmatmul.mubr.msk.f32.vlgmr.msra.gmra.mrb[0].mxu0 %vm32_vm1, %v12075_v27  ;;  %v3579_v58 = vmax.f32 %v3577_v36, %v3578_v5  ;;  %v3592_v46 = vrot.slane %v3591_v53, 4  ;;  %v3599_v22 = vrot.slane %v3598_v45, 4  ;;  %v3605_v26 = vsel %vm34_vm2, %v2614_v42, -inf }
 0x275   :  { %9259 = vmatpush3.msk.msra.mxu0 %vm4087_vm0, %v11911_v18  ;;  %9237 = vmatprep.mubr.msk.f32.mxu0 %vm32_vm1, %v12082_v35  ;;  %v3566_v19 = vrot.slane %v3565_v59, 2  ;;  %v3586_v40 = vmax.f32 %v3584_v16, %v3585_v17  ;;  %v3612_v20 = vsel %vm34_vm2, %v2616_v47, -inf  ;;  %v3573_v8 = vrot.slane %v3572_v11, 2 }
 0x276   :  { %9284 = vmatprep.subr.msk.mxu0 %vm4087_vm0, %v12090_v51  ;;  %v3580_v3 = vrot.slane %v3579_v58, 2  ;;  %v3593_v25 = vmax.f32 %v3591_v53, %v3592_v46  ;;  %v3600_v18 = vmax.f32 %v3598_v45, %v3599_v22  ;;  %v3606_v13 = vrot.slane %v3605_v26, 4  ;;  %v12126_v22 = vld [vmem:[#allocation2 + $0x72] sm:$0xff] }
 0x277   :  { %v3567_v24 = vmax.f32 %v3565_v59, %v3566_v19  ;;  %v3587_v61 = vrot.slane %v3586_v40, 2  ;;  %v3613_v6 = vrot.slane %v3612_v20, 4  ;;  %v3574_v41 = vmax.f32 %v3572_v11, %v3573_v8  ;;  %v4440_v8 = vld [vmem:[#allocation2 + $0xa2] sm:$0xff] }
 0x278   :  { %9238 = vmatmul.mubr.msk.f32.gmra.mrb[2].mxu0 %vm32_vm1, %v12100_v38  ;;  %v3581_v42 = vmax.f32 %v3579_v58, %v3580_v3  ;;  %v3594_v1 = vrot.slane %v3593_v25, 2  ;;  %v3601_v30 = vrot.slane %v3600_v18, 2  ;;  %v3607_v29 = vmax.f32 %v3605_v26, %v3606_v13 }
 0x279   :  { %9240 = vmatprep.mubr.msk.f32.mxu0 %vm32_vm1, %v12104_v12  ;;  %v3568_v23 = vrot.slane %v3567_v24, 1  ;;  %v3588_v47 = vmax.f32 %v3586_v40, %v3587_v61  ;;  %v3614_v28 = vmax.f32 %v3612_v20, %v3613_v6  ;;  %v3575_v52 = vrot.slane %v3574_v41, 1 }
 0x27a   :  { %v3582_v36 = vrot.slane %v3581_v42, 1  ;;  %v3595_v43 = vmax.f32 %v3593_v25, %v3594_v1  ;;  %v3602_v5 = vmax.f32 %v3600_v18, %v3601_v30  ;;  %v3608_v17 = vrot.slane %v3607_v29, 2 }
 0x27b   :  { %v12116_v16 = vmax.f32 %v3567_v24, %v3568_v23  ;;  %v3589_v59 = vrot.slane %v3588_v47, 1  ;;  %v3615_v53 = vrot.slane %v3614_v28, 2  ;;  %v12120_v45 = vmax.f32 %v3574_v41, %v3575_v52  ;;  %v12157_v52 = vld [vmem:[#allocation2 + $0xc2] sm:$0xff] }
 0x27c   :  { %9241 = vmatmul.mubr.msk.f32.gmra.mrb[4].mxu0 %vm32_vm1, %v12112_v44  ;;  %v12122_v11 = vmax.f32 %v3581_v42, %v3582_v36  ;;  %v3596_v58 = vrot.slane %v3595_v43, 1  ;;  %v3603_v46 = vrot.slane %v3602_v5, 1  ;;  %v3609_v40 = vmax.f32 %v3607_v29, %v3608_v17 }
 0x27d   :  { %9243 = vmatprep.mubr.msk.f32.mxu0 %vm32_vm1, %v12114_v63  ;;  %v12128_v19 = vmax.f32 %v3588_v47, %v3589_v59  ;;  %v3616_v26 = vmax.f32 %v3614_v28, %v3615_v53  ;;  %v3619_v20 = vsel %vm34_vm2, %v12053_v14, -inf  ;;  %v3626_v24 = vsel %vm34_vm2, %v2632_v21, -inf  ;;  %v12151_v21 = vld [vmem:[#allocation2 + $0xb2] sm:$0xff] }
 0x27e   :  { %v12132_v3 = vmax.f32 %v3595_v43, %v3596_v58  ;;  %v12134_v25 = vmax.f32 %v3602_v5, %v3603_v46  ;;  %v3620_v18 = vrot.slane %v3619_v20, 4  ;;  %v3610_v61 = vrot.slane %v3609_v40, 1 }
 0x27f   :  { %v3617_v13 = vrot.slane %v3616_v26, 1  ;;  %v3627_v6 = vrot.slane %v3626_v24, 4  ;;  %v3633_v41 = vsel %vm34_vm2, %v12057_v50, -inf  ;;  %v3640_v30 = vsel %vm34_vm2, %v2633_v57, -inf }
 0x280   :  { %9244 = vmatmul.mubr.msk.f32.gmra.mrb[6].mxu0 %vm32_vm1, %v12126_v22  ;;  %v3621_v42 = vmax.f32 %v3619_v20, %v3620_v18  ;;  %v3634_v1 = vrot.slane %v3633_v41, 4  ;;  %v3647_v14 = vsel %vm34_vm2, %v12063_v7, -inf  ;;  %v12153_v23 = vmax.f32 %v3609_v40, %v3610_v61  ;;  %v12169_v20 = vld [vmem:[#allocation2 + $0xd2] sm:$0xff] }
 0x281   :  { %9246 = vmatprep.mubr.msk.f32.mxu0 %vm32_vm1, %v4440_v8  ;;  %v12155_v47 = vmax.f32 %v3616_v26, %v3617_v13  ;;  %v3628_v29 = vmax.f32 %v3626_v24, %v3627_v6  ;;  %v3641_v28 = vrot.slane %v3640_v30, 4  ;;  %v3648_v50 = vrot.slane %v3647_v14, 4  ;;  %v12175_v24 = vld [vmem:[#allocation2 + $0xe2] sm:$0xff] }
 0x282   :  { %v3622_v36 = vrot.slane %v3621_v42, 2  ;;  %v3635_v43 = vmax.f32 %v3633_v41, %v3634_v1  ;;  %v3654_v57 = vsel %vm34_vm2, %v2649_v37, -inf  ;;  %v3661_v53 = vsel %vm34_vm2, %v12071_v0, -inf  ;;  %v12181_v0 = vld [vmem:[#allocation2 + $0xf2] sm:$0xff] }
 0x283   :  { %v3629_v5 = vrot.slane %v3628_v29, 2  ;;  %v3642_v59 = vmax.f32 %v3640_v30, %v3641_v28  ;;  %v3655_v17 = vrot.slane %v3654_v57, 4  ;;  %v3649_v40 = vmax.f32 %v3647_v14, %v3648_v50 }
 0x284   :  { %9247 = vmatmul.mubr.msk.f32.gmra.mrb[8].mxu0 %vm32_vm1, %v12151_v21  ;;  %v3623_v58 = vmax.f32 %v3621_v42, %v3622_v36  ;;  %v3636_v46 = vrot.slane %v3635_v43, 2  ;;  %v3662_v26 = vrot.slane %v3661_v53, 4  ;;  %v3668_v18 = vsel %vm34_vm2, %v2650_v33, -inf }
 0x285   :  { %9249 = vmatprep.mubr.msk.f32.mxu0 %vm32_vm1, %v12157_v52  ;;  %v3630_v7 = vmax.f32 %v3628_v29, %v3629_v5  ;;  %v3643_v37 = vrot.slane %v3642_v59, 2  ;;  %v3656_v8 = vmax.f32 %v3654_v57, %v3655_v17  ;;  %v3650_v6 = vrot.slane %v3649_v40, 2  ;;  %v12183_v17 = vld [vmem:[#allocation2 + $0x102] sm:$0xff] }
 0x286   :  { %v3624_v61 = vrot.slane %v3623_v58, 1  ;;  %v3637_v13 = vmax.f32 %v3635_v43, %v3636_v46  ;;  %v3663_v41 = vmax.f32 %v3661_v53, %v3662_v26  ;;  %v3669_v14 = vrot.slane %v3668_v18, 4 }
 0x287   :  { %v3631_v42 = vrot.slane %v3630_v7, 1  ;;  %v3644_v1 = vmax.f32 %v3642_v59, %v3643_v37  ;;  %v3657_v30 = vrot.slane %v3656_v8, 2  ;;  %v3651_v36 = vmax.f32 %v3649_v40, %v3650_v6 }
 0x288   :  { %9250 = vmatmul.mubr.msk.f32.gmra.mrb[10].mxu0 %vm32_vm1, %v12169_v20  ;;  %v3625_v29 = vmax.f32 %v3623_v58, %v3624_v61  ;;  %v3638_v28 = vrot.slane %v3637_v13, 1  ;;  %v3664_v50 = vrot.slane %v3663_v41, 2  ;;  %v3670_v5 = vmax.f32 %v3668_v18, %v3669_v14 }
 0x289   :  { %9252 = vmatprep.mubr.msk.f32.mxu0 %vm32_vm1, %v12175_v24  ;;  %v3632_v33 = vmax.f32 %v3630_v7, %v3631_v42  ;;  %v3645_v43 = vrot.slane %v3644_v1, 1  ;;  %v3658_v57 = vmax.f32 %v3656_v8, %v3657_v30  ;;  %v3652_v53 = vrot.slane %v3651_v36, 1 }
 0x28a   :  { %v3639_v59 = vmax.f32 %v3637_v13, %v3638_v28  ;;  %v3665_v46 = vmax.f32 %v3663_v41, %v3664_v50  ;;  %v3843_v58 = vsel %vm32_vm1, %v12116_v16, -inf  ;;  %v3671_v37 = vrot.slane %v3670_v5, 2  ;;  %v12194_v13 = vld [vmem:[#allocation2 + $0x112] sm:$0xff] }
 0x28b   :  { %v3646_v26 = vmax.f32 %v3644_v1, %v3645_v43  ;;  %v3659_v40 = vrot.slane %v3658_v57, 1  ;;  %v3844_v61 = vsel %vm32_vm1, %v3625_v29, -inf  ;;  %v3653_v7 = vmax.f32 %v3651_v36, %v3652_v53 }
 0x28c   :  { %9253 = vmatmul.mubr.msk.f32.gmra.mrb[12].mxu0 %vm32_vm1, %v12181_v0  ;;  %v3666_v6 = vrot.slane %v3665_v46, 1  ;;  %v3845_v8 = vmax.f32 %v3843_v58, %v3844_v61  ;;  %v3846_v18 = vsel %vm32_vm1, %v12120_v45, -inf  ;;  %v3672_v41 = vmax.f32 %v3670_v5, %v3671_v37 }
 0x28d   :  { %9255 = vmatprep.mubr.msk.f32.mxu0 %vm32_vm1, %v12183_v17  ;;  %v3660_v16 = vmax.f32 %v3658_v57, %v3659_v40  ;;  %v3847_v42 = vsel %vm32_vm1, %v3632_v33, -inf  ;;  %v3849_v1 = vsel %vm32_vm1, %v12122_v11, -inf  ;;  %v3850_v29 = vsel %vm32_vm1, %v3639_v59, -inf }
 0x28e   :  { %v3667_v30 = vmax.f32 %v3665_v46, %v3666_v6  ;;  %v3848_v14 = vmax.f32 %v3846_v18, %v3847_v42  ;;  %v3852_v28 = vsel %vm32_vm1, %v12128_v19, -inf  ;;  %v3673_v45 = vrot.slane %v3672_v41, 1  ;;  %v8664_v42 = vld [vmem:[%s13272_s1 + $0x18] sm:$0xf] }
 0x28f   :  { %v3851_v36 = vmax.f32 %v3849_v1, %v3850_v29  ;;  %v3853_v50 = vsel %vm32_vm1, %v3646_v26, -inf  ;;  %v3855_v43 = vsel %vm32_vm1, %v12132_v3, -inf  ;;  %v3856_v11 = vsel %vm32_vm1, %v3653_v7, -inf  ;;  %v12280_v1 = vld [vmem:[#allocation2 + $0x41] sm:$0xff]  ;;  %v12291_v29 = vld [vmem:[#allocation2 + $0x71] sm:$0xff] }
 0x290   :  { %9256 = vmatmul.mubr.msk.f32.gmra.mrb[14].mxu0 %vm32_vm1, %v12194_v13  ;;  %v3854_v33 = vmax.f32 %v3852_v28, %v3853_v50  ;;  %v3858_v57 = vsel %vm32_vm1, %v12134_v25, -inf  ;;  %v3859_v5 = vsel %vm32_vm1, %v3660_v16, -inf  ;;  %v3674_v19 = vmax.f32 %v3672_v41, %v3673_v45  ;;  %v12268_v16 = vld [vmem:[#allocation2 + $0x21] sm:$0xff]  ;;  %v12270_v41 = vld [vmem:[#allocation2 + $0x31] sm:$0xff] }
 0x291   :  { %9260 = vmatprep.mubr.msk.f32.mxu0 %vm32_vm1, %v11902_v48  ;;  %v3857_v59 = vmax.f32 %v3855_v43, %v3856_v11  ;;  %v3861_v53 = vsel %vm32_vm1, %v12153_v23, -inf  ;;  %v3860_v3 = vmax.f32 %v3858_v57, %v3859_v5  ;;  %v3862_v46 = vsel %vm32_vm1, %v3667_v30, -inf  ;;  %v8646_v48 = vld [vmem:[%s13272_s1 + $0x14] sm:$0xf]  ;;  %v12297_v28 = vld [vmem:[#allocation2 + $0x81] sm:$0xff] }
 0x292   :  { %v3864_v58 = vsel %vm32_vm1, %v12155_v47, -inf  ;;  %v3980_v26 = vsel %vm1962_vm3, %v3848_v14, %v3845_v8  ;;  %v3863_v40 = vmax.f32 %v3861_v53, %v3862_v46  ;;  %v3865_v25 = vsel %vm32_vm1, %v3674_v19, -inf  ;;  %v12282_v30 = vld [vmem:[#allocation2 + $0x51] sm:$0xff]  ;;  %v12289_v14 = vld [vmem:[#allocation2 + $0x61] sm:$0xff]  ;;  %v8682_v5 = vld [vmem:[%s13272_s1 + $0x1c] sm:$0xf] }
 0x293   :  { %v3981_v37 = vsel %vm1964_vm4, %v3851_v36, %v3980_v26  ;;  %v3866_v23 = vmax.f32 %v3864_v58, %v3865_v25  ;;  %v4900_v45 = vld [vmem:[#allocation2 + $0xb1] sm:$0xff]  ;;  %v12302_v36 = vld [vmem:[#allocation2 + $0xc1] sm:$0xff]  ;;  %vm6066_vm10 = vcmask 64512   ;;  %vm6241_vm11 = vcmask 58368  }
 0x294   :  { %9261 = vmatmul.mubr.msk.f32.vlgmr.msra.gmra.mrb[0].mxu0 %vm32_vm1, %v11904_v2  ;;  %v3982_v61 = vsel %vm1966_vm5, %v3854_v33, %v3981_v37  ;;  %v12304_v50 = vld [vmem:[#allocation2 + $0xd1] sm:$0xff]  ;;  %v12310_v43 = vld [vmem:[#allocation2 + $0xe1] sm:$0xff] }
 0x295   :  { %9285 = vmatpush3.msk.msra.mxu0 %vm4087_vm0, %v12090_v51  ;;  %9263 = vmatprep.mubr.msk.f32.mxu0 %vm32_vm1, %v11929_v9  ;;  %v3983_v47 = vsel %vm1968_vm6, %v3857_v59, %v3982_v61  ;;  %v12245_v51 = vld [vmem:[#allocation2 + $0x80] sm:$0xff]  ;;  %v12312_v33 = vld [vmem:[#allocation2 + $0xf1] sm:$0xff]  ;;  %v8720_v25 = vld [vmem:[%s13275_s5 + $0x8] sm:$0xff] }
 0x296   :  { %v3984_v7 = vsel %vm1970_vm7, %v3860_v3, %v3983_v47  ;;  %9310 = vmatprep.subr.msk.mxu0 %vm4087_vm0, %v8646_v48  ;;  %v4905_v11 = vld [vmem:[#allocation2 + $0x101] sm:$0xff]  ;;  %9414 = vmatprep.subr.mxu1 %v8720_v25 }
 0x297   :  { %v3985_v6 = vsel %vm1972_vm8, %v3863_v40, %v3984_v7  ;;  %v12551_v37 = vld [vmem:[%s13275_s5] sm:$0xff]  ;;  %9415 = vmatpush3.msra.mxu1 %v8720_v25 }
 0x298   :  { %9264 = vmatmul.mubr.msk.f32.gmra.mrb[2].mxu0 %vm32_vm1, %v11937_v31  ;;  %v3986_v8 = vsel %vm1974_vm9, %v3866_v23, %v3985_v6  ;;  %9440 = vmatprep.subr.mxu1 %v12551_v37 }
 0x299   :  { %9266 = vmatprep.mubr.msk.f32.mxu0 %vm32_vm1, %v11957_v60  ;;  %4003 = vst.msk [vmem:[#allocation2 + $0x121] sm:$0xff] %vm32_vm1, %v3986_v8 }
 0x29c   :  { %9267 = vmatmul.mubr.msk.f32.gmra.mrb[4].mxu0 %vm32_vm1, %v11963_v4 }
 0x29d   :  { %9269 = vmatprep.mubr.msk.f32.mxu0 %vm32_vm1, %v11973_v34 }
 0x2a0   :  { %9270 = vmatmul.mubr.msk.f32.gmra.mrb[6].mxu0 %vm32_vm1, %v12245_v51  ;;  %v12263_v18 = vld [vmem:[#allocation2 + $0x120] sm:$0xff] }
 0x2a1   :  { %9272 = vmatprep.mubr.msk.f32.mxu0 %vm32_vm1, %v11982_v62  ;;  %v4892_v62 = vld [vmem:[#allocation2 + $0x11] sm:$0xff]  ;;  %v4907_v57 = vld [vmem:[#allocation2 + $0x121] sm:$0xff] }
 0x2a4   :  { %9273 = vmatmul.mubr.msk.f32.gmra.mrb[8].mxu0 %vm32_vm1, %v11986_v15 }
 0x2a5   :  { %9275 = vmatprep.mubr.msk.f32.mxu0 %vm32_vm1, %v11998_v39 }
 0x2a8   :  { %9276 = vmatmul.mubr.msk.f32.gmra.mrb[10].mxu0 %vm32_vm1, %v12003_v49 }
 0x2a9   :  { %9278 = vmatprep.mubr.msk.f32.mxu0 %vm32_vm1, %v12028_v32 }
 0x2ac   :  { %9279 = vmatmul.mubr.msk.f32.gmra.mrb[12].mxu0 %vm32_vm1, %v12032_v56 }
 0x2ad   :  { %9281 = vmatprep.mubr.msk.f32.mxu0 %vm32_vm1, %v12048_v55 }
 0x2b0   :  { %9282 = vmatmul.mubr.msk.f32.gmra.mrb[14].mxu0 %vm32_vm1, %v12263_v18 }
 0x2b1   :  { %9286 = vmatprep.mubr.msk.f32.mxu0 %vm32_vm1, %v4892_v62 }
 0x2b4   :  { %9287 = vmatmul.mubr.msk.f32.vlgmr.msra.gmra.mrb[0].mxu0 %vm32_vm1, %v12268_v16 }
 0x2b5   :  { %9311 = vmatpush3.msk.msra.mxu0 %vm4087_vm0, %v8646_v48  ;;  %9289 = vmatprep.mubr.msk.f32.mxu0 %vm32_vm1, %v12270_v41 }
 0x2b6   :  { %9336 = vmatprep.subr.msk.mxu0 %vm4087_vm0, %v8664_v42 }
 0x2b8   :  { %9290 = vmatmul.mubr.msk.f32.gmra.mrb[2].mxu0 %vm32_vm1, %v12280_v1 }
 0x2b9   :  { %9292 = vmatprep.mubr.msk.f32.mxu0 %vm32_vm1, %v12282_v30 }
 0x2bc   :  { %9293 = vmatmul.mubr.msk.f32.gmra.mrb[4].mxu0 %vm32_vm1, %v12289_v14 }
 0x2bd   :  { %9295 = vmatprep.mubr.msk.f32.mxu0 %vm32_vm1, %v12291_v29 }
 0x2c0   :  { %9296 = vmatmul.mubr.msk.f32.gmra.mrb[6].mxu0 %vm32_vm1, %v12297_v28 }
 0x2c1   :  { %9298 = vmatprep.mubr.msk.f32.mxu0 %vm32_vm1, %v4900_v45 }
 0x2c4   :  { %9299 = vmatmul.mubr.msk.f32.gmra.mrb[8].mxu0 %vm32_vm1, %v12302_v36 }
 0x2c5   :  { %9301 = vmatprep.mubr.msk.f32.mxu0 %vm32_vm1, %v12304_v50 }
 0x2c8   :  { %9302 = vmatmul.mubr.msk.f32.gmra.mrb[10].mxu0 %vm32_vm1, %v12310_v43 }
 0x2c9   :  { %9304 = vmatprep.mubr.msk.f32.mxu0 %vm32_vm1, %v12312_v33 }
 0x2cc   :  { %9305 = vmatmul.mubr.msk.f32.gmra.mrb[12].mxu0 %vm32_vm1, %v4905_v11 }
 0x2cd   :  { %9307 = vmatprep.mubr.msk.f32.mxu0 %vm32_vm1, %v11897_v54  ;;  %v12341_v54 = vld [vmem:[#allocation2 + $0x82] sm:$0xff] }
 0x2d0   :  { %9308 = vmatmul.mubr.msk.f32.gmra.mrb[14].mxu0 %vm32_vm1, %v4907_v57 }
 0x2d1   :  { %9312 = vmatprep.mubr.msk.f32.mxu0 %vm32_vm1, %v12075_v27  ;;  %v12359_v27 = vld [vmem:[#allocation2 + $0x122] sm:$0xff] }
 0x2d4   :  { %9313 = vmatmul.mubr.msk.f32.vlgmr.msra.gmra.mrb[0].mxu0 %vm32_vm1, %v12082_v35  ;;  %v8700_v35 = vld [vmem:[%s13272_s1 + $0x20] sm:$0xf] }
 0x2d5   :  { %9337 = vmatpush3.msk.msra.mxu0 %vm4087_vm0, %v8664_v42  ;;  %9315 = vmatprep.mubr.msk.f32.mxu0 %vm32_vm1, %v12100_v38  ;;  %v5821_v38 = vld [vmem:[#allocation2 + $0xc2] sm:$0xff] }
 0x2d6   :  { %9362 = vmatprep.subr.msk.mxu0 %vm4087_vm0, %v8682_v5 }
 0x2d8   :  { %9316 = vmatmul.mubr.msk.f32.gmra.mrb[2].mxu0 %vm32_vm1, %v12104_v12  ;;  %v5822_v12 = vld [vmem:[#allocation2 + $0xd2] sm:$0xff] }
 0x2d9   :  { %9318 = vmatprep.mubr.msk.f32.mxu0 %vm32_vm1, %v12112_v44  ;;  %v5823_v44 = vld [vmem:[#allocation2 + $0xe2] sm:$0xff] }
 0x2dc   :  { %9319 = vmatmul.mubr.msk.f32.gmra.mrb[4].mxu0 %vm32_vm1, %v12114_v63  ;;  %v5824_v63 = vld [vmem:[#allocation2 + $0xf2] sm:$0xff] }
 0x2dd   :  { %9321 = vmatprep.mubr.msk.f32.mxu0 %vm32_vm1, %v12126_v22  ;;  %v5825_v22 = vld [vmem:[#allocation2 + $0x102] sm:$0xff] }
 0x2e0   :  { %9322 = vmatmul.mubr.msk.f32.gmra.mrb[6].mxu0 %vm32_vm1, %v12341_v54 }
 0x2e1   :  { %9324 = vmatprep.mubr.msk.f32.mxu0 %vm32_vm1, %v12151_v21  ;;  %v5826_v21 = vld [vmem:[#allocation2 + $0x112] sm:$0xff] }
 0x2e4   :  { %9325 = vmatmul.mubr.msk.f32.gmra.mrb[8].mxu0 %vm32_vm1, %v12157_v52  ;;  %v5828_v52 = vld [vmem:[#allocation2 + $0x132] sm:$0xff] }
 0x2e5   :  { %9327 = vmatprep.mubr.msk.f32.mxu0 %vm32_vm1, %v12169_v20  ;;  %v13291_v20 = vmov 0.0  }
 0x2e6   :  { %6240 = vst.msk [vmem:[#allocation3] sm:$0xff] %vm6066_vm10, %v13291_v20  ;;  %6243 = vst.msk [vmem:[#allocation3 + $0x10] sm:$0xff] %vm6066_vm10, %v13291_v20 }
 0x2e7   :  { %6245 = vst.msk [vmem:[#allocation3 + $0x20] sm:$0xff] %vm6066_vm10, %v13291_v20  ;;  %6247 = vst.msk [vmem:[#allocation3 + $0x30] sm:$0xff] %vm6066_vm10, %v13291_v20 }
 0x2e8   :  { %9328 = vmatmul.mubr.msk.f32.gmra.mrb[10].mxu0 %vm32_vm1, %v12175_v24  ;;  %6249 = vst.msk [vmem:[#allocation3 + $0x40] sm:$0xff] %vm6066_vm10, %v13291_v20  ;;  %6251 = vst.msk [vmem:[#allocation3 + $0x50] sm:$0xff] %vm6066_vm10, %v13291_v20  ;;  %v12487_v24 = vld [vmem:[%s13274_s2] ss:$0 sm:$0xff] }
 0x2e9   :  { %9330 = vmatprep.mubr.msk.f32.mxu0 %vm32_vm1, %v12181_v0  ;;  %6253 = vst.msk [vmem:[#allocation3 + $0x60] sm:$0xff] %vm6066_vm10, %v13291_v20  ;;  %6255 = vst.msk [vmem:[#allocation3 + $0x70] sm:$0xff] %vm6066_vm10, %v13291_v20 }
 0x2ea   :  { %6257 = vst.msk [vmem:[#allocation3 + $0x80] sm:$0xff] %vm6066_vm10, %v13291_v20  ;;  %6259 = vst.msk [vmem:[#allocation3 + $0x90] sm:$0xff] %vm6066_vm10, %v13291_v20 }
 0x2eb   :  { %6261 = vst.msk [vmem:[#allocation3 + $0xa0] sm:$0xff] %vm6066_vm10, %v13291_v20  ;;  %6263 = vst.msk [vmem:[#allocation3 + $0xb0] sm:$0xff] %vm6066_vm10, %v13291_v20 }
 0x2ec   :  { %9331 = vmatmul.mubr.msk.f32.gmra.mrb[12].mxu0 %vm32_vm1, %v12183_v17  ;;  %6265 = vst.msk [vmem:[#allocation3 + $0xc0] sm:$0xff] %vm6066_vm10, %v13291_v20  ;;  %6267 = vst.msk [vmem:[#allocation3 + $0xd0] sm:$0xff] %vm6066_vm10, %v13291_v20 }
 0x2ed   :  { %9333 = vmatprep.mubr.msk.f32.mxu0 %vm32_vm1, %v12194_v13  ;;  %6269 = vst.msk [vmem:[#allocation3 + $0xe0] sm:$0xff] %vm6066_vm10, %v13291_v20  ;;  %6271 = vst.msk [vmem:[#allocation3 + $0xf0] sm:$0xff] %vm6066_vm10, %v13291_v20 }
 0x2ee   :  { %6273 = vst.msk [vmem:[#allocation3 + $0x100] sm:$0xff] %vm6066_vm10, %v13291_v20  ;;  %6275 = vst.msk [vmem:[#allocation3 + $0x110] sm:$0xff] %vm6066_vm10, %v13291_v20 }
 0x2ef   :  { %6277 = vst.msk [vmem:[#allocation3 + $0x120] sm:$0xff] %vm6066_vm10, %v13291_v20  ;;  %6279 = vst.msk [vmem:[#allocation3 + $0x130] sm:$0xff] %vm6066_vm10, %v13291_v20 }
 0x2f0   :  { %9334 = vmatmul.mubr.msk.f32.gmra.mrb[14].mxu0 %vm32_vm1, %v12359_v27  ;;  %6266 = vst.msk [vmem:[#allocation3 + $0xc8] sm:$0x3] %vm6241_vm11, %v13291_v20  ;;  %6268 = vst.msk [vmem:[#allocation3 + $0xd8] sm:$0x3] %vm6241_vm11, %v13291_v20 }
 0x2f1   :  { %9338 = vmatprep.mubr.msk.f32.mxu0 %vm32_vm1, %v11904_v2  ;;  %v5360_v2 = vld [vmem:[#allocation2 + $0x90] sm:$0xff]  ;;  %6270 = vst.msk [vmem:[#allocation3 + $0xe8] sm:$0x3] %vm6241_vm11, %v13291_v20  ;;  %6272 = vst.msk [vmem:[#allocation3 + $0xf8] sm:$0x3] %vm6241_vm11, %v13291_v20 }
 0x2f2   :  { %6274 = vst.msk [vmem:[#allocation3 + $0x108] sm:$0x3] %vm6241_vm11, %v13291_v20  ;;  %6276 = vst.msk [vmem:[#allocation3 + $0x118] sm:$0x3] %vm6241_vm11, %v13291_v20 }
 0x2f3   :  { %6278 = vst.msk [vmem:[#allocation3 + $0x128] sm:$0x3] %vm6241_vm11, %v13291_v20  ;;  %6242 = vst.msk [vmem:[#allocation3 + $0x8] sm:$0x3] %vm6241_vm11, %v13291_v20 }
 0x2f4   :  { %9339 = vmatmul.mubr.msk.f32.vlgmr.msra.gmra.mrb[0].mxu0 %vm32_vm1, %v11929_v9  ;;  %v5368_v9 = vld [vmem:[#allocation2 + $0x130] sm:$0xff]  ;;  %6244 = vst.msk [vmem:[#allocation3 + $0x18] sm:$0x3] %vm6241_vm11, %v13291_v20  ;;  %6246 = vst.msk [vmem:[#allocation3 + $0x28] sm:$0x3] %vm6241_vm11, %v13291_v20 }
 0x2f5   :  { %9363 = vmatpush3.msk.msra.mxu0 %vm4087_vm0, %v8682_v5  ;;  %9341 = vmatprep.mubr.msk.f32.mxu0 %vm32_vm1, %v11937_v31  ;;  %v5590_v31 = vld [vmem:[#allocation2 + $0x91] sm:$0xff]  ;;  %6248 = vst.msk [vmem:[#allocation3 + $0x38] sm:$0x3] %vm6241_vm11, %v13291_v20  ;;  %6250 = vst.msk [vmem:[#allocation3 + $0x48] sm:$0x3] %vm6241_vm11, %v13291_v20 }
 0x2f6   :  { %9388 = vmatprep.subr.msk.mxu0 %vm4087_vm0, %v8700_v35  ;;  %6252 = vst.msk [vmem:[#allocation3 + $0x58] sm:$0x3] %vm6241_vm11, %v13291_v20  ;;  %6254 = vst.msk [vmem:[#allocation3 + $0x68] sm:$0x3] %vm6241_vm11, %v13291_v20 }
 0x2f7   :  { %6256 = vst.msk [vmem:[#allocation3 + $0x78] sm:$0x3] %vm6241_vm11, %v13291_v20  ;;  %6258 = vst.msk [vmem:[#allocation3 + $0x88] sm:$0x3] %vm6241_vm11, %v13291_v20 }
 0x2f8   :  { %9342 = vmatmul.mubr.msk.f32.gmra.mrb[2].mxu0 %vm32_vm1, %v11957_v60  ;;  %v5596_v60 = vld [vmem:[#allocation2 + $0x111] sm:$0xff]  ;;  %6260 = vst.msk [vmem:[#allocation3 + $0x98] sm:$0x3] %vm6241_vm11, %v13291_v20  ;;  %6262 = vst.msk [vmem:[#allocation3 + $0xa8] sm:$0x3] %vm6241_vm11, %v13291_v20 }
 0x2f9   :  { %9344 = vmatprep.mubr.msk.f32.mxu0 %vm32_vm1, %v11963_v4  ;;  %v5598_v4 = vld [vmem:[#allocation2 + $0x131] sm:$0xff]  ;;  %6264 = vst.msk [vmem:[#allocation3 + $0xb8] sm:$0x3] %vm6241_vm11, %v13291_v20  ;;  %6280 = vst.msk [vmem:[#allocation3 + $0x138] sm:$0x3] %vm6241_vm11, %v13291_v20 }
 0x2fc   :  { %9345 = vmatmul.mubr.msk.f32.gmra.mrb[4].mxu0 %vm32_vm1, %v11973_v34  ;;  %v5813_v34 = vld [vmem:[#allocation2 + $0x22] sm:$0xff] }
 0x2fd   :  { %9347 = vmatprep.mubr.msk.f32.mxu0 %vm32_vm1, %v12245_v51 }
 0x300   :  { %9348 = vmatmul.mubr.msk.f32.gmra.mrb[6].mxu0 %vm32_vm1, %v5360_v2 }
 0x301   :  { %9350 = vmatprep.mubr.msk.f32.mxu0 %vm32_vm1, %v11986_v15  ;;  %v5814_v15 = vld [vmem:[#allocation2 + $0x32] sm:$0xff] }
 0x304   :  { %9351 = vmatmul.mubr.msk.f32.gmra.mrb[8].mxu0 %vm32_vm1, %v11998_v39  ;;  %v5815_v39 = vld [vmem:[#allocation2 + $0x42] sm:$0xff] }
 0x305   :  { %9353 = vmatprep.mubr.msk.f32.mxu0 %vm32_vm1, %v12003_v49  ;;  %v5816_v49 = vld [vmem:[#allocation2 + $0x52] sm:$0xff] }
 0x308   :  { %9354 = vmatmul.mubr.msk.f32.gmra.mrb[10].mxu0 %vm32_vm1, %v12028_v32  ;;  %v5817_v32 = vld [vmem:[#allocation2 + $0x62] sm:$0xff] }
 0x309   :  { %9356 = vmatprep.mubr.msk.f32.mxu0 %vm32_vm1, %v12032_v56  ;;  %v5818_v56 = vld [vmem:[#allocation2 + $0x72] sm:$0xff] }
 0x30c   :  { %9357 = vmatmul.mubr.msk.f32.gmra.mrb[12].mxu0 %vm32_vm1, %v12048_v55  ;;  %v5820_v55 = vld [vmem:[#allocation2 + $0x92] sm:$0xff] }
 0x30d   :  { %9359 = vmatprep.mubr.msk.f32.mxu0 %vm32_vm1, %v12263_v18 }
 0x310   :  { %9360 = vmatmul.mubr.msk.f32.gmra.mrb[14].mxu0 %vm32_vm1, %v5368_v9 }
 0x311   :  { %9364 = vmatprep.mubr.msk.f32.mxu0 %vm32_vm1, %v12268_v16  ;;  %v6315_v16 = vld [vmem:[#allocation3 + $0x1] sm:$0xff] }
 0x312   :  { %9416 = vmatprep.mubr.msk.f32.mxu1 %vm6066_vm10, %v6315_v16 }
 0x314   :  { %9365 = vmatmul.mubr.msk.f32.vlgmr.msra.gmra.mrb[0].mxu0 %vm32_vm1, %v12270_v41 }
 0x315   :  { %9389 = vmatpush3.msk.msra.mxu0 %vm4087_vm0, %v8700_v35  ;;  %9367 = vmatprep.mubr.msk.f32.mxu0 %vm32_vm1, %v12280_v1 }
 0x318   :  { %9368 = vmatmul.mubr.msk.f32.gmra.mrb[2].mxu0 %vm32_vm1, %v12282_v30 }
 0x319   :  { %9370 = vmatprep.mubr.msk.f32.mxu0 %vm32_vm1, %v12289_v14 }
 0x31c   :  { %9371 = vmatmul.mubr.msk.f32.gmra.mrb[4].mxu0 %vm32_vm1, %v12291_v29 }
 0x31d   :  { %9373 = vmatprep.mubr.msk.f32.mxu0 %vm32_vm1, %v12297_v28 }
 0x320   :  { %9374 = vmatmul.mubr.msk.f32.gmra.mrb[6].mxu0 %vm32_vm1, %v5590_v31 }
 0x321   :  { %9376 = vmatprep.mubr.msk.f32.mxu0 %vm32_vm1, %v12302_v36 }
 0x324   :  { %9377 = vmatmul.mubr.msk.f32.gmra.mrb[8].mxu0 %vm32_vm1, %v12304_v50 }
 0x325   :  { %9379 = vmatprep.mubr.msk.f32.mxu0 %vm32_vm1, %v12310_v43 }
 0x328   :  { %9380 = vmatmul.mubr.msk.f32.gmra.mrb[10].mxu0 %vm32_vm1, %v12312_v33 }
 0x329   :  { %9382 = vmatprep.mubr.msk.f32.mxu0 %vm32_vm1, %v4905_v11 }
 0x32c   :  { %9383 = vmatmul.mubr.msk.f32.gmra.mrb[12].mxu0 %vm32_vm1, %v5596_v60 }
 0x32d   :  { %9385 = vmatprep.mubr.msk.f32.mxu0 %vm32_vm1, %v4907_v57 }
 0x330   :  { %9386 = vmatmul.mubr.msk.f32.gmra.mrb[14].mxu0 %vm32_vm1, %v5598_v4 }
 0x331   :  { %9390 = vmatprep.mubr.msk.f32.mxu0 %vm32_vm1, %v5813_v34 }
 0x334   :  { %9391 = vmatmul.mubr.msk.f32.vlgmr.msra.gmra.mrb[0].mxu0 %vm32_vm1, %v5814_v15 }
 0x335   :  { %9393 = vmatprep.mubr.msk.f32.mxu0 %vm32_vm1, %v5815_v39 }
 0x338   :  { %9394 = vmatmul.mubr.msk.f32.gmra.mrb[2].mxu0 %vm32_vm1, %v5816_v49 }
 0x339   :  { %9396 = vmatprep.mubr.msk.f32.mxu0 %vm32_vm1, %v5817_v32 }
 0x33c   :  { %9397 = vmatmul.mubr.msk.f32.gmra.mrb[4].mxu0 %vm32_vm1, %v5818_v56 }
 0x33d   :  { %9399 = vmatprep.mubr.msk.f32.mxu0 %vm32_vm1, %v12341_v54 }
 0x340   :  { %9400 = vmatmul.mubr.msk.f32.gmra.mrb[6].mxu0 %vm32_vm1, %v5820_v55 }
 0x341   :  { %9402 = vmatprep.mubr.msk.f32.mxu0 %vm32_vm1, %v5821_v38 }
 0x344   :  { %9403 = vmatmul.mubr.msk.f32.gmra.mrb[8].mxu0 %vm32_vm1, %v5822_v12 }
 0x345   :  { %9405 = vmatprep.mubr.msk.f32.mxu0 %vm32_vm1, %v5823_v44 }
 0x348   :  { %9406 = vmatmul.mubr.msk.f32.gmra.mrb[10].mxu0 %vm32_vm1, %v5824_v63 }
 0x349   :  { %9408 = vmatprep.mubr.msk.f32.mxu0 %vm32_vm1, %v5825_v22 }
 0x34c   :  { %9409 = vmatmul.mubr.msk.f32.gmra.mrb[12].mxu0 %vm32_vm1, %v5826_v21 }
 0x34d   :  { %9411 = vmatprep.mubr.msk.f32.mxu0 %vm32_vm1, %v12359_v27 }
 0x350   :  { %9412 = vmatmul.mubr.msk.f32.gmra.mrb[14].mxu0 %vm32_vm1, %v5828_v52 }
 0x407   :  { %v9392_v0 = vpop.f32.mrb[0].mxu0 }
 0x408   :  { %v12490_v17 = vadd.f32 %v9392_v0, %v12487_v24  ;;  %v5948_v13 = vpop.f32.mrb[1].mxu0 }
 0x409   :  { %v12493_v19 = vadd.f32 %v12487_v24, %v5948_v13 }
 0x40a   :  { %v6068_v59 = vsel %vm6066_vm10, %v12490_v17, 0.0 }
 0x40b   :  { %v6067_v53 = vsel %vm6066_vm10, %v12493_v19, 0.0  ;;  %v9395_v3 = vpop.f32.mrb[2].mxu0 }
 0x40c   :  { %v6069_v46 = vadd.f32 %v6068_v59, %v6067_v53  ;;  %v5958_v58 = vpop.f32.mrb[3].mxu0  ;;  %v12540_v26 = vadd.f32 %v9395_v3, %v12487_v24 }
 0x40d   :  { %v12543_v40 = vadd.f32 %v12487_v24, %v5958_v58 }
 0x40e   :  { %v6072_v7 = vsel %vm6066_vm10, %v12540_v26, 0.0 }
 0x40f   :  { %v6070_v48 = vsel %vm6066_vm10, %v12543_v40, 0.0  ;;  %v9398_v23 = vpop.f32.mrb[4].mxu0 }
 0x410   :  { %v6071_v61 = vadd.f32 %v6070_v48, %v6069_v46  ;;  %v5968_v47 = vpop.f32.mrb[5].mxu0  ;;  %v6055_v6 = vadd.f32 %v9398_v23, %v12487_v24 }
 0x411   :  { %v6054_v8 = vadd.f32 %v12487_v24, %v5968_v47 }
 0x412   :  { %v6073_v51 = vadd.f32 %v6072_v7, %v6071_v61  ;;  %v6076_v1 = vsel %vm6066_vm10, %v6055_v6, 0.0 }
 0x413   :  { %v6074_v18 = vsel %vm6066_vm10, %v6054_v8, 0.0  ;;  %v9401_v62 = vpop.f32.mrb[6].mxu0 }
 0x414   :  { %v6075_v41 = vadd.f32 %v6074_v18, %v6073_v51  ;;  %v5978_v42 = vpop.f32.mrb[7].mxu0  ;;  %v6057_v30 = vadd.f32 %v9401_v62, %v12487_v24 }
 0x415   :  { %v6056_v14 = vadd.f32 %v12487_v24, %v5978_v42 }
 0x416   :  { %v6077_v29 = vadd.f32 %v6076_v1, %v6075_v41  ;;  %v6080_v43 = vsel %vm6066_vm10, %v6057_v30, 0.0 }
 0x417   :  { %v6078_v28 = vsel %vm6066_vm10, %v6056_v14, 0.0  ;;  %v9404_v45 = vpop.f32.mrb[8].mxu0 }
 0x418   :  { %v6079_v36 = vadd.f32 %v6078_v28, %v6077_v29  ;;  %v5988_v50 = vpop.f32.mrb[9].mxu0  ;;  %v6059_v33 = vadd.f32 %v9404_v45, %v12487_v24 }
 0x419   :  { %v6058_v11 = vadd.f32 %v12487_v24, %v5988_v50 }
 0x41a   :  { %v6081_v57 = vadd.f32 %v6080_v43, %v6079_v36  ;;  %v6084_v2 = vsel %vm6066_vm10, %v6059_v33, 0.0 }
 0x41b   :  { %v6082_v5 = vsel %vm6066_vm10, %v6058_v11, 0.0  ;;  %v9407_v54 = vpop.f32.mrb[10].mxu0 }
 0x41c   :  { %v6083_v27 = vadd.f32 %v6082_v5, %v6081_v57  ;;  %v5998_v35 = vpop.f32.mrb[11].mxu0  ;;  %v6061_v9 = vadd.f32 %v9407_v54, %v12487_v24 }
 0x41d   :  { %v6060_v31 = vadd.f32 %v12487_v24, %v5998_v35 }
 0x41e   :  { %v6085_v60 = vadd.f32 %v6084_v2, %v6083_v27  ;;  %v6088_v49 = vsel %vm6066_vm10, %v6061_v9, 0.0 }
 0x41f   :  { %v6086_v4 = vsel %vm6066_vm10, %v6060_v31, 0.0  ;;  %v9410_v34 = vpop.f32.mrb[12].mxu0 }
 0x420   :  { %v6087_v15 = vadd.f32 %v6086_v4, %v6085_v60  ;;  %v6008_v39 = vpop.f32.mrb[13].mxu0  ;;  %v6063_v32 = vadd.f32 %v9410_v34, %v12487_v24 }
 0x421   :  { %v6062_v56 = vadd.f32 %v12487_v24, %v6008_v39 }
 0x422   :  { %v6089_v55 = vadd.f32 %v6088_v49, %v6087_v15  ;;  %v6092_v22 = vsel %vm6066_vm10, %v6063_v32, 0.0 }
 0x423   :  { %v6090_v38 = vsel %vm6066_vm10, %v6062_v56, 0.0  ;;  %v9413_v12 = vpop.f32.mrb[14].mxu0 }
 0x424   :  { %v6091_v44 = vadd.f32 %v6090_v38, %v6089_v55  ;;  %v6018_v63 = vpop.f32.mrb[15].mxu0  ;;  %v6065_v21 = vadd.f32 %v9413_v12, %v12487_v24 }
 0x425   :  { %v6064_v52 = vadd.f32 %v12487_v24, %v6018_v63 }
 0x426   :  { %v6093_v20 = vadd.f32 %v6092_v22, %v6091_v44  ;;  %v6096_v59 = vsel %vm6066_vm10, %v6065_v21, 0.0 }
 0x427   :  { %v6094_v0 = vsel %vm6066_vm10, %v6064_v52, 0.0 }
 0x428   :  { %v6095_v13 = vadd.f32 %v6094_v0, %v6093_v20 }
 0x42a   :  { %v6097_v53 = vadd.f32 %v6096_v59, %v6095_v13 }
 0x42c   :  { %v6098_v3 = vrot.slane %v6097_v53, 4 }
 0x42e   :  { %v6099_v46 = vadd.f32 %v6098_v3, %v6097_v53 }
 0x430   :  { %v6100_v58 = vrot.slane %v6099_v46, 2 }
 0x432   :  { %v6101_v25 = vadd.f32 %v6100_v58, %v6099_v46 }
 0x434   :  { %v6102_v48 = vrot.slane %v6101_v25, 1 }
 0x436   :  { %v6103_v23 = vadd.f32 %v6102_v48, %v6101_v25 }
 0x438   :  { %v6104_v61 = vmul.f32 0.0078125, %v6103_v23 }
 0x43a   :  { %v12584_v47 = vsub.f32 %v12493_v19, %v6104_v61  ;;  %v12587_v7 = vsub.f32 %v12490_v17, %v6104_v61  ;;  %v12590_v24 = vsub.f32 %v12543_v40, %v6104_v61  ;;  %v12593_v51 = vsub.f32 %v12540_v26, %v6104_v61 }
 0x43b   :  { %v12595_v18 = vsub.f32 %v6054_v8, %v6104_v61  ;;  %v12597_v62 = vsub.f32 %v6055_v6, %v6104_v61  ;;  %v12599_v16 = vsub.f32 %v6056_v14, %v6104_v61  ;;  %v12601_v41 = vsub.f32 %v6057_v30, %v6104_v61 }
 0x43c   :  { %v12603_v42 = vsub.f32 %v6058_v11, %v6104_v61  ;;  %v12605_v19 = vsub.f32 %v6059_v33, %v6104_v61  ;;  %v12607_v17 = vsub.f32 %v6060_v31, %v6104_v61  ;;  %v12609_v1 = vsub.f32 %v6061_v9, %v6104_v61 }
 0x43d   :  { %v12611_v40 = vsub.f32 %v6062_v56, %v6104_v61  ;;  %v12613_v26 = vsub.f32 %v6063_v32, %v6104_v61  ;;  %v12615_v8 = vsub.f32 %v6064_v52, %v6104_v61  ;;  %v12617_v6 = vsub.f32 %v6065_v21, %v6104_v61 }
 0x43e   :  { %v6121_v30 = vmul.f32 %v12584_v47, %v12584_v47  ;;  %v6122_v14 = vmul.f32 %v12587_v7, %v12587_v7  ;;  %v6123_v29 = vmul.f32 %v12590_v24, %v12590_v24  ;;  %v6124_v28 = vmul.f32 %v12593_v51, %v12593_v51 }
 0x43f   :  { %v6125_v43 = vmul.f32 %v12595_v18, %v12595_v18  ;;  %v6126_v57 = vmul.f32 %v12597_v62, %v12597_v62  ;;  %v6127_v27 = vmul.f32 %v12599_v16, %v12599_v16  ;;  %v6128_v9 = vmul.f32 %v12601_v41, %v12601_v41 }
 0x440   :  { %v6137_v45 = vsel %vm6066_vm10, %v6121_v30, 0.0  ;;  %v6138_v36 = vsel %vm6066_vm10, %v6122_v14, 0.0  ;;  %v6140_v33 = vsel %vm6066_vm10, %v6123_v29, 0.0  ;;  %v6142_v5 = vsel %vm6066_vm10, %v6124_v28, 0.0 }
 0x441   :  { %v6139_v50 = vadd.f32 %v6138_v36, %v6137_v45  ;;  %v6144_v35 = vsel %vm6066_vm10, %v6125_v43, 0.0  ;;  %v6146_v31 = vsel %vm6066_vm10, %v6126_v57, 0.0  ;;  %v6129_v4 = vmul.f32 %v12603_v42, %v12603_v42 }
 0x442   :  { %v6148_v34 = vsel %vm6066_vm10, %v6127_v27, 0.0  ;;  %v6130_v39 = vmul.f32 %v12605_v19, %v12605_v19  ;;  %v6150_v49 = vsel %vm6066_vm10, %v6128_v9, 0.0  ;;  %v6131_v56 = vmul.f32 %v12607_v17, %v12607_v17 }
 0x443   :  { %v6141_v11 = vadd.f32 %v6140_v33, %v6139_v50  ;;  %v6152_v55 = vsel %vm6066_vm10, %v6129_v4, 0.0  ;;  %v6132_v12 = vmul.f32 %v12609_v1, %v12609_v1  ;;  %v6133_v22 = vmul.f32 %v12611_v40, %v12611_v40 }
 0x444   :  { %v6154_v44 = vsel %vm6066_vm10, %v6130_v39, 0.0  ;;  %v6156_v21 = vsel %vm6066_vm10, %v6131_v56, 0.0  ;;  %v6134_v20 = vmul.f32 %v12613_v26, %v12613_v26  ;;  %v6135_v59 = vmul.f32 %v12615_v8, %v12615_v8  ;;  %v8719_v39 = vld [vmem:[%s13277_s4] ss:$0 sm:$0xff] }
 0x445   :  { %v6143_v54 = vadd.f32 %v6142_v5, %v6141_v11  ;;  %v6158_v0 = vsel %vm6066_vm10, %v6132_v12, 0.0  ;;  %v6160_v53 = vsel %vm6066_vm10, %v6133_v22, 0.0  ;;  %v6136_v46 = vmul.f32 %v12617_v6, %v12617_v6  ;;  %v6175_v11 = vld [vmem:[%s13276_s3] sm:$0x1] }
 0x446   :  { %v6162_v58 = vsel %vm6066_vm10, %v6134_v20, 0.0  ;;  %v6164_v48 = vsel %vm6066_vm10, %v6135_v59, 0.0  ;;  %v6182_v57 = vsub.s32 0, %v10131_v10  ;;  %v8873_v10 = vld [vmem:[%s13280_s8] ss:$0 sm:$0xff] }
 0x447   :  { %v6145_v2 = vadd.f32 %v6144_v35, %v6143_v54  ;;  %v6166_v61 = vsel %vm6066_vm10, %v6136_v46, 0.0 }
 0x449   :  { %v6147_v60 = vadd.f32 %v6146_v31, %v6145_v2 }
 0x44b   :  { %v6149_v15 = vadd.f32 %v6148_v34, %v6147_v60 }
 0x44d   :  { %v6151_v32 = vadd.f32 %v6150_v49, %v6149_v15 }
 0x44f   :  { %v6153_v38 = vadd.f32 %v6152_v55, %v6151_v32 }
 0x451   :  { %v6155_v63 = vadd.f32 %v6154_v44, %v6153_v38 }
 0x453   :  { %v6157_v52 = vadd.f32 %v6156_v21, %v6155_v63 }
 0x455   :  { %v6159_v13 = vadd.f32 %v6158_v0, %v6157_v52 }
 0x457   :  { %v6161_v3 = vadd.f32 %v6160_v53, %v6159_v13 }
 0x459   :  { %v6163_v25 = vadd.f32 %v6162_v58, %v6161_v3 }
 0x45b   :  { %v6165_v23 = vadd.f32 %v6164_v48, %v6163_v25 }
 0x45d   :  { %v6167_v30 = vadd.f32 %v6166_v61, %v6165_v23 }
 0x45f   :  { %v6168_v14 = vrot.slane %v6167_v30, 4 }
 0x461   :  { %v6169_v29 = vadd.f32 %v6168_v14, %v6167_v30 }
 0x463   :  { %v6170_v28 = vrot.slane %v6169_v29, 2 }
 0x465   :  { %v6171_v45 = vadd.f32 %v6170_v28, %v6169_v29  ;;  %v8753_v28 = vld [vmem:[%s13275_s5 + $0x10] sm:$0xff] }
 0x467   :  { %v6172_v36 = vrot.slane %v6171_v45, 1 }
 0x469   :  { %v6173_v50 = vadd.f32 %v6172_v36, %v6171_v45 }
 0x46b   :  { %v6174_v43 = vmul.f32 0.0078125, %v6173_v50 }
 0x46d   :  { %v6176_v33 = vadd.f32 1e-05, %v6174_v43  ;;  %v6323_v43 = vld [vmem:[#allocation3 + $0xa1] sm:$0xff] }
 0x46f   :  { %9970 = vrsqrt.f32 %v6176_v33 }
 0x479   :  { %v9971_v5 = vpop.eup %9970 }
 0x47a   :  { %v6178_v54 = vmul.f32 %v9971_v5, %v6175_v11 }
 0x47c   :  { %v6183_v27 = vrot.slane %v6178_v54, %v6182_v57 }
 0x47e   :  { %v6185_v35 = vmul.f32 %v6183_v27, %v12584_v47  ;;  %v6186_v2 = vmul.f32 %v6183_v27, %v12587_v7  ;;  %v6187_v9 = vmul.f32 %v6183_v27, %v12590_v24  ;;  %v6188_v31 = vmul.f32 %v6183_v27, %v12593_v51 }
 0x47f   :  { %v6189_v60 = vmul.f32 %v6183_v27, %v12595_v18  ;;  %v6190_v4 = vmul.f32 %v6183_v27, %v12597_v62  ;;  %v6191_v34 = vmul.f32 %v6183_v27, %v12599_v16  ;;  %v6192_v15 = vmul.f32 %v6183_v27, %v12601_v41 }
 0x480   :  { %v6193_v47 = vmul.f32 %v6183_v27, %v12603_v42  ;;  %v6194_v7 = vmul.f32 %v6183_v27, %v12605_v19  ;;  %v6195_v24 = vmul.f32 %v6183_v27, %v12607_v17  ;;  %v6196_v51 = vmul.f32 %v6183_v27, %v12609_v1 }
 0x481   :  { %v6197_v18 = vmul.f32 %v6183_v27, %v12611_v40  ;;  %v6198_v62 = vmul.f32 %v6183_v27, %v12613_v26  ;;  %v6199_v16 = vmul.f32 %v6183_v27, %v12615_v8  ;;  %v6200_v41 = vmul.f32 %v6183_v27, %v12617_v6 }
 0x482   :  { %v6208_v49 = vadd.f32 %v8719_v39, %v6185_v35  ;;  %v6209_v32 = vadd.f32 %v8719_v39, %v6186_v2  ;;  %v6210_v56 = vadd.f32 %v8719_v39, %v6187_v9  ;;  %v6211_v55 = vadd.f32 %v8719_v39, %v6188_v31  ;;  %v6298_v9 = vld [vmem:[#allocation3] sm:$0xff] }
 0x483   :  { %v6212_v38 = vadd.f32 %v8719_v39, %v6189_v60  ;;  %v6213_v42 = vadd.f32 %v8719_v39, %v6190_v4  ;;  %v6214_v12 = vadd.f32 %v8719_v39, %v6191_v34  ;;  %v6215_v19 = vadd.f32 %v8719_v39, %v6192_v15  ;;  %v8770_v4 = vld [vmem:[%s13275_s5 + $0x18] sm:$0xff] }
 0x484   :  { %v6216_v44 = vadd.f32 %v8719_v39, %v6193_v47  ;;  %v6217_v17 = vadd.f32 %v8719_v39, %v6194_v7  ;;  %v6218_v63 = vadd.f32 %v8719_v39, %v6195_v24  ;;  %v6219_v1 = vadd.f32 %v8719_v39, %v6196_v51  ;;  %v6306_v24 = vld [vmem:[#allocation3 + $0xa0] sm:$0xff] }
 0x485   :  { %v6220_v22 = vadd.f32 %v8719_v39, %v6197_v18  ;;  %v6221_v40 = vadd.f32 %v8719_v39, %v6198_v62  ;;  %v6222_v21 = vadd.f32 %v8719_v39, %v6199_v16  ;;  %v6223_v26 = vadd.f32 %v8719_v39, %v6200_v41 }
 0x486   :  { %v6224_v52 = vmax.f32 %v6208_v49, 0.0  ;;  %v6225_v8 = vmax.f32 %v6209_v32, 0.0  ;;  %v6226_v20 = vmax.f32 %v6210_v56, 0.0  ;;  %v6227_v6 = vmax.f32 %v6211_v55, 0.0  ;;  %v6719_v56 = vld [vmem:[#allocation3 + $0x2] sm:$0xff] }
 0x487   :  { %v6228_v0 = vmax.f32 %v6212_v38, 0.0  ;;  %v6229_v13 = vmax.f32 %v6213_v42, 0.0  ;;  %v6230_v59 = vmax.f32 %v6214_v12, 0.0  ;;  %v6231_v53 = vmax.f32 %v6215_v19, 0.0  ;;  %v8787_v42 = vld [vmem:[%s13275_s5 + $0x20] sm:$0xff] }
 0x488   :  { %v6232_v3 = vmax.f32 %v6216_v44, 0.0  ;;  %v6233_v46 = vmax.f32 %v6217_v17, 0.0  ;;  %v6234_v58 = vmax.f32 %v6218_v63, 0.0  ;;  %v6235_v25 = vmax.f32 %v6219_v1, 0.0  ;;  %6282 = vst.msk [vmem:[#allocation3 + $0x11] sm:$0xff] %vm6066_vm10, %v6224_v52  ;;  %6283 = vst.msk [vmem:[#allocation3 + $0x21] sm:$0xff] %vm6066_vm10, %v6225_v8 }
 0x489   :  { %6284 = vst.msk [vmem:[#allocation3 + $0x31] sm:$0xff] %vm6066_vm10, %v6226_v20  ;;  %6285 = vst.msk [vmem:[#allocation3 + $0x41] sm:$0xff] %vm6066_vm10, %v6227_v6  ;;  %v6236_v48 = vmax.f32 %v6220_v22, 0.0  ;;  %v6237_v23 = vmax.f32 %v6221_v40, 0.0  ;;  %v6238_v61 = vmax.f32 %v6222_v21, 0.0  ;;  %v6239_v30 = vmax.f32 %v6223_v26, 0.0 }
 0x48a   :  { %6286 = vst.msk [vmem:[#allocation3 + $0x51] sm:$0xff] %vm6066_vm10, %v6228_v0  ;;  %6287 = vst.msk [vmem:[#allocation3 + $0x61] sm:$0xff] %vm6066_vm10, %v6229_v13  ;;  %v6727_v1 = vld [vmem:[#allocation3 + $0xa2] sm:$0xff] }
 0x48b   :  { %6288 = vst.msk [vmem:[#allocation3 + $0x71] sm:$0xff] %vm6066_vm10, %v6230_v59  ;;  %6289 = vst.msk [vmem:[#allocation3 + $0x81] sm:$0xff] %vm6066_vm10, %v6231_v53  ;;  %v8804_v0 = vld [vmem:[%s13275_s5 + $0x28] sm:$0xff]  ;;  %v8821_v53 = vld [vmem:[%s13275_s5 + $0x30] sm:$0xff] }
 0x48c   :  { %6291 = vst.msk [vmem:[#allocation3 + $0xc1] sm:$0xff] %vm6066_vm10, %v6233_v46  ;;  %6292 = vst.msk [vmem:[#allocation3 + $0xd1] sm:$0xff] %vm6066_vm10, %v6234_v58  ;;  %v8838_v58 = vld [vmem:[%s13275_s5 + $0x38] sm:$0xff] }
 0x48d   :  { %6293 = vst.msk [vmem:[#allocation3 + $0xe1] sm:$0xff] %vm6066_vm10, %v6235_v25  ;;  %6290 = vst.msk [vmem:[#allocation3 + $0xb1] sm:$0xff] %vm6066_vm10, %v6232_v3 }
 0x48e   :  { %6294 = vst.msk [vmem:[#allocation3 + $0xf1] sm:$0xff] %vm6066_vm10, %v6236_v48  ;;  %6295 = vst.msk [vmem:[#allocation3 + $0x101] sm:$0xff] %vm6066_vm10, %v6237_v23  ;;  %v8855_v23 = vld [vmem:[%s13275_s5 + $0x40] sm:$0xff] }
 0x48f   :  { %6296 = vst.msk [vmem:[#allocation3 + $0x111] sm:$0xff] %vm6066_vm10, %v6238_v61  ;;  %6297 = vst.msk [vmem:[#allocation3 + $0x121] sm:$0xff] %vm6066_vm10, %v6239_v30  ;;  %v12708_v14 = vld [vmem:[#allocation3 + $0x11] sm:$0xff]  ;;  %v12710_v29 = vld [vmem:[#allocation3 + $0x21] sm:$0xff] }
 0x490   :  { %9417 = vmatmul.mubr.msk.f32.vlgmr.msra.gmra.mrb[0].mxu1 %vm6066_vm10, %v12708_v14  ;;  %v12720_v45 = vld [vmem:[#allocation3 + $0x31] sm:$0xff]  ;;  %v12724_v36 = vld [vmem:[#allocation3 + $0x41] sm:$0xff] }
 0x491   :  { %9441 = vmatpush3.msra.mxu1 %v12551_v37  ;;  %9419 = vmatprep.mubr.msk.f32.mxu1 %vm6066_vm10, %v12710_v29  ;;  %v12728_v50 = vld [vmem:[#allocation3 + $0x51] sm:$0xff]  ;;  %v12732_v37 = vld [vmem:[#allocation3 + $0x61] sm:$0xff] }
 0x492   :  { %9466 = vmatprep.subr.mxu1 %v8753_v28  ;;  %v12736_v33 = vld [vmem:[#allocation3 + $0x71] sm:$0xff]  ;;  %v12777_v34 = vld [vmem:[#allocation3 + $0x20] sm:$0xff] }
 0x493   :  { %v12745_v5 = vld [vmem:[#allocation3 + $0xc1] sm:$0xff]  ;;  %v12749_v54 = vld [vmem:[#allocation3 + $0xd1] sm:$0xff] }
 0x494   :  { %9420 = vmatmul.mubr.msk.f32.gmra.mrb[2].mxu1 %vm6066_vm10, %v12720_v45  ;;  %v12741_v11 = vld [vmem:[#allocation3 + $0xb1] sm:$0xff]  ;;  %v12753_v27 = vld [vmem:[#allocation3 + $0xe1] sm:$0xff] }
 0x495   :  { %9422 = vmatprep.mubr.msk.f32.mxu1 %vm6066_vm10, %v12724_v36  ;;  %v12757_v35 = vld [vmem:[#allocation3 + $0xf1] sm:$0xff]  ;;  %v12761_v2 = vld [vmem:[#allocation3 + $0x101] sm:$0xff] }
 0x496   :  { %v12765_v31 = vld [vmem:[#allocation3 + $0x111] sm:$0xff]  ;;  %v12785_v39 = vld [vmem:[#allocation3 + $0x40] sm:$0xff] }
 0x497   :  { %v12770_v60 = vld [vmem:[#allocation3 + $0x10] sm:$0xff]  ;;  %v12793_v7 = vld [vmem:[#allocation3 + $0x60] sm:$0xff] }
 0x498   :  { %9423 = vmatmul.mubr.msk.f32.gmra.mrb[4].mxu1 %vm6066_vm10, %v12728_v50  ;;  %v12781_v15 = vld [vmem:[#allocation3 + $0x30] sm:$0xff]  ;;  %v12803_v62 = vld [vmem:[#allocation3 + $0xc0] sm:$0xff] }
 0x499   :  { %9425 = vmatprep.mubr.msk.f32.mxu1 %vm6066_vm10, %v12732_v37  ;;  %v12789_v47 = vld [vmem:[#allocation3 + $0x50] sm:$0xff]  ;;  %v12811_v41 = vld [vmem:[#allocation3 + $0xe0] sm:$0xff] }
 0x49a   :  { %v12797_v51 = vld [vmem:[#allocation3 + $0x70] sm:$0xff]  ;;  %v12819_v32 = vld [vmem:[#allocation3 + $0x100] sm:$0xff] }
 0x49b   :  { %v6307_v18 = vld [vmem:[#allocation3 + $0xb0] sm:$0xff]  ;;  %v12835_v12 = vld [vmem:[#allocation3 + $0x22] sm:$0xff] }
 0x49c   :  { %9426 = vmatmul.mubr.msk.f32.gmra.mrb[6].mxu1 %vm6066_vm10, %v12736_v33  ;;  %v12807_v16 = vld [vmem:[#allocation3 + $0xd0] sm:$0xff]  ;;  %v12843_v44 = vld [vmem:[#allocation3 + $0x42] sm:$0xff] }
 0x49d   :  { %9428 = vmatprep.mubr.msk.f32.mxu1 %vm6066_vm10, %v6323_v43  ;;  %v12815_v49 = vld [vmem:[#allocation3 + $0xf0] sm:$0xff]  ;;  %v12851_v63 = vld [vmem:[#allocation3 + $0x62] sm:$0xff] }
 0x49e   :  { %v12823_v55 = vld [vmem:[#allocation3 + $0x110] sm:$0xff]  ;;  %v12864_v21 = vld [vmem:[#allocation3 + $0xc2] sm:$0xff] }
 0x49f   :  { %v12828_v38 = vld [vmem:[#allocation3 + $0x12] sm:$0xff]  ;;  %v12872_v52 = vld [vmem:[#allocation3 + $0xe2] sm:$0xff] }
 0x4a0   :  { %9429 = vmatmul.mubr.msk.f32.gmra.mrb[8].mxu1 %vm6066_vm10, %v12741_v11  ;;  %v12839_v19 = vld [vmem:[#allocation3 + $0x32] sm:$0xff]  ;;  %v12880_v20 = vld [vmem:[#allocation3 + $0x102] sm:$0xff] }
 0x4a1   :  { %9431 = vmatprep.mubr.msk.f32.mxu1 %vm6066_vm10, %v12745_v5  ;;  %v12847_v17 = vld [vmem:[#allocation3 + $0x52] sm:$0xff]  ;;  %v6953_v13 = vld [vmem:[#allocation3 + $0x80] sm:$0xff] }
 0x4a2   :  { %v12855_v22 = vld [vmem:[#allocation3 + $0x72] sm:$0xff]  ;;  %v6961_v59 = vld [vmem:[#allocation3 + $0x120] sm:$0xff] }
 0x4a3   :  { %v12860_v40 = vld [vmem:[#allocation3 + $0xb2] sm:$0xff]  ;;  %v7180_v3 = vld [vmem:[#allocation3 + $0x81] sm:$0xff] }
 0x4a4   :  { %9432 = vmatmul.mubr.msk.f32.gmra.mrb[10].mxu1 %vm6066_vm10, %v12749_v54  ;;  %v12868_v26 = vld [vmem:[#allocation3 + $0xd2] sm:$0xff]  ;;  %v7188_v46 = vld [vmem:[#allocation3 + $0x121] sm:$0xff] }
 0x4a5   :  { %9434 = vmatprep.mubr.msk.f32.mxu1 %vm6066_vm10, %v12753_v27  ;;  %v12876_v8 = vld [vmem:[#allocation3 + $0xf2] sm:$0xff]  ;;  %v7407_v25 = vld [vmem:[#allocation3 + $0x82] sm:$0xff] }
 0x4a6   :  { %v12884_v6 = vld [vmem:[#allocation3 + $0x112] sm:$0xff]  ;;  %v7415_v48 = vld [vmem:[#allocation3 + $0x122] sm:$0xff] }
 0x4a7   :  { %v7635_v61 = vld [vmem:[#allocation3 + $0x90] sm:$0xff] }
 0x4a8   :  { %9435 = vmatmul.mubr.msk.f32.gmra.mrb[12].mxu1 %vm6066_vm10, %v12757_v35  ;;  %v7643_v30 = vld [vmem:[#allocation3 + $0x130] sm:$0xff] }
 0x4a9   :  { %9437 = vmatprep.mubr.msk.f32.mxu1 %vm6066_vm10, %v12761_v2 }
 0x4ac   :  { %9438 = vmatmul.mubr.msk.f32.gmra.mrb[14].mxu1 %vm6066_vm10, %v12765_v31 }
 0x4ad   :  { %9442 = vmatprep.mubr.msk.f32.mxu1 %vm6066_vm10, %v6298_v9 }
 0x4b0   :  { %9443 = vmatmul.mubr.msk.f32.vlgmr.msra.gmra.mrb[0].mxu1 %vm6066_vm10, %v12770_v60 }
 0x4b1   :  { %9467 = vmatpush3.msra.mxu1 %v8753_v28  ;;  %9445 = vmatprep.mubr.msk.f32.mxu1 %vm6066_vm10, %v12777_v34  ;;  %v8089_v28 = vld [vmem:[#allocation3 + $0x92] sm:$0xff] }
 0x4b2   :  { %9492 = vmatprep.subr.mxu1 %v8770_v4 }
 0x4b4   :  { %9446 = vmatmul.mubr.msk.f32.gmra.mrb[2].mxu1 %vm6066_vm10, %v12781_v15 }
 0x4b5   :  { %9448 = vmatprep.mubr.msk.f32.mxu1 %vm6066_vm10, %v12785_v39 }
 0x4b8   :  { %9449 = vmatmul.mubr.msk.f32.gmra.mrb[4].mxu1 %vm6066_vm10, %v12789_v47 }
 0x4b9   :  { %9451 = vmatprep.mubr.msk.f32.mxu1 %vm6066_vm10, %v12793_v7 }
 0x4bc   :  { %9452 = vmatmul.mubr.msk.f32.gmra.mrb[6].mxu1 %vm6066_vm10, %v12797_v51 }
 0x4bd   :  { %9454 = vmatprep.mubr.msk.f32.mxu1 %vm6066_vm10, %v6306_v24 }
 0x4c0   :  { %9455 = vmatmul.mubr.msk.f32.gmra.mrb[8].mxu1 %vm6066_vm10, %v6307_v18 }
 0x4c1   :  { %9457 = vmatprep.mubr.msk.f32.mxu1 %vm6066_vm10, %v12803_v62 }
 0x4c4   :  { %9458 = vmatmul.mubr.msk.f32.gmra.mrb[10].mxu1 %vm6066_vm10, %v12807_v16 }
 0x4c5   :  { %9460 = vmatprep.mubr.msk.f32.mxu1 %vm6066_vm10, %v12811_v41 }
 0x4c8   :  { %9461 = vmatmul.mubr.msk.f32.gmra.mrb[12].mxu1 %vm6066_vm10, %v12815_v49 }
 0x4c9   :  { %9463 = vmatprep.mubr.msk.f32.mxu1 %vm6066_vm10, %v12819_v32 }
 0x4cc   :  { %9464 = vmatmul.mubr.msk.f32.gmra.mrb[14].mxu1 %vm6066_vm10, %v12823_v55 }
 0x4cd   :  { %9468 = vmatprep.mubr.msk.f32.mxu1 %vm6066_vm10, %v6719_v56 }
 0x4d0   :  { %9469 = vmatmul.mubr.msk.f32.vlgmr.msra.gmra.mrb[0].mxu1 %vm6066_vm10, %v12828_v38 }
 0x4d1   :  { %9493 = vmatpush3.msra.mxu1 %v8770_v4  ;;  %9471 = vmatprep.mubr.msk.f32.mxu1 %vm6066_vm10, %v12835_v12 }
 0x4d2   :  { %9518 = vmatprep.subr.mxu1 %v8787_v42 }
 0x4d4   :  { %9472 = vmatmul.mubr.msk.f32.gmra.mrb[2].mxu1 %vm6066_vm10, %v12839_v19 }
 0x4d5   :  { %9474 = vmatprep.mubr.msk.f32.mxu1 %vm6066_vm10, %v12843_v44 }
 0x4d8   :  { %9475 = vmatmul.mubr.msk.f32.gmra.mrb[4].mxu1 %vm6066_vm10, %v12847_v17 }
 0x4d9   :  { %9477 = vmatprep.mubr.msk.f32.mxu1 %vm6066_vm10, %v12851_v63 }
 0x4dc   :  { %9478 = vmatmul.mubr.msk.f32.gmra.mrb[6].mxu1 %vm6066_vm10, %v12855_v22 }
 0x4dd   :  { %9480 = vmatprep.mubr.msk.f32.mxu1 %vm6066_vm10, %v6727_v1 }
 0x4e0   :  { %9481 = vmatmul.mubr.msk.f32.gmra.mrb[8].mxu1 %vm6066_vm10, %v12860_v40 }
 0x4e1   :  { %9483 = vmatprep.mubr.msk.f32.mxu1 %vm6066_vm10, %v12864_v21 }
 0x4e4   :  { %9484 = vmatmul.mubr.msk.f32.gmra.mrb[10].mxu1 %vm6066_vm10, %v12868_v26 }
 0x4e5   :  { %9486 = vmatprep.mubr.msk.f32.mxu1 %vm6066_vm10, %v12872_v52 }
 0x4e8   :  { %9487 = vmatmul.mubr.msk.f32.gmra.mrb[12].mxu1 %vm6066_vm10, %v12876_v8 }
 0x4e9   :  { %9489 = vmatprep.mubr.msk.f32.mxu1 %vm6066_vm10, %v12880_v20 }
 0x4ec   :  { %9490 = vmatmul.mubr.msk.f32.gmra.mrb[14].mxu1 %vm6066_vm10, %v12884_v6 }
 0x4ed   :  { %9494 = vmatprep.mubr.msk.f32.mxu1 %vm6066_vm10, %v12770_v60 }
 0x4f0   :  { %9495 = vmatmul.mubr.msk.f32.vlgmr.msra.gmra.mrb[0].mxu1 %vm6066_vm10, %v12777_v34 }
 0x4f1   :  { %9519 = vmatpush3.msra.mxu1 %v8787_v42  ;;  %9497 = vmatprep.mubr.msk.f32.mxu1 %vm6066_vm10, %v12781_v15 }
 0x4f2   :  { %9544 = vmatprep.subr.mxu1 %v8804_v0 }
 0x4f4   :  { %9498 = vmatmul.mubr.msk.f32.gmra.mrb[2].mxu1 %vm6066_vm10, %v12785_v39 }
 0x4f5   :  { %9500 = vmatprep.mubr.msk.f32.mxu1 %vm6066_vm10, %v12789_v47 }
 0x4f8   :  { %9501 = vmatmul.mubr.msk.f32.gmra.mrb[4].mxu1 %vm6066_vm10, %v12793_v7 }
 0x4f9   :  { %9503 = vmatprep.mubr.msk.f32.mxu1 %vm6066_vm10, %v12797_v51 }
 0x4fc   :  { %9504 = vmatmul.mubr.msk.f32.gmra.mrb[6].mxu1 %vm6066_vm10, %v6953_v13 }
 0x4fd   :  { %9506 = vmatprep.mubr.msk.f32.mxu1 %vm6066_vm10, %v6307_v18 }
 0x500   :  { %9507 = vmatmul.mubr.msk.f32.gmra.mrb[8].mxu1 %vm6066_vm10, %v12803_v62 }
 0x501   :  { %9509 = vmatprep.mubr.msk.f32.mxu1 %vm6066_vm10, %v12807_v16 }
 0x504   :  { %9510 = vmatmul.mubr.msk.f32.gmra.mrb[10].mxu1 %vm6066_vm10, %v12811_v41 }
 0x505   :  { %9512 = vmatprep.mubr.msk.f32.mxu1 %vm6066_vm10, %v12815_v49 }
 0x508   :  { %9513 = vmatmul.mubr.msk.f32.gmra.mrb[12].mxu1 %vm6066_vm10, %v12819_v32 }
 0x509   :  { %9515 = vmatprep.mubr.msk.f32.mxu1 %vm6066_vm10, %v12823_v55 }
 0x50c   :  { %9516 = vmatmul.mubr.msk.f32.gmra.mrb[14].mxu1 %vm6066_vm10, %v6961_v59 }
 0x50d   :  { %9520 = vmatprep.mubr.msk.f32.mxu1 %vm6066_vm10, %v12708_v14  ;;  %v7862_v14 = vld [vmem:[#allocation3 + $0x91] sm:$0xff] }
 0x510   :  { %9521 = vmatmul.mubr.msk.f32.vlgmr.msra.gmra.mrb[0].mxu1 %vm6066_vm10, %v12710_v29 }
 0x511   :  { %9545 = vmatpush3.msra.mxu1 %v8804_v0  ;;  %9523 = vmatprep.mubr.msk.f32.mxu1 %vm6066_vm10, %v12720_v45 }
 0x512   :  { %9570 = vmatprep.subr.mxu1 %v8821_v53 }
 0x514   :  { %9524 = vmatmul.mubr.msk.f32.gmra.mrb[2].mxu1 %vm6066_vm10, %v12724_v36 }
 0x515   :  { %9526 = vmatprep.mubr.msk.f32.mxu1 %vm6066_vm10, %v12728_v50 }
 0x518   :  { %9527 = vmatmul.mubr.msk.f32.gmra.mrb[4].mxu1 %vm6066_vm10, %v12732_v37 }
 0x519   :  { %9529 = vmatprep.mubr.msk.f32.mxu1 %vm6066_vm10, %v12736_v33 }
 0x51c   :  { %9530 = vmatmul.mubr.msk.f32.gmra.mrb[6].mxu1 %vm6066_vm10, %v7180_v3 }
 0x51d   :  { %9532 = vmatprep.mubr.msk.f32.mxu1 %vm6066_vm10, %v12741_v11 }
 0x520   :  { %9533 = vmatmul.mubr.msk.f32.gmra.mrb[8].mxu1 %vm6066_vm10, %v12745_v5 }
 0x521   :  { %9535 = vmatprep.mubr.msk.f32.mxu1 %vm6066_vm10, %v12749_v54 }
 0x524   :  { %9536 = vmatmul.mubr.msk.f32.gmra.mrb[10].mxu1 %vm6066_vm10, %v12753_v27 }
 0x525   :  { %9538 = vmatprep.mubr.msk.f32.mxu1 %vm6066_vm10, %v12757_v35 }
 0x528   :  { %9539 = vmatmul.mubr.msk.f32.gmra.mrb[12].mxu1 %vm6066_vm10, %v12761_v2 }
 0x529   :  { %9541 = vmatprep.mubr.msk.f32.mxu1 %vm6066_vm10, %v12765_v31 }
 0x52c   :  { %9542 = vmatmul.mubr.msk.f32.gmra.mrb[14].mxu1 %vm6066_vm10, %v7188_v46 }
 0x52d   :  { %9546 = vmatprep.mubr.msk.f32.mxu1 %vm6066_vm10, %v12828_v38 }
 0x530   :  { %9547 = vmatmul.mubr.msk.f32.vlgmr.msra.gmra.mrb[0].mxu1 %vm6066_vm10, %v12835_v12 }
 0x531   :  { %9571 = vmatpush3.msra.mxu1 %v8821_v53  ;;  %9549 = vmatprep.mubr.msk.f32.mxu1 %vm6066_vm10, %v12839_v19 }
 0x532   :  { %9596 = vmatprep.subr.mxu1 %v8838_v58 }
 0x534   :  { %9550 = vmatmul.mubr.msk.f32.gmra.mrb[2].mxu1 %vm6066_vm10, %v12843_v44 }
 0x535   :  { %9552 = vmatprep.mubr.msk.f32.mxu1 %vm6066_vm10, %v12847_v17 }
 0x538   :  { %9553 = vmatmul.mubr.msk.f32.gmra.mrb[4].mxu1 %vm6066_vm10, %v12851_v63 }
 0x539   :  { %9555 = vmatprep.mubr.msk.f32.mxu1 %vm6066_vm10, %v12855_v22 }
 0x53c   :  { %9556 = vmatmul.mubr.msk.f32.gmra.mrb[6].mxu1 %vm6066_vm10, %v7407_v25 }
 0x53d   :  { %9558 = vmatprep.mubr.msk.f32.mxu1 %vm6066_vm10, %v12860_v40 }
 0x540   :  { %9559 = vmatmul.mubr.msk.f32.gmra.mrb[8].mxu1 %vm6066_vm10, %v12864_v21 }
 0x541   :  { %9561 = vmatprep.mubr.msk.f32.mxu1 %vm6066_vm10, %v12868_v26 }
 0x544   :  { %9562 = vmatmul.mubr.msk.f32.gmra.mrb[10].mxu1 %vm6066_vm10, %v12872_v52 }
 0x545   :  { %9564 = vmatprep.mubr.msk.f32.mxu1 %vm6066_vm10, %v12876_v8 }
 0x548   :  { %9565 = vmatmul.mubr.msk.f32.gmra.mrb[12].mxu1 %vm6066_vm10, %v12880_v20 }
 0x549   :  { %9567 = vmatprep.mubr.msk.f32.mxu1 %vm6066_vm10, %v12884_v6 }
 0x54c   :  { %9568 = vmatmul.mubr.msk.f32.gmra.mrb[14].mxu1 %vm6066_vm10, %v7415_v48 }
 0x54d   :  { %9572 = vmatprep.mubr.msk.f32.mxu1 %vm6066_vm10, %v12777_v34 }
 0x550   :  { %9573 = vmatmul.mubr.msk.f32.vlgmr.msra.gmra.mrb[0].mxu1 %vm6066_vm10, %v12781_v15 }
 0x551   :  { %9597 = vmatpush3.msra.mxu1 %v8838_v58  ;;  %9575 = vmatprep.mubr.msk.f32.mxu1 %vm6066_vm10, %v12785_v39 }
 0x552   :  { %9622 = vmatprep.subr.mxu1 %v8855_v23 }
 0x554   :  { %9576 = vmatmul.mubr.msk.f32.gmra.mrb[2].mxu1 %vm6066_vm10, %v12789_v47 }
 0x555   :  { %9578 = vmatprep.mubr.msk.f32.mxu1 %vm6066_vm10, %v12793_v7 }
 0x558   :  { %9579 = vmatmul.mubr.msk.f32.gmra.mrb[4].mxu1 %vm6066_vm10, %v12797_v51 }
 0x559   :  { %9581 = vmatprep.mubr.msk.f32.mxu1 %vm6066_vm10, %v6953_v13 }
 0x55c   :  { %9582 = vmatmul.mubr.msk.f32.gmra.mrb[6].mxu1 %vm6066_vm10, %v7635_v61 }
 0x55d   :  { %9584 = vmatprep.mubr.msk.f32.mxu1 %vm6066_vm10, %v12803_v62 }
 0x560   :  { %9585 = vmatmul.mubr.msk.f32.gmra.mrb[8].mxu1 %vm6066_vm10, %v12807_v16 }
 0x561   :  { %9587 = vmatprep.mubr.msk.f32.mxu1 %vm6066_vm10, %v12811_v41 }
 0x564   :  { %9588 = vmatmul.mubr.msk.f32.gmra.mrb[10].mxu1 %vm6066_vm10, %v12815_v49 }
 0x565   :  { %9590 = vmatprep.mubr.msk.f32.mxu1 %vm6066_vm10, %v12819_v32 }
 0x568   :  { %9591 = vmatmul.mubr.msk.f32.gmra.mrb[12].mxu1 %vm6066_vm10, %v12823_v55 }
 0x569   :  { %9593 = vmatprep.mubr.msk.f32.mxu1 %vm6066_vm10, %v6961_v59 }
 0x56c   :  { %9594 = vmatmul.mubr.msk.f32.gmra.mrb[14].mxu1 %vm6066_vm10, %v7643_v30 }
 0x56d   :  { %9598 = vmatprep.mubr.msk.f32.mxu1 %vm6066_vm10, %v12710_v29  ;;  %v7870_v29 = vld [vmem:[#allocation3 + $0x131] sm:$0xff] }
 0x570   :  { %9599 = vmatmul.mubr.msk.f32.vlgmr.msra.gmra.mrb[0].mxu1 %vm6066_vm10, %v12720_v45  ;;  %v8097_v45 = vld [vmem:[#allocation3 + $0x132] sm:$0xff] }
 0x571   :  { %9623 = vmatpush3.msra.mxu1 %v8855_v23  ;;  %9601 = vmatprep.mubr.msk.f32.mxu1 %vm6066_vm10, %v12724_v36  ;;  %v8872_v36 = vld [vmem:[%s13278_s6] ss:$0 sm:$0xff] }
 0x574   :  { %9602 = vmatmul.mubr.msk.f32.gmra.mrb[2].mxu1 %vm6066_vm10, %v12728_v50 }
 0x575   :  { %9604 = vmatprep.mubr.msk.f32.mxu1 %vm6066_vm10, %v12732_v37 }
 0x578   :  { %9605 = vmatmul.mubr.msk.f32.gmra.mrb[4].mxu1 %vm6066_vm10, %v12736_v33 }
 0x579   :  { %9607 = vmatprep.mubr.msk.f32.mxu1 %vm6066_vm10, %v7180_v3 }
 0x57c   :  { %9608 = vmatmul.mubr.msk.f32.gmra.mrb[6].mxu1 %vm6066_vm10, %v7862_v14 }
 0x57d   :  { %9610 = vmatprep.mubr.msk.f32.mxu1 %vm6066_vm10, %v12745_v5 }
 0x580   :  { %9611 = vmatmul.mubr.msk.f32.gmra.mrb[8].mxu1 %vm6066_vm10, %v12749_v54 }
 0x581   :  { %9613 = vmatprep.mubr.msk.f32.mxu1 %vm6066_vm10, %v12753_v27 }
 0x584   :  { %9614 = vmatmul.mubr.msk.f32.gmra.mrb[10].mxu1 %vm6066_vm10, %v12757_v35 }
 0x585   :  { %9616 = vmatprep.mubr.msk.f32.mxu1 %vm6066_vm10, %v12761_v2 }
 0x588   :  { %9617 = vmatmul.mubr.msk.f32.gmra.mrb[12].mxu1 %vm6066_vm10, %v12765_v31 }
 0x589   :  { %9619 = vmatprep.mubr.msk.f32.mxu1 %vm6066_vm10, %v7188_v46 }
 0x58c   :  { %9620 = vmatmul.mubr.msk.f32.gmra.mrb[14].mxu1 %vm6066_vm10, %v7870_v29 }
 0x58d   :  { %9624 = vmatprep.mubr.msk.f32.mxu1 %vm6066_vm10, %v12835_v12 }
 0x590   :  { %9625 = vmatmul.mubr.msk.f32.vlgmr.msra.gmra.mrb[0].mxu1 %vm6066_vm10, %v12839_v19 }
 0x591   :  { %9627 = vmatprep.mubr.msk.f32.mxu1 %vm6066_vm10, %v12843_v44 }
 0x594   :  { %9628 = vmatmul.mubr.msk.f32.gmra.mrb[2].mxu1 %vm6066_vm10, %v12847_v17 }
 0x595   :  { %9630 = vmatprep.mubr.msk.f32.mxu1 %vm6066_vm10, %v12851_v63 }
 0x598   :  { %9631 = vmatmul.mubr.msk.f32.gmra.mrb[4].mxu1 %vm6066_vm10, %v12855_v22 }
 0x599   :  { %9633 = vmatprep.mubr.msk.f32.mxu1 %vm6066_vm10, %v7407_v25 }
 0x59c   :  { %9634 = vmatmul.mubr.msk.f32.gmra.mrb[6].mxu1 %vm6066_vm10, %v8089_v28 }
 0x59d   :  { %9636 = vmatprep.mubr.msk.f32.mxu1 %vm6066_vm10, %v12864_v21 }
 0x5a0   :  { %9637 = vmatmul.mubr.msk.f32.gmra.mrb[8].mxu1 %vm6066_vm10, %v12868_v26 }
 0x5a1   :  { %9639 = vmatprep.mubr.msk.f32.mxu1 %vm6066_vm10, %v12872_v52 }
 0x5a4   :  { %9640 = vmatmul.mubr.msk.f32.gmra.mrb[10].mxu1 %vm6066_vm10, %v12876_v8 }
 0x5a5   :  { %9642 = vmatprep.mubr.msk.f32.mxu1 %vm6066_vm10, %v12880_v20 }
 0x5a8   :  { %9643 = vmatmul.mubr.msk.f32.gmra.mrb[12].mxu1 %vm6066_vm10, %v12884_v6 }
 0x5a9   :  { %9645 = vmatprep.mubr.msk.f32.mxu1 %vm6066_vm10, %v7415_v48 }
 0x5ac   :  { %9646 = vmatmul.mubr.msk.f32.gmra.mrb[14].mxu1 %vm6066_vm10, %v8097_v45 }
 0x663   :  { %v9626_v50 = vpop.f32.mrb[0].mxu1 }
 0x664   :  { %v13076_v37 = vadd.f32 %v9626_v50, %v8872_v36  ;;  %v8214_v43 = vpop.f32.mrb[1].mxu1 }
 0x665   :  { %v13078_v33 = vadd.f32 %v8872_v36, %v8214_v43 }
 0x666   :  { %v8333_v11 = vsel %vm6066_vm10, %v13076_v37, 0.0 }
 0x667   :  { %v8332_v5 = vsel %vm6066_vm10, %v13078_v33, 0.0  ;;  %v9629_v54 = vpop.f32.mrb[2].mxu1 }
 0x668   :  { %v8334_v27 = vadd.f32 %v8333_v11, %v8332_v5  ;;  %v8224_v35 = vpop.f32.mrb[3].mxu1  ;;  %v13084_v2 = vadd.f32 %v9629_v54, %v8872_v36 }
 0x669   :  { %v8318_v9 = vadd.f32 %v8872_v36, %v8224_v35 }
 0x66a   :  { %v8337_v15 = vsel %vm6066_vm10, %v13084_v2, 0.0 }
 0x66b   :  { %v8335_v31 = vsel %vm6066_vm10, %v8318_v9, 0.0  ;;  %v9632_v60 = vpop.f32.mrb[4].mxu1 }
 0x66c   :  { %v8336_v4 = vadd.f32 %v8335_v31, %v8334_v27  ;;  %v8234_v34 = vpop.f32.mrb[5].mxu1  ;;  %v8321_v39 = vadd.f32 %v9632_v60, %v8872_v36 }
 0x66d   :  { %v8320_v47 = vadd.f32 %v8872_v36, %v8234_v34 }
 0x66e   :  { %v8338_v7 = vadd.f32 %v8337_v15, %v8336_v4  ;;  %v8341_v16 = vsel %vm6066_vm10, %v8321_v39, 0.0 }
 0x66f   :  { %v8339_v24 = vsel %vm6066_vm10, %v8320_v47, 0.0  ;;  %v9635_v51 = vpop.f32.mrb[6].mxu1 }
 0x670   :  { %v8340_v18 = vadd.f32 %v8339_v24, %v8338_v7  ;;  %v8244_v62 = vpop.f32.mrb[7].mxu1  ;;  %v8323_v41 = vadd.f32 %v9635_v51, %v8872_v36 }
 0x671   :  { %v8322_v49 = vadd.f32 %v8872_v36, %v8244_v62 }
 0x672   :  { %v8342_v32 = vadd.f32 %v8341_v16, %v8340_v18  ;;  %v8345_v12 = vsel %vm6066_vm10, %v8323_v41, 0.0 }
 0x673   :  { %v8343_v56 = vsel %vm6066_vm10, %v8322_v49, 0.0  ;;  %v9638_v55 = vpop.f32.mrb[8].mxu1 }
 0x674   :  { %v8344_v38 = vadd.f32 %v8343_v56, %v8342_v32  ;;  %v8254_v42 = vpop.f32.mrb[9].mxu1  ;;  %v8325_v19 = vadd.f32 %v9638_v55, %v8872_v36 }
 0x675   :  { %v8324_v44 = vadd.f32 %v8872_v36, %v8254_v42 }
 0x676   :  { %v8346_v17 = vadd.f32 %v8345_v12, %v8344_v38  ;;  %v8349_v21 = vsel %vm6066_vm10, %v8325_v19, 0.0 }
 0x677   :  { %v8347_v63 = vsel %vm6066_vm10, %v8324_v44, 0.0  ;;  %v9641_v1 = vpop.f32.mrb[10].mxu1 }
 0x678   :  { %v8348_v22 = vadd.f32 %v8347_v63, %v8346_v17  ;;  %v8264_v40 = vpop.f32.mrb[11].mxu1  ;;  %v8327_v26 = vadd.f32 %v9641_v1, %v8872_v36 }
 0x679   :  { %v8326_v52 = vadd.f32 %v8872_v36, %v8264_v40 }
 0x67a   :  { %v8350_v8 = vadd.f32 %v8349_v21, %v8348_v22  ;;  %v8353_v59 = vsel %vm6066_vm10, %v8327_v26, 0.0 }
 0x67b   :  { %v8351_v20 = vsel %vm6066_vm10, %v8326_v52, 0.0  ;;  %v9644_v6 = vpop.f32.mrb[12].mxu1 }
 0x67c   :  { %v8352_v0 = vadd.f32 %v8351_v20, %v8350_v8  ;;  %v8274_v13 = vpop.f32.mrb[13].mxu1  ;;  %v8329_v53 = vadd.f32 %v9644_v6, %v8872_v36 }
 0x67d   :  { %v8328_v3 = vadd.f32 %v8872_v36, %v8274_v13 }
 0x67e   :  { %v8354_v46 = vadd.f32 %v8353_v59, %v8352_v0  ;;  %v8357_v61 = vsel %vm6066_vm10, %v8329_v53, 0.0 }
 0x67f   :  { %v8355_v58 = vsel %vm6066_vm10, %v8328_v3, 0.0  ;;  %v9647_v25 = vpop.f32.mrb[14].mxu1 }
 0x680   :  { %v8356_v48 = vadd.f32 %v8355_v58, %v8354_v46  ;;  %v8284_v23 = vpop.f32.mrb[15].mxu1  ;;  %v8331_v30 = vadd.f32 %v9647_v25, %v8872_v36 }
 0x681   :  { %v8330_v14 = vadd.f32 %v8872_v36, %v8284_v23 }
 0x682   :  { %v8358_v29 = vadd.f32 %v8357_v61, %v8356_v48  ;;  %v8361_v50 = vsel %vm6066_vm10, %v8331_v30, 0.0 }
 0x683   :  { %v8359_v28 = vsel %vm6066_vm10, %v8330_v14, 0.0 }
 0x684   :  { %v8360_v45 = vadd.f32 %v8359_v28, %v8358_v29 }
 0x686   :  { %v8362_v43 = vadd.f32 %v8361_v50, %v8360_v45 }
 0x688   :  { %v8363_v11 = vrot.slane %v8362_v43, 4 }
 0x68a   :  { %v8364_v5 = vadd.f32 %v8363_v11, %v8362_v43 }
 0x68c   :  { %v8365_v54 = vrot.slane %v8364_v5, 2 }
 0x68e   :  { %v8366_v27 = vadd.f32 %v8365_v54, %v8364_v5 }
 0x690   :  { %v8367_v35 = vrot.slane %v8366_v27, 1 }
 0x692   :  { %v8368_v31 = vadd.f32 %v8367_v35, %v8366_v27 }
 0x694   :  { %v8369_v60 = vmul.f32 0.0078125, %v8368_v31 }
 0x696   :  { %v13102_v4 = vsub.f32 %v13078_v33, %v8369_v60  ;;  %v13105_v34 = vsub.f32 %v13076_v37, %v8369_v60  ;;  %v13107_v36 = vsub.f32 %v8318_v9, %v8369_v60  ;;  %v13110_v15 = vsub.f32 %v13084_v2, %v8369_v60 }
 0x697   :  { %v13112_v7 = vsub.f32 %v8320_v47, %v8369_v60  ;;  %v13114_v24 = vsub.f32 %v8321_v39, %v8369_v60  ;;  %v13116_v51 = vsub.f32 %v8322_v49, %v8369_v60  ;;  %v13118_v18 = vsub.f32 %v8323_v41, %v8369_v60 }
 0x698   :  { %v13120_v62 = vsub.f32 %v8324_v44, %v8369_v60  ;;  %v13122_v33 = vsub.f32 %v8325_v19, %v8369_v60  ;;  %v13124_v16 = vsub.f32 %v8326_v52, %v8369_v60  ;;  %v13126_v37 = vsub.f32 %v8327_v26, %v8369_v60 }
 0x699   :  { %v13128_v9 = vsub.f32 %v8328_v3, %v8369_v60  ;;  %v13130_v2 = vsub.f32 %v8329_v53, %v8369_v60  ;;  %v13132_v47 = vsub.f32 %v8330_v14, %v8369_v60  ;;  %v13134_v39 = vsub.f32 %v8331_v30, %v8369_v60 }
 0x69a   :  { %v8386_v41 = vmul.f32 %v13102_v4, %v13102_v4  ;;  %v8387_v49 = vmul.f32 %v13105_v34, %v13105_v34  ;;  %v8388_v32 = vmul.f32 %v13107_v36, %v13107_v36  ;;  %v8389_v56 = vmul.f32 %v13110_v15, %v13110_v15 }
 0x69b   :  { %v8390_v12 = vmul.f32 %v13112_v7, %v13112_v7  ;;  %v8391_v17 = vmul.f32 %v13114_v24, %v13114_v24  ;;  %v8392_v22 = vmul.f32 %v13116_v51, %v13116_v51  ;;  %v8393_v26 = vmul.f32 %v13118_v18, %v13118_v18 }
 0x69c   :  { %v8402_v55 = vsel %vm6066_vm10, %v8386_v41, 0.0  ;;  %v8403_v38 = vsel %vm6066_vm10, %v8387_v49, 0.0  ;;  %v8405_v19 = vsel %vm6066_vm10, %v8388_v32, 0.0  ;;  %v8407_v63 = vsel %vm6066_vm10, %v8389_v56, 0.0 }
 0x69d   :  { %v8404_v42 = vadd.f32 %v8403_v38, %v8402_v55  ;;  %v8409_v40 = vsel %vm6066_vm10, %v8390_v12, 0.0  ;;  %v8411_v52 = vsel %vm6066_vm10, %v8391_v17, 0.0  ;;  %v8394_v20 = vmul.f32 %v13120_v62, %v13120_v62 }
 0x69e   :  { %v8413_v6 = vsel %vm6066_vm10, %v8392_v22, 0.0  ;;  %v8395_v13 = vmul.f32 %v13122_v33, %v13122_v33  ;;  %v8415_v59 = vsel %vm6066_vm10, %v8393_v26, 0.0  ;;  %v8396_v3 = vmul.f32 %v13124_v16, %v13124_v16 }
 0x69f   :  { %v8406_v44 = vadd.f32 %v8405_v19, %v8404_v42  ;;  %v8417_v46 = vsel %vm6066_vm10, %v8394_v20, 0.0  ;;  %v8397_v25 = vmul.f32 %v13126_v37, %v13126_v37  ;;  %v8398_v61 = vmul.f32 %v13128_v9, %v13128_v9 }
 0x6a0   :  { %v8419_v48 = vsel %vm6066_vm10, %v8395_v13, 0.0  ;;  %v8421_v30 = vsel %vm6066_vm10, %v8396_v3, 0.0  ;;  %v8399_v29 = vmul.f32 %v13130_v2, %v13130_v2  ;;  %v8400_v50 = vmul.f32 %v13132_v47, %v13132_v47 }
 0x6a1   :  { %v8408_v1 = vadd.f32 %v8407_v63, %v8406_v44  ;;  %v8423_v28 = vsel %vm6066_vm10, %v8397_v25, 0.0  ;;  %v8425_v43 = vsel %vm6066_vm10, %v8398_v61, 0.0  ;;  %v8401_v5 = vmul.f32 %v13134_v39, %v13134_v39  ;;  %v8440_v44 = vld [vmem:[%s13279_s7] sm:$0x1] }
 0x6a2   :  { %v8427_v54 = vsel %vm6066_vm10, %v8399_v29, 0.0  ;;  %v8429_v35 = vsel %vm6066_vm10, %v8400_v50, 0.0 }
 0x6a3   :  { %v8410_v21 = vadd.f32 %v8409_v40, %v8408_v1  ;;  %v8431_v60 = vsel %vm6066_vm10, %v8401_v5, 0.0 }
 0x6a5   :  { %v8412_v8 = vadd.f32 %v8411_v52, %v8410_v21 }
 0x6a7   :  { %v8414_v0 = vadd.f32 %v8413_v6, %v8412_v8 }
 0x6a9   :  { %v8416_v53 = vadd.f32 %v8415_v59, %v8414_v0 }
 0x6ab   :  { %v8418_v58 = vadd.f32 %v8417_v46, %v8416_v53 }
 0x6ad   :  { %v8420_v23 = vadd.f32 %v8419_v48, %v8418_v58 }
 0x6af   :  { %v8422_v14 = vadd.f32 %v8421_v30, %v8420_v23 }
 0x6b1   :  { %v8424_v45 = vadd.f32 %v8423_v28, %v8422_v14 }
 0x6b3   :  { %v8426_v11 = vadd.f32 %v8425_v43, %v8424_v45 }
 0x6b5   :  { %v8428_v27 = vadd.f32 %v8427_v54, %v8426_v11 }
 0x6b7   :  { %v8430_v31 = vadd.f32 %v8429_v35, %v8428_v27 }
 0x6b9   :  { %v8432_v41 = vadd.f32 %v8431_v60, %v8430_v31 }
 0x6bb   :  { %v8433_v49 = vrot.slane %v8432_v41, 4 }
 0x6bd   :  { %v8434_v32 = vadd.f32 %v8433_v49, %v8432_v41 }
 0x6bf   :  { %v8435_v56 = vrot.slane %v8434_v32, 2 }
 0x6c1   :  { %v8436_v55 = vadd.f32 %v8435_v56, %v8434_v32 }
 0x6c3   :  { %v8437_v38 = vrot.slane %v8436_v55, 1 }
 0x6c5   :  { %v8438_v42 = vadd.f32 %v8437_v38, %v8436_v55 }
 0x6c7   :  { %v8439_v12 = vmul.f32 0.0078125, %v8438_v42 }
 0x6c9   :  { %v8441_v19 = vadd.f32 1e-05, %v8439_v12 }
 0x6cb   :  { %9972 = vrsqrt.f32 %v8441_v19 }
 0x6d5   :  { %v9973_v17 = vpop.eup %9972 }
 0x6d6   :  { %v8443_v63 = vmul.f32 %v9973_v17, %v8440_v44 }
 0x6d8   :  { %v8448_v1 = vrot.slane %v8443_v63, %v6182_v57 }
 0x6da   :  { %v8450_v22 = vmul.f32 %v8448_v1, %v13102_v4  ;;  %v8451_v40 = vmul.f32 %v8448_v1, %v13105_v34  ;;  %v8452_v21 = vmul.f32 %v8448_v1, %v13107_v36  ;;  %v8453_v26 = vmul.f32 %v8448_v1, %v13110_v15 }
 0x6db   :  { %v8454_v52 = vmul.f32 %v8448_v1, %v13112_v7  ;;  %v8455_v8 = vmul.f32 %v8448_v1, %v13114_v24  ;;  %v8456_v20 = vmul.f32 %v8448_v1, %v13116_v51  ;;  %v8457_v6 = vmul.f32 %v8448_v1, %v13118_v18 }
 0x6dc   :  { %v8458_v57 = vmul.f32 %v8448_v1, %v13120_v62  ;;  %v8459_v4 = vmul.f32 %v8448_v1, %v13122_v33  ;;  %v8460_v34 = vmul.f32 %v8448_v1, %v13124_v16  ;;  %v8461_v36 = vmul.f32 %v8448_v1, %v13126_v37 }
 0x6dd   :  { %v8462_v15 = vmul.f32 %v8448_v1, %v13128_v9  ;;  %v8463_v7 = vmul.f32 %v8448_v1, %v13130_v2  ;;  %v8464_v24 = vmul.f32 %v8448_v1, %v13132_v47  ;;  %v8465_v51 = vmul.f32 %v8448_v1, %v13134_v39 }
 0x6de   :  { %v8473_v18 = vadd.f32 %v8873_v10, %v8450_v22  ;;  %v8474_v0 = vadd.f32 %v8873_v10, %v8451_v40  ;;  %v8475_v13 = vadd.f32 %v8873_v10, %v8452_v21  ;;  %v8476_v59 = vadd.f32 %v8873_v10, %v8453_v26 }
 0x6df   :  { %v8477_v53 = vadd.f32 %v8873_v10, %v8454_v52  ;;  %v8478_v62 = vadd.f32 %v8873_v10, %v8455_v8  ;;  %v8479_v3 = vadd.f32 %v8873_v10, %v8456_v20  ;;  %v8480_v33 = vadd.f32 %v8873_v10, %v8457_v6 }
 0x6e0   :  { %v8481_v46 = vadd.f32 %v8873_v10, %v8458_v57  ;;  %v8482_v16 = vadd.f32 %v8873_v10, %v8459_v4  ;;  %v8483_v58 = vadd.f32 %v8873_v10, %v8460_v34  ;;  %v8484_v37 = vadd.f32 %v8873_v10, %v8461_v36 }
 0x6e1   :  { %v8485_v25 = vadd.f32 %v8873_v10, %v8462_v15  ;;  %v8486_v9 = vadd.f32 %v8873_v10, %v8463_v7  ;;  %v8487_v48 = vadd.f32 %v8873_v10, %v8464_v24  ;;  %v8488_v2 = vadd.f32 %v8873_v10, %v8465_v51 }
 0x6e2   :  { %v8489_v23 = vmax.f32 %v8473_v18, 0.0  ;;  %v8490_v47 = vmax.f32 %v8474_v0, 0.0  ;;  %v8491_v61 = vmax.f32 %v8475_v13, 0.0  ;;  %v8492_v39 = vmax.f32 %v8476_v59, 0.0 }
 0x6e3   :  { %v8493_v30 = vmax.f32 %v8477_v53, 0.0  ;;  %v8494_v14 = vmax.f32 %v8478_v62, 0.0  ;;  %v8495_v29 = vmax.f32 %v8479_v3, 0.0  ;;  %v8496_v28 = vmax.f32 %v8480_v33, 0.0 }
 0x6e4   :  { %v8497_v45 = vmax.f32 %v8481_v46, 0.0  ;;  %v8498_v50 = vmax.f32 %v8482_v16, 0.0  ;;  %v8499_v43 = vmax.f32 %v8483_v58, 0.0  ;;  %v8500_v11 = vmax.f32 %v8484_v37, 0.0  ;;  %8505 = vst.msk [vmem:[%s13281_s9] sm:$0xff] %vm6066_vm10, %v8489_v23  ;;  %8506 = vst.msk [vmem:[%s13281_s9 + $0x8] sm:$0xff] %vm6066_vm10, %v8490_v47 }
 0x6e5   :  { %8507 = vst.msk [vmem:[%s13281_s9 + $0x10] sm:$0xff] %vm6066_vm10, %v8491_v61  ;;  %8508 = vst.msk [vmem:[%s13281_s9 + $0x18] sm:$0xff] %vm6066_vm10, %v8492_v39  ;;  %v8501_v5 = vmax.f32 %v8485_v25, 0.0  ;;  %v8502_v54 = vmax.f32 %v8486_v9, 0.0  ;;  %v8503_v27 = vmax.f32 %v8487_v48, 0.0  ;;  %v8504_v35 = vmax.f32 %v8488_v2, 0.0 }
 0x6e6   :  { %8509 = vst.msk [vmem:[%s13281_s9 + $0x20] sm:$0xff] %vm6066_vm10, %v8493_v30  ;;  %8510 = vst.msk [vmem:[%s13281_s9 + $0x28] sm:$0xff] %vm6066_vm10, %v8494_v14 }
 0x6e7   :  { %8511 = vst.msk [vmem:[%s13281_s9 + $0x30] sm:$0xff] %vm6066_vm10, %v8495_v29  ;;  %8512 = vst.msk [vmem:[%s13281_s9 + $0x38] sm:$0xff] %vm6066_vm10, %v8496_v28 }
 0x6e8   :  { %8513 = vst.msk [vmem:[%s13281_s9 + $0x40] sm:$0xff] %vm6066_vm10, %v8497_v45  ;;  %8514 = vst.msk [vmem:[%s13281_s9 + $0x48] sm:$0xff] %vm6066_vm10, %v8498_v50 }
 0x6e9   :  { %8515 = vst.msk [vmem:[%s13281_s9 + $0x50] sm:$0xff] %vm6066_vm10, %v8499_v43  ;;  %8516 = vst.msk [vmem:[%s13281_s9 + $0x58] sm:$0xff] %vm6066_vm10, %v8500_v11 }
 0x6ea   :  { %8517 = vst.msk [vmem:[%s13281_s9 + $0x60] sm:$0xff] %vm6066_vm10, %v8501_v5  ;;  %8518 = vst.msk [vmem:[%s13281_s9 + $0x68] sm:$0xff] %vm6066_vm10, %v8502_v54 }
 0x6eb   :  { %8519 = vst.msk [vmem:[%s13281_s9 + $0x70] sm:$0xff] %vm6066_vm10, %v8503_v27  ;;  %8520 = vst.msk [vmem:[%s13281_s9 + $0x78] sm:$0xff] %vm6066_vm10, %v8504_v35 }

</bundles_post_ra>
